<compile_context>
chip_gen: v7x
topology: tpu7x:2x2x1
jax: 0.10.0
libtpu: 0.0.40
codegen_flags: <defaults>
</compile_context>

<pallas_src>
import functools

import jax
import jax.numpy as jnp
import numpy as np
from jax.experimental import pallas as pl
from jax.experimental.pallas import tpu as pltpu


# ----------------------------------------------------------------------------
# Pooler (ROIAlign) -- vectorized plain-JAX glue.
# ----------------------------------------------------------------------------
def roi_align_nhwc(features_nchw, rois, spatial_scale, resolution, sampling_ratio):
    """ROIAlign.  features: (B, C, H, W) NCHW; rois: (N, 5) [batch_idx, x1, y1, x2, y2].

    Returns pooled ROI features (N, R, R, C) in NHWC.  Bilinear sampling is
    expressed as two dense interpolation matrices per ROI (no pointwise
    gathers), so it maps onto batched matmuls on TPU.
    """
    # TODO(synk): multi-level FPN LevelMapper not implemented (single pooler level).
    # TODO(synk): adaptive sampling ratio (POOLER_SAMPLING_RATIO <= 0) not implemented.
    # TODO(synk): at production FPN sizes this dense-interp einsum over the full
    #   feature map dominates wall clock; window to the ROI bbox or implement a
    #   Pallas DMA-windowed pooler before scaling up.
    B, C, H, W = features_nchw.shape
    R = resolution
    sr = sampling_ratio
    S = R * sr

    def interp_matrix(coords, size):
        # ROIAlign CUDA semantics: a sample is zero iff coord < -1 or coord > size,
        # otherwise clamp to [0, size-1] and bilinear-interpolate.
        valid = (coords >= -1.0) & (coords <= float(size))
        c = jnp.clip(coords, 0.0, float(size - 1))
        c0 = jnp.floor(c)
        lo = c0.astype(jnp.int32)
        hi = jnp.minimum(lo + 1, size - 1)
        f = c - c0
        grid = jnp.arange(size, dtype=jnp.int32)[None, :]                 # (1, size)
        w_lo = (1.0 - f)[:, None] * (grid == lo[:, None]).astype(jnp.float32)
        w_hi = f[:, None] * (grid == hi[:, None]).astype(jnp.float32)
        return (w_lo + w_hi) * valid[:, None].astype(jnp.float32)         # (S, size)

    def one(roi):
        feat = jnp.take(features_nchw, roi[0].astype(jnp.int32), axis=0)  # (C, H, W)
        x1, y1 = roi[1] * spatial_scale, roi[2] * spatial_scale
        x2, y2 = roi[3] * spatial_scale, roi[4] * spatial_scale
        roi_w = jnp.maximum(x2 - x1, 1.0)
        roi_h = jnp.maximum(y2 - y1, 1.0)
        frac = (jnp.arange(S, dtype=jnp.float32) + 0.5) / sr              # bin units
        ys = y1 + frac * (roi_h / R)
        xs = x1 + frac * (roi_w / R)
        My = interp_matrix(ys, H)                                         # (S, H)
        Mx = interp_matrix(xs, W)                                         # (S, W)
        samples = jnp.einsum("yh,chw,xw->cyx", My, feat, Mx)              # (C, S, S)
        pooled = samples.reshape(C, R, sr, R, sr).mean(axis=(2, 4))       # (C, R, R)
        return jnp.transpose(pooled, (1, 2, 0))                           # (R, R, C)

    return jax.vmap(one)(rois)


# ----------------------------------------------------------------------------
# Offline parameter folding (runs once, outside the hot path).
# ----------------------------------------------------------------------------
def fold_params(conv_ws, conv_bs, fc_w, fc_b, resolution, dilation, lane=128):
    """Fold conv / fc weights into the layouts the fused kernel consumes.

    * Each 3x3 conv (PyTorch OIHW weight) becomes ONE band matrix of shape
      (3*R*Cin, R*Cout): the vertical taps live in the contraction (K)
      dimension and the whole horizontal convolution (all kx taps + implicit
      horizontal zero padding) is folded into the band, so a conv layer is a
      single MXU matmul (K = 192 / 384 here) instead of 3 accumulated small
      matmuls.
    * Conv biases are tiled across the R x-positions -> (1, R*Cout).
    * The fc6 weight gets the PyTorch NCHW x.view(N, -1) permutation folded in
      and is reshaped to (R*R*Cout, rep) so fc6 is ONE matmul.  rep is padded
      up to a multiple of 128 (zero columns / zero bias) so the kernel's output
      stores are full-lane; the wrapper slices the padding off.
    """
    R = resolution
    wbands, btiles = [], []
    for w, b in zip(conv_ws, conv_bs):
        w = np.asarray(w, np.float32)                        # (Co, Ci, 3, 3)
        co, ci, kh, kw = w.shape
        band = np.zeros((kh, R, ci, R, co), np.float32)      # [ky, x_in, ci, x_out, co]
        for ky in range(kh):
            for kx in range(kw):
                off = (kx - (kw - 1) // 2) * dilation        # padding == dilation
                for xo in range(R):
                    xi = xo + off
                    if 0 <= xi < R:
                        band[ky, xi, :, xo, :] = w[:, :, ky, kx].T
        wbands.append(jnp.asarray(band.reshape(kh * R * ci, R * co)))
        btiles.append(jnp.asarray(np.tile(np.asarray(b, np.float32), R)[None, :]))

    rep, d_in = np.asarray(fc_w).shape
    co_last = conv_ws[-1].shape[0]
    assert d_in == co_last * R * R
    wf = np.asarray(fc_w, np.float32).reshape(rep, co_last, R, R)      # [r, c, h, w]
    wf = np.transpose(wf, (2, 3, 1, 0)).reshape(R * R * co_last, rep)  # [(h,x,c), r]
    fcb = np.asarray(fc_b, np.float32)
    rep_pad = ((rep + lane - 1) // lane) * lane
    if rep_pad != rep:                                       # lane-dense output stores
        wf = np.pad(wf, ((0, 0), (0, rep_pad - rep)))
        fcb = np.pad(fcb, (0, rep_pad - rep))
    return wbands, btiles, jnp.asarray(wf), jnp.asarray(fcb[None, :])


# ----------------------------------------------------------------------------
# Fused Pallas kernel: stacked 3x3 conv + ReLU  ->  NCHW flatten  ->  fc6 + ReLU
# ----------------------------------------------------------------------------
def _fused_xconv_fc_kernel(*refs, num_layers, res, dilation, compute_dtype):
    x_ref = refs[0]                                    # (tn, res, res*Cin)   compute_dtype
    layer_refs = refs[1:1 + 2 * num_layers]            # per layer: band W (cd), bias (f32)
    wf_ref = refs[1 + 2 * num_layers]                  # (res*res*Co, rep_pad) compute_dtype
    fcb_ref = refs[2 + 2 * num_layers]                 # (1, rep_pad)               f32
    o_ref = refs[3 + 2 * num_layers]                   # (tn, rep_pad)              f32

    d = dilation
    act = x_ref[...]                                   # (tn, res, res*Cin)
    tn = act.shape[0]

    for l in range(num_layers):
        w_ref = layer_refs[2 * l]                      # (3*res*Ci, res*Co)
        b_ref = layer_refs[2 * l + 1]                  # (1, res*Co)
        lc_in = act.shape[-1]
        lc_out = b_ref.shape[1]

        # Vertical taps built functionally (no VMEM halo scratch round trip):
        #   up[:, y, :]   = act[:, y-d, :]   (zero rows at the top border)
        #   down[:, y, :] = act[:, y+d, :]   (zero rows at the bottom border)
        # i.e. the conv's vertical zero padding is the zero border rows.
        zrows = jnp.zeros((tn, d, lc_in), act.dtype)
        up = jnp.concatenate([zrows, act[:, :res - d, :]], axis=1)
        down = jnp.concatenate([act[:, d:, :], zrows], axis=1)

        # Fold the 3 vertical taps into the contraction dim: the whole 3x3 conv
        # (horizontal taps + horizontal padding already folded into the band
        # weight offline) is ONE MXU matmul with K = 3*res*Cin.
        lhs = jnp.concatenate([up, act, down], axis=-1)            # (tn, res, 3*lc_in)
        lhs = lhs.reshape(tn * res, 3 * lc_in)
        out = jnp.dot(lhs, w_ref[...], preferred_element_type=jnp.float32)

        # Bias + ReLU in f32; store the next layer's activation in compute
        # dtype (halves activation traffic, no per-tap casts).
        act = jnp.maximum(out + b_ref[...], 0.0).astype(compute_dtype)
        act = act.reshape(tn, res, lc_out)

    # fc6 + ReLU as ONE matmul: the NCHW x.view(N,-1) flatten permutation is
    # folded into wf offline, and rep is padded to a multiple of 128 so the
    # output store below is full-lane (unmasked vst).
    act_flat = act.reshape(tn, res * act.shape[-1])                # (tn, res*res*Co)
    y = jnp.dot(act_flat, wf_ref[...], preferred_element_type=jnp.float32)
    o_ref[...] = jnp.maximum(y + fcb_ref[...], 0.0)


def xconvs_fc_fused(pooled_nhwc, wbands, btiles, wf, fcb, *, out_dim, dilation,
                    tile_n=64, compute_dtype=jnp.bfloat16):
    """Fused xconvs (conv3x3+ReLU stack) -> NCHW flatten -> fc6 -> ReLU.

    tile_n notes:
      * v5e / v6e (single TensorCore): the grid is a serial loop; prefer a
        larger tile_n (128-256, VMEM permitting) so fewer ~0.35us grid steps.
      * v7x (2 TensorCores): keep n_pad/tile_n >= 2 (ideally >= 4) so the
        "parallel" ROI axis actually feeds both cores.
    """
    # TODO(synk): USE_GN (GroupNorm between conv and ReLU) path not implemented.
    # TODO(synk): weights are held fully VMEM-resident (constant index_map),
    #   which only works at small sizes.  At production CONV_HEAD_DIM/R the
    #   folded bands exceed the VMEM budget (esp. v7x 64 MiB): stream Cout
    #   tiles via a real grid axis / index_map (or memory_space=pl.ANY + a
    #   one-time DMA) and set vmem_limit_bytes in CompilerParams before
    #   scaling this up.
    n, res, res2, c0 = pooled_nhwc.shape
    assert res2 == res
    num_layers = len(wbands)
    rep_pad = wf.shape[-1]

    # Lane-dense activation layout: rows = (roi, y), lanes = (x, channel).
    # Cast once here: the kernel's input DMA and all matmul operands are in
    # compute_dtype; accumulation, bias and ReLU stay f32 inside the kernel.
    x = pooled_nhwc.reshape(n, res, res * c0).astype(compute_dtype)

    tile_n = max(8, (min(tile_n, ((n + 7) // 8) * 8) // 8) * 8)
    n_pad = pl.cdiv(n, tile_n) * tile_n
    if n_pad != n:
        x = jnp.concatenate(
            [x, jnp.zeros((n_pad - n, res, res * c0), x.dtype)], axis=0)

    wbands = [w.astype(compute_dtype) for w in wbands]
    wf = wf.astype(compute_dtype)

    in_specs = [pl.BlockSpec((tile_n, res, res * c0), lambda i: (i, 0, 0))]
    args = [x]
    for wb, bt in zip(wbands, btiles):
        in_specs.append(pl.BlockSpec(wb.shape, lambda i: (0, 0)))
        in_specs.append(pl.BlockSpec(bt.shape, lambda i: (0, 0)))
        args += [wb, bt]
    in_specs.append(pl.BlockSpec(wf.shape, lambda i: (0, 0)))
    in_specs.append(pl.BlockSpec(fcb.shape, lambda i: (0, 0)))
    args += [wf, fcb]

    kernel = functools.partial(
        _fused_xconv_fc_kernel, num_layers=num_layers, res=res,
        dilation=dilation, compute_dtype=compute_dtype)

    out = pl.pallas_call(
        kernel,
        out_shape=jax.ShapeDtypeStruct((n_pad, rep_pad), jnp.float32),
        grid=(n_pad // tile_n,),
        in_specs=in_specs,
        out_specs=pl.BlockSpec((tile_n, rep_pad), lambda i: (i, 0)),
        # ROI-tile axis is embarrassingly parallel -> shards across both
        # TensorCores on v7x; harmless no-op on v5e/v6e.
        compiler_params=pltpu.CompilerParams(dimension_semantics=("parallel",)),
    )(*args)
    return out[:n, :out_dim]


# ----------------------------------------------------------------------------
# Full forward pass of FPNXconv1fcFeatureExtractor
# ----------------------------------------------------------------------------
def fpn_xconv1fc_forward(features, rois, folded_params, *, out_dim, spatial_scale,
                         resolution, sampling_ratio, dilation, tile_n=64,
                         compute_dtype=jnp.bfloat16):
    pooled = roi_align_nhwc(features, rois, spatial_scale, resolution,
                            sampling_ratio)
    return xconvs_fc_fused(pooled, *folded_params, out_dim=out_dim,
                           dilation=dilation, tile_n=tile_n,
                           compute_dtype=compute_dtype)


# ----------------------------------------------------------------------------
# Pure-JAX reference head (unfolded weights) for correctness checking.
# ----------------------------------------------------------------------------
def reference_head(pooled_nhwc, conv_ws, conv_bs, fc_w, fc_b, dilation):
    x = pooled_nhwc
    for w, b in zip(conv_ws, conv_bs):
        x = jax.lax.conv_general_dilated(
            x, jnp.transpose(w, (2, 3, 1, 0)), (1, 1),
            [(dilation, dilation), (dilation, dilation)],
            rhs_dilation=(dilation, dilation),
            dimension_numbers=("NHWC", "HWIO", "NHWC"),
            precision=jax.lax.Precision.HIGHEST)
        x = jnp.maximum(x + b[None, None, None, :], 0.0)
    xf = jnp.transpose(x, (0, 3, 1, 2)).reshape(x.shape[0], -1)   # NCHW flatten
    y = jnp.dot(xf, fc_w.T, precision=jax.lax.Precision.HIGHEST) + fc_b[None, :]
    return jnp.maximum(y, 0.0)


if __name__ == "__main__":
    # cfg-equivalent hyperparameters (small synthetic config)
    B, Cin, H, W = 2, 8, 32, 32            # FPN feature map (NCHW)
    resolution = 8                         # POOLER_RESOLUTION
    spatial_scale = 0.25                   # POOLER_SCALES (single level)
    sampling_ratio = 2                     # POOLER_SAMPLING_RATIO
    conv_head_dim = 16                     # CONV_HEAD_DIM
    num_stacked_convs = 2                  # NUM_STACKED_CONVS
    dilation = 1                           # DILATION
    mlp_head_dim = 32                      # MLP_HEAD_DIM
    n_rois = 128                           # 2 grid steps at tile_n=64 (feeds both v7x TCs)

    key = jax.random.PRNGKey(0)
    k_feat, k_box, k_fc, *k_conv = jax.random.split(key, 3 + num_stacked_convs)

    features = jax.random.normal(k_feat, (B, Cin, H, W), jnp.float32)

    # rois: (N, 5) = [batch_idx, x1, y1, x2, y2] in image coords (image 128x128).
    cxy = jax.random.uniform(k_box, (n_rois, 2), minval=8.0, maxval=120.0)
    wh = jax.random.uniform(jax.random.fold_in(k_box, 1), (n_rois, 2),
                            minval=8.0, maxval=64.0)
    x1y1 = jnp.maximum(cxy - wh / 2.0, 0.0)
    x2y2 = jnp.minimum(cxy + wh / 2.0, 127.0)
    bidx = (jnp.arange(n_rois) % B).astype(jnp.float32)[:, None]
    rois = jnp.concatenate([bidx, x1y1, x2y2], axis=1)

    # Parameters (module shapes; small random biases to exercise the bias path;
    # the real module inits conv weight std=0.01, bias=0 when USE_GN is False).
    conv_ws, conv_bs = [], []
    cin = Cin
    for i in range(num_stacked_convs):
        conv_ws.append(0.01 * jax.random.normal(
            k_conv[i], (conv_head_dim, cin, 3, 3), jnp.float32))
        conv_bs.append(0.01 * jax.random.normal(
            jax.random.fold_in(k_conv[i], 7), (conv_head_dim,), jnp.float32))
        cin = conv_head_dim
    d_in = conv_head_dim * resolution * resolution
    fc_w = jax.random.normal(k_fc, (mlp_head_dim, d_in),
                             jnp.float32) / jnp.sqrt(float(d_in))
    fc_b = 0.01 * jax.random.normal(jax.random.fold_in(k_fc, 7),
                                    (mlp_head_dim,), jnp.float32)

    folded = fold_params(conv_ws, conv_bs, fc_w, fc_b, resolution, dilation)

    # --- correctness check (f32 kernel vs pure-JAX reference on same pooled) ---
    pooled = roi_align_nhwc(features, rois, spatial_scale, resolution,
                            sampling_ratio)
    ref = reference_head(pooled, conv_ws, conv_bs, fc_w, fc_b, dilation)
    out_f32 = jax.block_until_ready(
        xconvs_fc_fused(pooled, *folded, out_dim=mlp_head_dim,
                        dilation=dilation, tile_n=64,
                        compute_dtype=jnp.float32))
    assert out_f32.shape == (n_rois, mlp_head_dim), out_f32.shape
    assert bool(jnp.allclose(out_f32, ref, rtol=5e-2, atol=5e-4))

    # --- production path: full pipeline, bf16 matmuls, f32 accumulation ---
    fwd = jax.jit(functools.partial(
        fpn_xconv1fc_forward, out_dim=mlp_head_dim, spatial_scale=spatial_scale,
        resolution=resolution, sampling_ratio=sampling_ratio,
        dilation=dilation, tile_n=64, compute_dtype=jnp.bfloat16))
    out = jax.block_until_ready(fwd(features, rois, folded))

    assert out.shape == (n_rois, mlp_head_dim), out.shape
    assert out.dtype == jnp.float32
    assert bool(jnp.all(jnp.isfinite(out)))
    assert bool(jnp.all(out >= 0.0))                   # ReLU output
    assert bool(jnp.allclose(out, ref, rtol=0.2, atol=2e-3))
    print("KERNEL_OK")
</pallas_src>

<mosaic_0001>
module attributes {stable_mosaic.version = 11 : i64} {
  func.func @_fused_xconv_fc_kernel(%arg0: i32, %arg1: memref<64x8x64xf32, #tpu.memory_space<vmem>>, %arg2: memref<192x128xf32, #tpu.memory_space<vmem>>, %arg3: memref<1x128xf32, #tpu.memory_space<vmem>>, %arg4: memref<384x128xf32, #tpu.memory_space<vmem>>, %arg5: memref<1x128xf32, #tpu.memory_space<vmem>>, %arg6: memref<1024x128xf32, #tpu.memory_space<vmem>>, %arg7: memref<1x128xf32, #tpu.memory_space<vmem>>, %arg8: memref<64x128xf32, #tpu.memory_space<vmem>>) attributes {dimension_semantics = [#tpu.dimension_semantics<parallel>], iteration_bounds = array<i64: 2>, scalar_prefetch = 0 : i64, scratch_operands = 0 : i64, tpu.core_type = #tpu.core_type<tc>, window_params = [{transform_indices = @transform_0, window_bounds = array<i64: 64, 8, 64>}, {pipeline_mode = #tpu.pipeline_mode<synchronous>, transform_indices = @transform_1, window_bounds = array<i64: 192, 128>}, {pipeline_mode = #tpu.pipeline_mode<synchronous>, transform_indices = @transform_2, window_bounds = array<i64: 1, 128>}, {pipeline_mode = #tpu.pipeline_mode<synchronous>, transform_indices = @transform_3, window_bounds = array<i64: 384, 128>}, {pipeline_mode = #tpu.pipeline_mode<synchronous>, transform_indices = @transform_4, window_bounds = array<i64: 1, 128>}, {pipeline_mode = #tpu.pipeline_mode<synchronous>, transform_indices = @transform_5, window_bounds = array<i64: 1024, 128>}, {pipeline_mode = #tpu.pipeline_mode<synchronous>, transform_indices = @transform_6, window_bounds = array<i64: 1, 128>}, {transform_indices = @transform_7, window_bounds = array<i64: 64, 128>}]} {
    %c0 = arith.constant 0 : index
    %c0_0 = arith.constant 0 : index
    %c0_1 = arith.constant 0 : index
    %0 = vector.load %arg1[%c0, %c0_0, %c0_1] : memref<64x8x64xf32, #tpu.memory_space<vmem>>, vector<64x8x64xf32>
    %cst = arith.constant 0.000000e+00 : f32
    %1 = vector.broadcast %cst : f32 to vector<64x1x64xf32>
    %2 = vector.extract_strided_slice %0 {offsets = [0, 0, 0], sizes = [64, 7, 64], strides = [1, 1, 1]} : vector<64x8x64xf32> to vector<64x7x64xf32>
    %3 = tpu.concatenate %1, %2 in 1 : vector<64x1x64xf32>, vector<64x7x64xf32> -> vector<64x8x64xf32>
    %4 = vector.extract_strided_slice %0 {offsets = [0, 1, 0], sizes = [64, 7, 64], strides = [1, 1, 1]} : vector<64x8x64xf32> to vector<64x7x64xf32>
    %5 = tpu.concatenate %4, %1 in 1 : vector<64x7x64xf32>, vector<64x1x64xf32> -> vector<64x8x64xf32>
    %6 = tpu.concatenate %3, %0, %5 in 2 : vector<64x8x64xf32>, vector<64x8x64xf32>, vector<64x8x64xf32> -> vector<64x8x192xf32>
    %7 = vector.shape_cast %6 : vector<64x8x192xf32> to vector<512x192xf32>
    %c0_2 = arith.constant 0 : index
    %c0_3 = arith.constant 0 : index
    %8 = vector.load %arg2[%c0_2, %c0_3] : memref<192x128xf32, #tpu.memory_space<vmem>>, vector<192x128xf32>
    %cst_4 = arith.constant dense<0.000000e+00> : vector<512x128xf32>
    %9 = tpu.matmul %7, %8, %cst_4 {dimension_numbers = #tpu.dot_dimension_numbers<[1], [0], [0], [1], [0, 0, 1, 1], [], []>} : vector<512x192xf32>, vector<192x128xf32>, vector<512x128xf32> -> vector<512x128xf32>
    %c0_5 = arith.constant 0 : index
    %c0_6 = arith.constant 0 : index
    %10 = vector.load %arg3[%c0_5, %c0_6] : memref<1x128xf32, #tpu.memory_space<vmem>>, vector<1x128xf32>
    %11 = vector.broadcast %10 : vector<1x128xf32> to vector<512x128xf32>
    %12 = arith.addf %9, %11 : vector<512x128xf32>
    %cst_7 = arith.constant 0.000000e+00 : f32
    %13 = vector.broadcast %cst_7 : f32 to vector<512x128xf32>
    %14 = arith.maximumf %12, %13 : vector<512x128xf32>
    %15 = vector.shape_cast %14 : vector<512x128xf32> to vector<64x8x128xf32>
    %cst_8 = arith.constant 0.000000e+00 : f32
    %16 = vector.broadcast %cst_8 : f32 to vector<64x1x128xf32>
    %17 = vector.extract_strided_slice %15 {offsets = [0, 0, 0], sizes = [64, 7, 128], strides = [1, 1, 1]} : vector<64x8x128xf32> to vector<64x7x128xf32>
    %18 = tpu.concatenate %16, %17 in 1 : vector<64x1x128xf32>, vector<64x7x128xf32> -> vector<64x8x128xf32>
    %19 = vector.extract_strided_slice %15 {offsets = [0, 1, 0], sizes = [64, 7, 128], strides = [1, 1, 1]} : vector<64x8x128xf32> to vector<64x7x128xf32>
    %20 = tpu.concatenate %19, %16 in 1 : vector<64x7x128xf32>, vector<64x1x128xf32> -> vector<64x8x128xf32>
    %21 = tpu.concatenate %18, %15, %20 in 2 : vector<64x8x128xf32>, vector<64x8x128xf32>, vector<64x8x128xf32> -> vector<64x8x384xf32>
    %22 = vector.shape_cast %21 : vector<64x8x384xf32> to vector<512x384xf32>
    %c0_9 = arith.constant 0 : index
    %c0_10 = arith.constant 0 : index
    %23 = vector.load %arg4[%c0_9, %c0_10] : memref<384x128xf32, #tpu.memory_space<vmem>>, vector<384x128xf32>
    %cst_11 = arith.constant dense<0.000000e+00> : vector<512x128xf32>
    %24 = tpu.matmul %22, %23, %cst_11 {dimension_numbers = #tpu.dot_dimension_numbers<[1], [0], [0], [1], [0, 0, 1, 1], [], []>} : vector<512x384xf32>, vector<384x128xf32>, vector<512x128xf32> -> vector<512x128xf32>
    %c0_12 = arith.constant 0 : index
    %c0_13 = arith.constant 0 : index
    %25 = vector.load %arg5[%c0_12, %c0_13] : memref<1x128xf32, #tpu.memory_space<vmem>>, vector<1x128xf32>
    %26 = vector.broadcast %25 : vector<1x128xf32> to vector<512x128xf32>
    %27 = arith.addf %24, %26 : vector<512x128xf32>
    %cst_14 = arith.constant 0.000000e+00 : f32
    %28 = vector.broadcast %cst_14 : f32 to vector<512x128xf32>
    %29 = arith.maximumf %27, %28 : vector<512x128xf32>
    %30 = vector.shape_cast %29 : vector<512x128xf32> to vector<64x8x128xf32>
    %31 = vector.shape_cast %30 : vector<64x8x128xf32> to vector<64x1024xf32>
    %c0_15 = arith.constant 0 : index
    %c0_16 = arith.constant 0 : index
    %32 = vector.load %arg6[%c0_15, %c0_16] : memref<1024x128xf32, #tpu.memory_space<vmem>>, vector<1024x128xf32>
    %cst_17 = arith.constant dense<0.000000e+00> : vector<64x128xf32>
    %33 = tpu.matmul %31, %32, %cst_17 {dimension_numbers = #tpu.dot_dimension_numbers<[1], [0], [0], [1], [0, 0, 1, 1], [], []>} : vector<64x1024xf32>, vector<1024x128xf32>, vector<64x128xf32> -> vector<64x128xf32>
    %c0_18 = arith.constant 0 : index
    %c0_19 = arith.constant 0 : index
    %34 = vector.load %arg7[%c0_18, %c0_19] : memref<1x128xf32, #tpu.memory_space<vmem>>, vector<1x128xf32>
    %35 = vector.broadcast %34 : vector<1x128xf32> to vector<64x128xf32>
    %36 = arith.addf %33, %35 : vector<64x128xf32>
    %cst_20 = arith.constant 0.000000e+00 : f32
    %37 = vector.broadcast %cst_20 : f32 to vector<64x128xf32>
    %38 = arith.maximumf %36, %37 : vector<64x128xf32>
    %c0_21 = arith.constant 0 : index
    %c0_22 = arith.constant 0 : index
    %39 = vector.load %arg8[%c0_21, %c0_22] : memref<64x128xf32, #tpu.memory_space<vmem>>, vector<64x128xf32>
    tpu.vector_store %arg8[%c0_21, %c0_22], %38 {strides = array<i32>} : memref<64x128xf32, #tpu.memory_space<vmem>>, vector<64x128xf32>,
    return
  }
  func.func @transform_0(%arg0: i32) -> (i32, i32, i32) {
    %c0_i32 = arith.constant 0 : i32
    %c0_i32_0 = arith.constant 0 : i32
    %c0_i32_1 = arith.constant 0 : i32
    return %arg0, %c0_i32, %c0_i32_0 : i32, i32, i32
  }
  func.func @transform_1(%arg0: i32) -> (i32, i32) {
    %c0_i32 = arith.constant 0 : i32
    %c0_i32_0 = arith.constant 0 : i32
    %c0_i32_1 = arith.constant 0 : i32
    return %c0_i32, %c0_i32_0 : i32, i32
  }
  func.func @transform_2(%arg0: i32) -> (i32, i32) {
    %c0_i32 = arith.constant 0 : i32
    %c0_i32_0 = arith.constant 0 : i32
    %c0_i32_1 = arith.constant 0 : i32
    return %c0_i32, %c0_i32_0 : i32, i32
  }
  func.func @transform_3(%arg0: i32) -> (i32, i32) {
    %c0_i32 = arith.constant 0 : i32
    %c0_i32_0 = arith.constant 0 : i32
    %c0_i32_1 = arith.constant 0 : i32
    return %c0_i32, %c0_i32_0 : i32, i32
  }
  func.func @transform_4(%arg0: i32) -> (i32, i32) {
    %c0_i32 = arith.constant 0 : i32
    %c0_i32_0 = arith.constant 0 : i32
    %c0_i32_1 = arith.constant 0 : i32
    return %c0_i32, %c0_i32_0 : i32, i32
  }
  func.func @transform_5(%arg0: i32) -> (i32, i32) {
    %c0_i32 = arith.constant 0 : i32
    %c0_i32_0 = arith.constant 0 : i32
    %c0_i32_1 = arith.constant 0 : i32
    return %c0_i32, %c0_i32_0 : i32, i32
  }
  func.func @transform_6(%arg0: i32) -> (i32, i32) {
    %c0_i32 = arith.constant 0 : i32
    %c0_i32_0 = arith.constant 0 : i32
    %c0_i32_1 = arith.constant 0 : i32
    return %c0_i32, %c0_i32_0 : i32, i32
  }
  func.func @transform_7(%arg0: i32) -> (i32, i32) {
    %c0_i32 = arith.constant 0 : i32
    %c0_i32_0 = arith.constant 0 : i32
    return %arg0, %c0_i32 : i32, i32
  }
}

</mosaic_0001>

<bundles_post_ra>
// kernel: tpu_custom_call.1
= control target key start
LH: loop header
LB: loop body
LE: loop exit
PB: predicated region body
PF: predicated region fallthrough
CT: control target
= control target key end

     0   :  { %12 = vsyncpa [#allocation3], 0  ;;  %s8546_s0 = inlined_call_operand.vmem [shape: f32[128,8,64], index: 0, kind: input, shape index: {}]   ;;  %s8547_s1 = inlined_call_operand.hbm [shape: f32[192,128], index: 1, kind: input, shape index: {}]   ;;  %s8548_s2 = inlined_call_operand.vmem [shape: f32[1,128], index: 2, kind: input, shape index: {}]   ;;  %s8549_s3 = inlined_call_operand.vmem [shape: f32[384,128], index: 3, kind: input, shape index: {}]   ;;  %s8550_s4 = inlined_call_operand.vmem [shape: f32[1,128], index: 4, kind: input, shape index: {}]   ;;  %s8551_s5 = inlined_call_operand.vmem [shape: f32[1024,128], index: 5, kind: input, shape index: {}]   ;;  %s8552_s6 = inlined_call_operand.vmem [shape: f32[1,128], index: 6, kind: input, shape index: {}]   ;;  %s8553_s7 = inlined_call_operand.hbm [shape: f32[128,128], index: 7, kind: output, shape index: {}]  }
   0x1   :  { %13 = vsyncpa [#allocation4], 0 }
   0x2   :  { %15 = vsyncpa [#allocation4 + $0x1], 0  ;;  %s6137_s24 = smov 0   ;;  %s6139_s25 = smov 0  }
   0x3   :  { %s6141_s26 = smov 0   ;;  %s6143_s27 = smov 0  }
   0x4 LB: > { %s6158_s28 = sadd.s32 4294967295, %s6086_s27   ;;  %s4950_s29 = sadd.s32 4294967294, %s6086_s27   ;;  %s6086_s27 = sphi %s6143_s27, %s8741_s27   ;;  %s6082_s26 = sphi %s6141_s26, %s8740_s26   ;;  %s6078_s25 = sphi %s6139_s25, %s8739_s25   ;;  %s6074_s24 = sphi %s6137_s24, %s8738_s24  }
   0x5   : > { %s6162_s30 = sadd.s32 1, %s6086_s27   ;;  %s180_s8 = sadd.s32 1, %s6082_s26 }
   0x6   : > { %s177_s9 = ssub.s32 %s6086_s27, %s6162_s30  ;;  %p190_p0 = scmp.ne.s32.totalorder %s6082_s26, %s6078_s25 }
   0x7   : > { %p178_p1 = scmp.eq.s32.totalorder %s177_s9, 0  ;;  %p191_p2 = scmp.eq.s32.totalorder %s6158_s28, 1 }
   0x8   : > { %p196_p3 = scmp.ne.s32.totalorder %s6078_s25, %s6074_s24  ;;  %p197_p4 = scmp.eq.s32.totalorder %s4950_s29, 1 }
   0x9   : > { %s6173_s10 = scalar_select %p178_p1, %s6082_s26, %s180_s8  }
   0xa   : > { %p6175_p5 = por %p191_p2, %p190_p0  ;;  %p6179_p6 = por %p197_p4, %p196_p3 }
   0xb   : > { %p4951_p7 = scmp.ge.s32.totalorder %s6086_s27, 1  ;;  %p204_p8 = scmp.lt.s32.totalorder %s6086_s27, 3 }
   0xc   : > { %s8613_s11 = scalar_select %p6175_p5, 1, 0 }
   0xd   : > { %s8614_s12 = scalar_select %p6179_p6, 1, 0 }
   0xe   : > { %p8554_p9 = scmp.eq.s32.totalorder %s6158_s28, 0  ;;  %p6186_p10 = pnand %p4951_p7, %p204_p8 }
   0xf   : > { %s6088_s14 = smov [#allocation2]   ;;  %s5992_s19 = scalar_lea.hbm %s8547_s1, 3072 }
  0x10   : > { %s8615_s13 = scalar_select %p6186_p10, 1, 0 }
  0x11   : > { %s216_s15 = sshll.u32 %s6088_s14, 4  ;;  %p5922_p11 = pneg %p6186_p10  ;;  %s217_s15 = int_to_ptr.vmem [resolvable:$true] %s216_s15 }
  0x12   : > { %p5993_p13 = scmp.ne.s32.totalorder %s8547_s1, %s5992_s19  ;;  %p5999_p3 = scmp.lt.u32.totalorder %s5992_s19, %s8547_s1 }
  0x13   : > { %p6194_p12 = pnand %p8554_p9, %p5922_p11 }
  0x15   : > { %p5994_p0 = pneg %p6194_p12 }
  0x17   : > { %p5995_p1 = pnand %p5994_p0, %p5993_p13 }
  0x19   : > { %p5996_p2 = pneg %p5995_p1 }
  0x1b   : > { %p6001_p4 = pnand %p5999_p3, %p5996_p2 }
  0x1d   : > { %6004 = shalt.err (!%p6001_p4)
}
  0x1e   : > { %s6005_s29 = scalar_lea.vmem %s217_s15, 3072  ;;  %p6013_p9 = scmp.lt.s32.totalorder %s217_s15, %s217_s15 }
  0x1f   : > { %p6006_p7 = scmp.ne.s32.totalorder %s217_s15, %s6005_s29  ;;  %p6014_p6 = scmp.lt.s32.totalorder %s6005_s29, %s6005_s29 }
  0x21   : > { %p6008_p8 = pnand %p6006_p7, %p5994_p0  ;;  %p6015_p5 = por %p6014_p6, %p6013_p9 }
  0x23   : > { %p6009_p11 = pneg %p6008_p8 }
  0x25   : > { %p6016_p10 = pnand %p6015_p5, %p6009_p11 }
  0x27   : > { %6019 = shalt.err (!%p6016_p10)
}
  0x28   : > { %s6089_s8 = smov 128   ;;  %s6090_s9 = smov 8  }
  0x29   : > { %5925 = dma.hbm_to_vmem [thread:$0]  (!%p6194_p12), %s8547_s1, 3072, %s217_s15, [#allocation3], %s6089_s8, %s6089_s8, %s6090_s9  }
  0x2a   : > { %p8617_p13 = scmp.ne.s32.totalorder %s8615_s13, 0 }
  0x2c   : > { %256 = sbr.rel (%p8617_p13) target bundleno = 1198 (0x4ae), region = 48 }
  0x33   : > { %p8618_p1 = scmp.eq.s32.totalorder %s6158_s28, 0 }
  0x35   : > { %6065 = dma.done.wait (%p8618_p1), [#allocation3], 3072   ;;  %p8619_p0 = pmov %p8618_p1 }
  0x36   : > { %s4957_s18 = sshll.u32 %s6158_s28, 6  ;;  %v6091_v0 = vmov 0.0|0.0   ;;  %s6092_s20 = smov 64   ;;  %v1066_v7 = vld [vmem:[#allocation2] sm:$0xff]  ;;  %v1067_v8 = vld [vmem:[#allocation2 + $0x8] sm:$0xff]  ;;  %v1068_v9 = vld [vmem:[#allocation2 + $0x10] sm:$0xff] }
  0x37   : > { %6067 = vsyncadd (%p8619_p0), [#allocation3], 4294964224  ;;  %p289_p5 = scmp.lt.s32.totalorder %s4957_s18, 127  ;;  %5656 = vmatprep.subr.bf16.mxu0 %v6091_v0  ;;  %5692 = vmatprep.subr.bf16.mxu1 %v6091_v0  ;;  %vm744_vm0 = vcmask 1046528   ;;  %v5657_v12 = vpack.c.bf16 %v1067_v8, %v1066_v7  ;;  %v1069_v13 = vld [vmem:[#allocation2 + $0x18] sm:$0xff]  ;;  %vm1001_vm1 = vcmask 523264  }
  0x38   : > { %v5660_v15 = vpack.c.bf16 %v1069_v13, %v1068_v9  ;;  %v1070_v17 = vld [vmem:[#allocation2 + $0x20] sm:$0xff]  ;;  %v1071_v18 = vld [vmem:[#allocation2 + $0x28] sm:$0xff]  ;;  %v1072_v22 = vld [vmem:[#allocation2 + $0x30] sm:$0xff]  ;;  %vm551_vm2 = vcmask 1040384   ;;  %s285_s9 = sand.u32 1, %s6078_s25   ;;  %s5223_s17 = sshll.u32 %s6158_s28, 10 }
  0x39   : > { %s8743_s18 = smov (!%p289_p5, %s4957_s18), 127  ;;  %5658 = vmatpush1.bf16.msra.mxu0 %v5657_v12  ;;  %v5663_v21 = vpack.c.bf16 %v1071_v18, %v1070_v17  ;;  %v1073_v23 = vld [vmem:[#allocation2 + $0x38] sm:$0xff]  ;;  %v1074_v27 = vld [vmem:[#allocation2 + $0x40] sm:$0xff]  ;;  %v1075_v28 = vld [vmem:[#allocation2 + $0x48] sm:$0xff]  ;;  %s4956_s14 = sshll.u32 %s285_s9, 6 }
  0x3a   : > { %s4958_s16 = sshll.u32 %s8743_s18, 3  ;;  %5659 = vmatprep.subr.bf16.mxu0 %v6091_v0  ;;  %v5666_v26 = vpack.c.bf16 %v1073_v23, %v1072_v22  ;;  %v5669_v31 = vpack.c.bf16 %v1075_v28, %v1074_v27  ;;  %v1076_v32 = vld [vmem:[#allocation2 + $0x50] sm:$0xff]  ;;  %v1077_v33 = vld [vmem:[#allocation2 + $0x58] sm:$0xff]  ;;  %v1078_v37 = vld [vmem:[#allocation2 + $0x60] sm:$0xff]  ;;  %s8498_s19 = scalar_lea.hbm %s8553_s7, %s5223_s17 }
  0x3b   : > { %s6226_s13 = scalar_lea.vmem %s8546_s0, %s4958_s16  ;;  %v5672_v36 = vpack.c.bf16 %v1077_v33, %v1076_v32  ;;  %v1079_v38 = vld [vmem:[#allocation2 + $0x68] sm:$0xff]  ;;  %v1080_v42 = vld [vmem:[#allocation2 + $0x70] sm:$0xff]  ;;  %v1081_v43 = vld [vmem:[#allocation2 + $0x78] sm:$0xff]  ;;  %p8736_p9 = scmp.ne.s32.totalorder %s8613_s11, 0 }
  0x3c   : > { %v6229_v1 = vld [vmem:[%s6226_s13] sm:$0xff]  ;;  %v6232_v2 = vld [vmem:[%s6226_s13 + $0x10] sm:$0xff]  ;;  %v6239_v3 = vld [vmem:[%s6226_s13 + $0x8] sm:$0xff]  ;;  %v5675_v41 = vpack.c.bf16 %v1079_v38, %v1078_v37  ;;  %v5678_v46 = vpack.c.bf16 %v1081_v43, %v1080_v42  ;;  %s6094_s28 = smov [#allocation5]  }
  0x3d   : > { %809 = vrot.lane.b32.xlu0 %v6229_v1, %s6092_s20  ;;  %813 = vrot.lane.b32.xlu1 %v6232_v2, %s6092_s20  ;;  %v6242_v4 = vld [vmem:[%s6226_s13 + $0x18] sm:$0xff]  ;;  %v6249_v5 = vld [vmem:[%s6226_s13 + $0x20] sm:$0xff]  ;;  %v616_v14 = vrot.slane %v6229_v1, 1  ;;  %v1083_v48 = vld [vmem:[#allocation2 + $0x88] sm:$0xff]  ;;  %s6024_s22 = sshll.u32 %s6094_s28, 4  ;;  %s6025_s22 = int_to_ptr.vmem [resolvable:$false] %s6024_s22 }
  0x3e   : > { %v6252_v6 = vld [vmem:[%s6226_s13 + $0x28] sm:$0xff]  ;;  %v6259_v10 = vld [vmem:[%s6226_s13 + $0x30] sm:$0xff]  ;;  %v6262_v11 = vld [vmem:[%s6226_s13 + $0x38] sm:$0xff]  ;;  %5661 = vmatpush1.bf16.msra.mxu0 %v5660_v15  ;;  %s6026_s23 = scalar_lea.vmem %s6025_s22, 2048 }
  0x3f   : > { %v745_v16 = vsel %vm744_vm0, %v616_v14, 0.0  ;;  %v6271_v19 = vld [vmem:[%s6226_s13 + $0x40] sm:$0xff]  ;;  %v6274_v20 = vld [vmem:[%s6226_s13 + $0x48] sm:$0xff]  ;;  %v6283_v24 = vld [vmem:[%s6226_s13 + $0x50] sm:$0xff]  ;;  %5662 = vmatprep.subr.bf16.mxu0 %v6091_v0 }
  0x40   : > { %4960 = vmatprep.mubr.msk.f32.mxu0 %vm1001_vm1, %v745_v16  ;;  %v6286_v25 = vld [vmem:[%s6226_s13 + $0x58] sm:$0xff]  ;;  %v6294_v29 = vld [vmem:[%s6226_s13 + $0x60] sm:$0xff]  ;;  %v6297_v30 = vld [vmem:[%s6226_s13 + $0x68] sm:$0xff] }
  0x41   : > { %811 = vrot.lane.b32.xlu0 %v6239_v3, %s6092_s20  ;;  %815 = vrot.lane.b32.xlu1 %v6242_v4, %s6092_s20  ;;  %v6305_v34 = vld [vmem:[%s6226_s13 + $0x70] sm:$0xff]  ;;  %v6308_v35 = vld [vmem:[%s6226_s13 + $0x78] sm:$0xff]  ;;  %v1082_v47 = vld [vmem:[#allocation2 + $0x80] sm:$0xff] }
  0x42   : > { %5664 = vmatpush1.bf16.msra.mxu0 %v5663_v21  ;;  %v6316_v39 = vld [vmem:[%s6226_s13 + $0x80] sm:$0xff]  ;;  %v6319_v40 = vld [vmem:[%s6226_s13 + $0x88] sm:$0xff]  ;;  %v6327_v44 = vld [vmem:[%s6226_s13 + $0x90] sm:$0xff]  ;;  %v5681_v51 = vpack.c.bf16 %v1083_v48, %v1082_v47 }
  0x43   : > { %5665 = vmatprep.subr.bf16.mxu0 %v6091_v0  ;;  %v6330_v45 = vld [vmem:[%s6226_s13 + $0x98] sm:$0xff]  ;;  %v6338_v49 = vld [vmem:[%s6226_s13 + $0xa0] sm:$0xff]  ;;  %v6341_v50 = vld [vmem:[%s6226_s13 + $0xa8] sm:$0xff] }
  0x44   : > { %v1084_v52 = vld [vmem:[#allocation2 + $0x90] sm:$0xff]  ;;  %v1085_v53 = vld [vmem:[#allocation2 + $0x98] sm:$0xff]  ;;  %v1086_v57 = vld [vmem:[#allocation2 + $0xa0] sm:$0xff] }
  0x45   : > { %817 = vrot.lane.b32.xlu0 %v6249_v5, %s6092_s20  ;;  %819 = vrot.lane.b32.xlu1 %v6252_v6, %s6092_s20  ;;  %v6349_v54 = vld [vmem:[%s6226_s13 + $0xb0] sm:$0xff]  ;;  %v6352_v55 = vld [vmem:[%s6226_s13 + $0xb8] sm:$0xff]  ;;  %v5684_v56 = vpack.c.bf16 %v1085_v53, %v1084_v52  ;;  %v1087_v58 = vld [vmem:[#allocation2 + $0xa8] sm:$0xff] }
  0x46   : > { %5667 = vmatpush1.bf16.msra.mxu0 %v5666_v26  ;;  %v6360_v59 = vld [vmem:[%s6226_s13 + $0xc0] sm:$0xff]  ;;  %v6363_v60 = vld [vmem:[%s6226_s13 + $0xc8] sm:$0xff]  ;;  %v5687_v61 = vpack.c.bf16 %v1087_v58, %v1086_v57  ;;  %v1088_v62 = vld [vmem:[#allocation2 + $0xb0] sm:$0xff] }
  0x47   : > { %5668 = vmatprep.subr.bf16.mxu0 %v6091_v0  ;;  %v1089_v63 = vld [vmem:[#allocation2 + $0xb8] sm:$0xff]  ;;  %v6371_v7 = vld [vmem:[%s6226_s13 + $0xd0] sm:$0xff]  ;;  %v6383_v12 = vld [vmem:[%s6226_s13 + $0xe0] sm:$0xff] }
  0x48   : > { %v6375_v8 = vld [vmem:[%s6226_s13 + $0xd8] sm:$0xff]  ;;  %v5690_v9 = vpack.c.bf16 %v1089_v63, %v1088_v62  ;;  %v6386_v13 = vld [vmem:[%s6226_s13 + $0xe8] sm:$0xff]  ;;  %v6393_v14 = vld [vmem:[%s6226_s13 + $0xf0] sm:$0xff] }
  0x49   : > { %821 = vrot.lane.b32.xlu0 %v6259_v10, %s6092_s20  ;;  %823 = vrot.lane.b32.xlu1 %v6262_v11, %s6092_s20  ;;  %v6396_v15 = vld [vmem:[%s6226_s13 + $0xf8] sm:$0xff]  ;;  %v6403_v16 = vld [vmem:[%s6226_s13 + $0x100] sm:$0xff]  ;;  %vm7002_vm3 = vmneg %vm551_vm2 }
  0x4a   : > { %5670 = vmatpush1.bf16.msra.mxu0 %v5669_v31  ;;  %v6406_v17 = vld [vmem:[%s6226_s13 + $0x108] sm:$0xff]  ;;  %v6413_v18 = vld [vmem:[%s6226_s13 + $0x110] sm:$0xff]  ;;  %v6416_v21 = vld [vmem:[%s6226_s13 + $0x118] sm:$0xff] }
  0x4b   : > { %5671 = vmatprep.subr.bf16.mxu0 %v6091_v0  ;;  %v6423_v22 = vld [vmem:[%s6226_s13 + $0x120] sm:$0xff]  ;;  %v6426_v23 = vld [vmem:[%s6226_s13 + $0x128] sm:$0xff]  ;;  %v6433_v26 = vld [vmem:[%s6226_s13 + $0x130] sm:$0xff] }
  0x4c   : > { %v6436_v27 = vld [vmem:[%s6226_s13 + $0x138] sm:$0xff]  ;;  %v2218_v28 = vld [vmem:[%s8549_s3 + $0x100] sm:$0xff]  ;;  %v2219_v31 = vld [vmem:[%s8549_s3 + $0x108] sm:$0xff] }
  0x4d   : > { %825 = vrot.lane.b32.xlu0 %v6271_v19, %s6092_s20  ;;  %827 = vrot.lane.b32.xlu1 %v6274_v20, %s6092_s20  ;;  %v6449_v32 = vld [vmem:[%s6226_s13 + $0x140] sm:$0xff]  ;;  %v6452_v33 = vld [vmem:[%s6226_s13 + $0x148] sm:$0xff] }
  0x4e   : > { %5673 = vmatpush1.bf16.msra.mxu0 %v5672_v36  ;;  %v5740_v36 = vpack.c.bf16 %v2219_v31, %v2218_v28  ;;  %v6459_v37 = vld [vmem:[%s6226_s13 + $0x150] sm:$0xff]  ;;  %v6462_v38 = vld [vmem:[%s6226_s13 + $0x158] sm:$0xff]  ;;  %v6472_v42 = vld [vmem:[%s6226_s13 + $0x168] sm:$0xff] }
  0x4f   : > { %5674 = vmatprep.subr.bf16.mxu0 %v6091_v0  ;;  %v6479_v43 = vld [vmem:[%s6226_s13 + $0x170] sm:$0xff]  ;;  %v343_v47 = vld [vmem:[%s6226_s13 + $0x180] sm:$0xff]  ;;  %v344_v48 = vld [vmem:[%s6226_s13 + $0x188] sm:$0xff] }
  0x50   : > { %v346_v52 = vld [vmem:[%s6226_s13 + $0x198] sm:$0xff]  ;;  %v347_v53 = vld [vmem:[%s6226_s13 + $0x1a0] sm:$0xff]  ;;  %v349_v57 = vld [vmem:[%s6226_s13 + $0x1b0] sm:$0xff] }
  0x51   : > { %829 = vrot.lane.b32.xlu0 %v6283_v24, %s6092_s20  ;;  %831 = vrot.lane.b32.xlu1 %v6286_v25, %s6092_s20  ;;  %v350_v58 = vld [vmem:[%s6226_s13 + $0x1b8] sm:$0xff]  ;;  %v351_v62 = vld [vmem:[%s6226_s13 + $0x1c0] sm:$0xff] }
  0x52   : > { %5676 = vmatpush1.bf16.msra.mxu0 %v5675_v41  ;;  %v6469_v41 = vld [vmem:[%s6226_s13 + $0x160] sm:$0xff]  ;;  %v352_v63 = vld [vmem:[%s6226_s13 + $0x1c8] sm:$0xff]  ;;  %v2220_v28 = vld [vmem:[%s8549_s3 + $0x110] sm:$0xff] }
  0x53   : > { %5677 = vmatprep.subr.bf16.mxu0 %v6091_v0  ;;  %v2221_v31 = vld [vmem:[%s8549_s3 + $0x118] sm:$0xff] }
  0x55   : > { %833 = vrot.lane.b32.xlu0 %v6294_v29, %s6092_s20  ;;  %835 = vrot.lane.b32.xlu1 %v6297_v30, %s6092_s20 }
  0x56   : > { %5679 = vmatpush1.bf16.msra.mxu0 %v5678_v46  ;;  %v342_v46 = vld [vmem:[%s6226_s13 + $0x178] sm:$0xff] }
  0x57   : > { %5680 = vmatprep.subr.bf16.mxu0 %v6091_v0 }
  0x59   : > { %837 = vrot.lane.b32.xlu0 %v6305_v34, %s6092_s20  ;;  %839 = vrot.lane.b32.xlu1 %v6308_v35, %s6092_s20 }
  0x5a   : > { %5682 = vmatpush1.bf16.msra.mxu0 %v5681_v51  ;;  %v345_v51 = vld [vmem:[%s6226_s13 + $0x190] sm:$0xff] }
  0x5b   : > { %5683 = vmatprep.subr.bf16.mxu0 %v6091_v0 }
  0x5d   : > { %841 = vrot.lane.b32.xlu0 %v6316_v39, %s6092_s20  ;;  %843 = vrot.lane.b32.xlu1 %v6319_v40, %s6092_s20 }
  0x5e   : > { %5685 = vmatpush1.bf16.msra.mxu0 %v5684_v56  ;;  %v348_v56 = vld [vmem:[%s6226_s13 + $0x1a8] sm:$0xff] }
  0x5f   : > { %5686 = vmatprep.subr.bf16.mxu0 %v6091_v0 }
  0x61   : > { %845 = vrot.lane.b32.xlu0 %v6327_v44, %s6092_s20  ;;  %847 = vrot.lane.b32.xlu1 %v6330_v45, %s6092_s20 }
  0x62   : > { %5688 = vmatpush1.bf16.msra.mxu0 %v5687_v61  ;;  %v423_v61 = vrot.slane %v6229_v1, 7  ;;  %v424_v1 = vrot.slane %v6239_v3, 7 }
  0x63   : > { %5689 = vmatprep.subr.bf16.mxu0 %v6091_v0 }
  0x65   : > { %849 = vrot.lane.b32.xlu0 %v6338_v49, %s6092_s20  ;;  %851 = vrot.lane.b32.xlu1 %v6341_v50, %s6092_s20 }
  0x66   : > { %5691 = vmatpush1.bf16.msra.mxu0 %v5690_v9  ;;  %v617_v9 = vrot.slane %v6239_v3, 1  ;;  %v553_v3 = vsel %vm551_vm2, 0.0, %v424_v1 }
  0x67   : > { %5741 = vmatprep.subr.bf16.mxu0 %v5740_v36 }
  0x69   : > { %853 = vrot.lane.b32.xlu0 %v6349_v54, %s6092_s20  ;;  %855 = vrot.lane.b32.xlu1 %v6352_v55, %s6092_s20 }
  0x6d   : > { %857 = vrot.lane.b32.xlu0 %v6360_v59, %s6092_s20  ;;  %859 = vrot.lane.b32.xlu1 %v6363_v60, %s6092_s20 }
  0x71   : > { %861 = vrot.lane.b32.xlu0 %v6371_v7, %s6092_s20  ;;  %863 = vrot.lane.b32.xlu1 %v6375_v8, %s6092_s20 }
  0x75   : > { %865 = vrot.lane.b32.xlu0 %v6383_v12, %s6092_s20  ;;  %867 = vrot.lane.b32.xlu1 %v6386_v13, %s6092_s20 }
  0x79   : > { %869 = vrot.lane.b32.xlu0 %v6393_v14, %s6092_s20  ;;  %871 = vrot.lane.b32.xlu1 %v6396_v15, %s6092_s20 }
  0x7d   : > { %873 = vrot.lane.b32.xlu0 %v6403_v16, %s6092_s20  ;;  %875 = vrot.lane.b32.xlu1 %v6406_v17, %s6092_s20 }
  0x81   : > { %877 = vrot.lane.b32.xlu0 %v6413_v18, %s6092_s20  ;;  %879 = vrot.lane.b32.xlu1 %v6416_v21, %s6092_s20 }
  0x85   : > { %881 = vrot.lane.b32.xlu0 %v6423_v22, %s6092_s20  ;;  %883 = vrot.lane.b32.xlu1 %v6426_v23, %s6092_s20 }
  0x89   : > { %885 = vrot.lane.b32.xlu0 %v6433_v26, %s6092_s20  ;;  %887 = vrot.lane.b32.xlu1 %v6436_v27, %s6092_s20 }
  0x8d   : > { %889 = vrot.lane.b32.xlu0 %v6449_v32, %s6092_s20  ;;  %891 = vrot.lane.b32.xlu1 %v6452_v33, %s6092_s20 }
  0x91   : > { %893 = vrot.lane.b32.xlu0 %v6459_v37, %s6092_s20  ;;  %895 = vrot.lane.b32.xlu1 %v6462_v38, %s6092_s20 }
  0x95   : > { %897 = vrot.lane.b32.xlu0 %v6469_v41, %s6092_s20  ;;  %899 = vrot.lane.b32.xlu1 %v6472_v42, %s6092_s20 }
  0x99   : > { %901 = vrot.lane.b32.xlu0 %v6479_v43, %s6092_s20  ;;  %903 = vrot.lane.b32.xlu1 %v342_v46, %s6092_s20  ;;  %v552_v46 = vsel %vm551_vm2, 0.0, %v423_v61 }
  0x9d   : > { %905 = vrot.lane.b32.xlu0 %v343_v47, %s6092_s20  ;;  %907 = vrot.lane.b32.xlu1 %v344_v48, %s6092_s20  ;;  %v353_v47 = vld [vmem:[%s6226_s13 + $0x1d0] sm:$0xff]  ;;  %v425_v48 = vrot.slane %v6232_v2, 7 }
  0xa1   : > { %909 = vrot.lane.b32.xlu0 %v345_v51, %s6092_s20  ;;  %911 = vrot.lane.b32.xlu1 %v346_v52, %s6092_s20  ;;  %v618_v51 = vrot.slane %v6232_v2, 1  ;;  %v426_v2 = vrot.slane %v6242_v4, 7 }
  0xa5   : > { %913 = vrot.lane.b32.xlu0 %v347_v53, %s6092_s20  ;;  %915 = vrot.lane.b32.xlu1 %v348_v56, %s6092_s20  ;;  %v746_v53 = vsel %vm744_vm0, %v617_v9, 0.0  ;;  %v5744_v56 = vpack.c.bf16 %v2221_v31, %v2220_v28  ;;  %v747_v28 = vsel %vm744_vm0, %v618_v51, 0.0  ;;  %v554_v31 = vsel %vm551_vm2, 0.0, %v425_v48 }
  0xa6   : > { %v620_v48 = vrot.slane %v6249_v5, 1 }
  0xa9   : > { %917 = vrot.lane.b32.xlu0 %v349_v57, %s6092_s20  ;;  %919 = vrot.lane.b32.xlu1 %v350_v58, %s6092_s20  ;;  %v354_v58 = vld [vmem:[%s6226_s13 + $0x1d8] sm:$0xff] }
  0xad   : > { %921 = vrot.lane.b32.xlu0 %v351_v62, %s6092_s20  ;;  %923 = vrot.lane.b32.xlu1 %v352_v63, %s6092_s20  ;;  %v355_v62 = vld [vmem:[%s6226_s13 + $0x1e0] sm:$0xff]  ;;  %v619_v63 = vrot.slane %v6242_v4, 1  ;;  %v357_v4 = vld [vmem:[%s6226_s13 + $0x1f0] sm:$0xff] }
  0xaf   : > { %v810_v52 = vpop.permute.xlu0 %809  ;;  %v814_v61 = vpop.permute.xlu1 %813 }
  0xb0   : > { %v1002_v57 = vsel %vm1001_vm1, %v552_v46, %v810_v52  ;;  %v356_v46 = vld [vmem:[%s6226_s13 + $0x1e8] sm:$0xff]  ;;  %v748_v52 = vsel %vm744_vm0, %v619_v63, 0.0  ;;  %v429_v63 = vrot.slane %v6259_v10, 7 }
  0xb1   : > { %1354 = vmatmul.mubr.f32.vlgmr.msra.gmra.mrb[0].mxu0 %v1002_v57  ;;  %925 = vrot.lane.b32.xlu0 %v353_v47, %s6092_s20  ;;  %v427_v47 = vrot.slane %v6249_v5, 7  ;;  %v358_v57 = vld [vmem:[%s6226_s13 + $0x1f8] sm:$0xff] }
  0xb2   : > { %4961 = vmatprep.mubr.msk.f32.mxu0 %vm1001_vm1, %v746_v53  ;;  %5743 = vmatpush3.bf16.msra.mxu0 %v5740_v36  ;;  %v1004_v36 = vsel %vm1001_vm1, %v554_v31, %v814_v61  ;;  %v555_v53 = vsel %vm551_vm2, 0.0, %v426_v2  ;;  %v749_v61 = vsel %vm744_vm0, %v620_v48, 0.0  ;;  %v558_v48 = vsel %vm551_vm2, 0.0, %v429_v63 }
  0xb3   : > { %v812_v9 = vpop.permute.xlu0 %811  ;;  %927 = vrot.lane.b32.xlu1 %v354_v58, %s6092_s20  ;;  %5745 = vmatprep.subr.bf16.mxu0 %v5744_v56  ;;  %v816_v51 = vpop.permute.xlu1 %815  ;;  %v428_v58 = vrot.slane %v6252_v6, 7 }
  0xb4   : > { %v1003_v1 = vsel %vm1001_vm1, %v553_v3, %v812_v9  ;;  %v621_v3 = vrot.slane %v6252_v6, 1  ;;  %v622_v9 = vrot.slane %v6259_v10, 1 }
  0xb5   : > { %1359 = vmatmul.mubr.f32.gmra.mrb[2].mxu0 %v1003_v1  ;;  %929 = vrot.lane.b32.xlu0 %v355_v62, %s6092_s20  ;;  %v556_v62 = vsel %vm551_vm2, 0.0, %v427_v47  ;;  %v557_v6 = vsel %vm551_vm2, 0.0, %v428_v58  ;;  %v2223_v58 = vld [vmem:[%s8549_s3 + $0x128] sm:$0xff] }
  0xb6   : > { %4962 = vmatprep.mubr.msk.f32.mxu0 %vm1001_vm1, %v747_v28  ;;  %5747 = vmatpush3.bf16.msra.mxu0 %v5744_v56  ;;  %v1005_v56 = vsel %vm1001_vm1, %v555_v53, %v816_v51  ;;  %v750_v31 = vsel %vm744_vm0, %v621_v3, 0.0  ;;  %v751_v47 = vsel %vm744_vm0, %v622_v9, 0.0  ;;  %v431_v51 = vrot.slane %v6271_v19, 7  ;;  %v2186_v3 = vld [vmem:[%s8549_s3] sm:$0xff] }
  0xb7   : > { %931 = vrot.lane.b32.xlu1 %v356_v46, %s6092_s20  ;;  %v818_v5 = vpop.permute.xlu0 %817  ;;  %v820_v28 = vpop.permute.xlu1 %819  ;;  %v430_v46 = vrot.slane %v6262_v11, 7 }
  0xb8   : > { %v1006_v2 = vsel %vm1001_vm1, %v556_v62, %v818_v5  ;;  %v1007_v1 = vsel %vm1001_vm1, %v557_v6, %v820_v28  ;;  %v2187_v62 = vld [vmem:[%s8549_s3 + $0x8] sm:$0xff]  ;;  %v560_v28 = vsel %vm551_vm2, 0.0, %v431_v51  ;;  %v2188_v6 = vld [vmem:[%s8549_s3 + $0x10] sm:$0xff]  ;;  %v2190_v51 = vld [vmem:[%s8549_s3 + $0x20] sm:$0xff] }
  0xb9   : > { %1364 = vmatmul.mubr.f32.gmra.mrb[4].mxu0 %v1004_v36  ;;  %933 = vrot.lane.b32.xlu0 %v357_v4, %s6092_s20  ;;  %v623_v36 = vrot.slane %v6262_v11, 1  ;;  %v2222_v11 = vld [vmem:[%s8549_s3 + $0x120] sm:$0xff] }
  0xba   : > { %4963 = vmatprep.mubr.msk.f32.mxu0 %vm1001_vm1, %v748_v52  ;;  %v624_v52 = vrot.slane %v6271_v19, 1  ;;  %v432_v19 = vrot.slane %v6274_v20, 7 }
  0xbb   : > { %935 = vrot.lane.b32.xlu1 %v358_v57, %s6092_s20  ;;  %v822_v4 = vpop.permute.xlu0 %821  ;;  %v824_v53 = vpop.permute.xlu1 %823  ;;  %v752_v57 = vsel %vm744_vm0, %v623_v36, 0.0  ;;  %v433_v36 = vrot.slane %v6283_v24, 7  ;;  %s8505_s20 = scalar_lea.sflag [#allocation4], %s285_s9 }
  0xbc   : > { %v1008_v10 = vsel %vm1001_vm1, %v558_v48, %v822_v4  ;;  %v753_v9 = vsel %vm744_vm0, %v624_v52, 0.0  ;;  %v626_v4 = vrot.slane %v6283_v24, 1  ;;  %v2191_v52 = vld [vmem:[%s8549_s3 + $0x28] sm:$0xff] }
  0xbd   : > { %1369 = vmatmul.mubr.f32.gmra.mrb[6].mxu0 %v1005_v56  ;;  %v559_v56 = vsel %vm551_vm2, 0.0, %v430_v46 }
  0xbe   : > { %4964 = vmatprep.mubr.msk.f32.mxu0 %vm1001_vm1, %v749_v61  ;;  %v1009_v5 = vsel %vm1001_vm1, %v559_v56, %v824_v53  ;;  %v5748_v61 = vpack.c.bf16 %v2223_v58, %v2222_v11  ;;  %v5699_v53 = vpack.c.bf16 %v2191_v52, %v2190_v51  ;;  %v627_v56 = vrot.slane %v6286_v25, 1 }
  0xbf   : > { %v826_v63 = vpop.permute.xlu0 %825  ;;  %v755_v58 = vsel %vm744_vm0, %v626_v4, 0.0  ;;  %v437_v52 = vrot.slane %v6305_v34, 7 }
  0xc0   : > { %5749 = vmatprep.subr.bf16.mxu0 %v5748_v61 }
  0xc1   : > { %1374 = vmatmul.mubr.f32.gmra.mrb[8].mxu0 %v1006_v2  ;;  %v625_v2 = vrot.slane %v6274_v20, 1  ;;  %v1010_v20 = vsel %vm1001_vm1, %v560_v28, %v826_v63 }
  0xc2   : > { %4965 = vmatprep.mubr.msk.f32.mxu0 %vm1001_vm1, %v750_v31  ;;  %v5693_v31 = vpack.c.bf16 %v2187_v62, %v2186_v3  ;;  %5751 = vmatpush3.bf16.msra.mxu0 %v5748_v61  ;;  %v562_v3 = vsel %vm551_vm2, 0.0, %v433_v36  ;;  %v435_v62 = vrot.slane %v6294_v29, 7 }
  0xc3   : > { %v754_v48 = vsel %vm744_vm0, %v625_v2, 0.0  ;;  %v830_v11 = vpop.permute.xlu0 %829  ;;  %v628_v2 = vrot.slane %v6294_v29, 1 }
  0xc4   : > { %5694 = vmatpush1.bf16.msra.mxu1 %v5693_v31  ;;  %v1012_v61 = vsel %vm1001_vm1, %v562_v3, %v830_v11  ;;  %v2194_v31 = vld [vmem:[%s8549_s3 + $0x40] sm:$0xff] }
  0xc5   : > { %1379 = vmatmul.mubr.f32.gmra.mrb[10].mxu0 %v1007_v1  ;;  %v2189_v1 = vld [vmem:[%s8549_s3 + $0x18] sm:$0xff]  ;;  %5695 = vmatprep.subr.bf16.mxu1 %v6091_v0  ;;  %v757_v4 = vsel %vm744_vm0, %v628_v2, 0.0  ;;  %v2198_v11 = vld [vmem:[%s8549_s3 + $0x60] sm:$0xff]  ;;  %v2200_v2 = vld [vmem:[%s8549_s3 + $0x70] sm:$0xff] }
  0xc6   : > { %4966 = vmatprep.mubr.msk.f32.mxu0 %vm1001_vm1, %v751_v47  ;;  %v5696_v46 = vpack.c.bf16 %v2189_v1, %v2188_v6  ;;  %v828_v47 = vpop.permute.xlu1 %827  ;;  %v2195_v6 = vld [vmem:[%s8549_s3 + $0x48] sm:$0xff] }
  0xc7   : > { %v5705_v29 = vpack.c.bf16 %v2195_v6, %v2194_v31  ;;  %v834_v36 = vpop.permute.xlu0 %833  ;;  %v632_v31 = vrot.slane %v6316_v39, 1 }
  0xc8   : > { %5697 = vmatpush1.bf16.msra.mxu1 %v5696_v46  ;;  %v629_v46 = vrot.slane %v6297_v30, 1 }
  0xc9   : > { %1384 = vmatmul.mubr.f32.gmra.mrb[12].mxu0 %v1008_v10  ;;  %v561_v10 = vsel %vm551_vm2, 0.0, %v432_v19  ;;  %5698 = vmatprep.subr.bf16.mxu1 %v6091_v0  ;;  %v2192_v19 = vld [vmem:[%s8549_s3 + $0x30] sm:$0xff] }
  0xca   : > { %4967 = vmatprep.mubr.msk.f32.mxu0 %vm1001_vm1, %v752_v57  ;;  %v1011_v24 = vsel %vm1001_vm1, %v561_v10, %v828_v47  ;;  %v434_v57 = vrot.slane %v6286_v25, 7  ;;  %v832_v63 = vpop.permute.xlu1 %831  ;;  %v564_v47 = vsel %vm551_vm2, 0.0, %v435_v62  ;;  %v2197_v10 = vld [vmem:[%s8549_s3 + $0x58] sm:$0xff]  ;;  %v566_v62 = vsel %vm551_vm2, 0.0, %v437_v52 }
  0xcb   : > { %v1014_v51 = vsel %vm1001_vm1, %v564_v47, %v834_v36  ;;  %v2202_v36 = vld [vmem:[%s8549_s3 + $0x80] sm:$0xff] }
  0xcc   : > { %5700 = vmatpush1.bf16.msra.mxu1 %v5699_v53  ;;  %v563_v28 = vsel %vm551_vm2, 0.0, %v434_v57  ;;  %v758_v57 = vsel %vm744_vm0, %v629_v46, 0.0  ;;  %v2225_v46 = vld [vmem:[%s8549_s3 + $0x138] sm:$0xff] }
  0xcd   : > { %1389 = vmatmul.mubr.f32.gmra.mrb[14].mxu0 %v1009_v5  ;;  %v2193_v5 = vld [vmem:[%s8549_s3 + $0x38] sm:$0xff]  ;;  %5701 = vmatprep.subr.bf16.mxu1 %v6091_v0  ;;  %v1013_v1 = vsel %vm1001_vm1, %v563_v28, %v832_v63  ;;  %v439_v28 = vrot.slane %v6316_v39, 7  ;;  %v440_v39 = vrot.slane %v6319_v40, 7 }
  0xce   : > { %4968 = vmatprep.mubr.msk.f32.mxu0 %vm1001_vm1, %v753_v9  ;;  %v5702_v25 = vpack.c.bf16 %v2193_v5, %v2192_v19  ;;  %v756_v9 = vsel %vm744_vm0, %v627_v56, 0.0  ;;  %v836_v53 = vpop.permute.xlu1 %835  ;;  %v438_v19 = vrot.slane %v6308_v35, 7  ;;  %v631_v5 = vrot.slane %v6308_v35, 1  ;;  %v2201_v63 = vld [vmem:[%s8549_s3 + $0x78] sm:$0xff] }
  0xcf   : > { %v5714_v35 = vpack.c.bf16 %v2201_v63, %v2200_v2  ;;  %v568_v52 = vsel %vm551_vm2, 0.0, %v439_v28  ;;  %v635_v2 = vrot.slane %v6330_v45, 1  ;;  %v2208_v28 = vld [vmem:[%s8549_s3 + $0xb0] sm:$0xff] }
  0xd0   : > { %5703 = vmatpush1.bf16.msra.mxu1 %v5702_v25 }
  0xd1   : > { %1394 = vmatmul.mubr.f32.gmra.mrb[16].mxu0 %v1010_v20  ;;  %5704 = vmatprep.subr.bf16.mxu1 %v6091_v0  ;;  %v436_v20 = vrot.slane %v6297_v30, 7 }
  0xd2   : > { %4969 = vmatprep.mubr.msk.f32.mxu0 %vm1001_vm1, %v754_v48  ;;  %v2196_v48 = vld [vmem:[%s8549_s3 + $0x50] sm:$0xff]  ;;  %v840_v6 = vpop.permute.xlu1 %839 }
  0xd3   : > { %v5708_v30 = vpack.c.bf16 %v2197_v10, %v2196_v48  ;;  %v565_v56 = vsel %vm551_vm2, 0.0, %v436_v20  ;;  %v2224_v20 = vld [vmem:[%s8549_s3 + $0x130] sm:$0xff]  ;;  %v2203_v48 = vld [vmem:[%s8549_s3 + $0x88] sm:$0xff]  ;;  %v633_v10 = vrot.slane %v6319_v40, 1 }
  0xd4   : > { %5706 = vmatpush1.bf16.msra.mxu1 %v5705_v29  ;;  %v1015_v3 = vsel %vm1001_vm1, %v565_v56, %v836_v53  ;;  %v567_v29 = vsel %vm551_vm2, 0.0, %v438_v19  ;;  %v5752_v47 = vpack.c.bf16 %v2225_v46, %v2224_v20  ;;  %v2204_v53 = vld [vmem:[%s8549_s3 + $0x90] sm:$0xff]  ;;  %v569_v19 = vsel %vm551_vm2, 0.0, %v440_v39  ;;  %v2210_v39 = vld [vmem:[%s8549_s3 + $0xc0] sm:$0xff] }
  0xd5   : > { %1399 = vmatmul.mubr.f32.gmra.mrb[18].mxu0 %v1011_v24  ;;  %5707 = vmatprep.subr.bf16.mxu1 %v6091_v0  ;;  %v630_v24 = vrot.slane %v6305_v34, 1  ;;  %v764_v46 = vsel %vm744_vm0, %v635_v2, 0.0 }
  0xd6   : > { %4970 = vmatprep.mubr.msk.f32.mxu0 %vm1001_vm1, %v755_v58  ;;  %v2199_v58 = vld [vmem:[%s8549_s3 + $0x68] sm:$0xff]  ;;  %5753 = vmatprep.subr.bf16.mxu0 %v5752_v47 }
  0xd7   : > { %v5711_v34 = vpack.c.bf16 %v2199_v58, %v2198_v11  ;;  %v759_v25 = vsel %vm744_vm0, %v630_v24, 0.0  ;;  %v5717_v24 = vpack.c.bf16 %v2203_v48, %v2202_v36  ;;  %5755 = vmatpush3.bf16.msra.mxu0 %v5752_v47  ;;  %v441_v11 = vrot.slane %v6327_v44, 7 }
  0xd8   : > { %5709 = vmatpush1.bf16.msra.mxu1 %v5708_v30  ;;  %v761_v30 = vsel %vm744_vm0, %v632_v31, 0.0  ;;  %v634_v58 = vrot.slane %v6327_v44, 1  ;;  %v2209_v31 = vld [vmem:[%s8549_s3 + $0xb8] sm:$0xff]  ;;  %v444_v48 = vrot.slane %v6341_v50, 7 }
  0xd9   : > { %1404 = vmatmul.mubr.f32.gmra.mrb[20].mxu0 %v1012_v61  ;;  %5710 = vmatprep.subr.bf16.mxu1 %v6091_v0  ;;  %v838_v61 = vpop.permute.xlu0 %837 }
  0xda   : > { %4971 = vmatprep.mubr.msk.f32.mxu0 %vm1001_vm1, %v756_v9  ;;  %v1016_v9 = vsel %vm1001_vm1, %v566_v62, %v838_v61  ;;  %v2207_v61 = vld [vmem:[%s8549_s3 + $0xa8] sm:$0xff]  ;;  %v442_v62 = vrot.slane %v6330_v45, 7  ;;  %v5726_v45 = vpack.c.bf16 %v2209_v31, %v2208_v28  ;;  %v447_v28 = vrot.slane %v6360_v59, 7 }
  0xdb   : > { %v640_v31 = vrot.slane %v6360_v59, 1 }
  0xdc   : > { %5712 = vmatpush1.bf16.msra.mxu1 %v5711_v34  ;;  %v762_v34 = vsel %vm744_vm0, %v633_v10, 0.0  ;;  %v571_v36 = vsel %vm551_vm2, 0.0, %v442_v62  ;;  %v637_v10 = vrot.slane %v6341_v50, 1  ;;  %v576_v59 = vsel %vm551_vm2, 0.0, %v447_v28 }
  0xdd   : > { %1409 = vmatmul.mubr.f32.gmra.mrb[22].mxu0 %v1013_v1  ;;  %5713 = vmatprep.subr.bf16.mxu1 %v6091_v0  ;;  %v760_v1 = vsel %vm744_vm0, %v631_v5, 0.0  ;;  %v2206_v5 = vld [vmem:[%s8549_s3 + $0xa0] sm:$0xff]  ;;  %v647_v28 = vrot.slane %v6396_v15, 1 }
  0xde   : > { %4972 = vmatprep.mubr.msk.f32.mxu0 %vm1001_vm1, %v757_v4  ;;  %v1017_v4 = vsel %vm1001_vm1, %v567_v29, %v840_v6  ;;  %v636_v29 = vrot.slane %v6338_v49, 1 }
  0xe0   : > { %5715 = vmatpush1.bf16.msra.mxu1 %v5714_v35  ;;  %v570_v35 = vsel %vm551_vm2, 0.0, %v441_v11 }
  0xe1   : > { %1414 = vmatmul.mubr.f32.gmra.mrb[24].mxu0 %v1014_v51  ;;  %5716 = vmatprep.subr.bf16.mxu1 %v6091_v0  ;;  %v842_v51 = vpop.permute.xlu0 %841 }
  0xe2   : > { %4973 = vmatprep.mubr.msk.f32.mxu0 %vm1001_vm1, %v758_v57  ;;  %v2205_v57 = vld [vmem:[%s8549_s3 + $0x98] sm:$0xff]  ;;  %v1018_v40 = vsel %vm1001_vm1, %v568_v52, %v842_v51 }
  0xe3   : > { %v5720_v56 = vpack.c.bf16 %v2205_v57, %v2204_v53  ;;  %v2213_v53 = vld [vmem:[%s8549_s3 + $0xd8] sm:$0xff] }
  0xe4   : > { %5718 = vmatpush1.bf16.msra.mxu1 %v5717_v24  ;;  %v2212_v24 = vld [vmem:[%s8549_s3 + $0xd0] sm:$0xff] }
  0xe5   : > { %1419 = vmatmul.mubr.f32.gmra.mrb[26].mxu0 %v1015_v3  ;;  %v844_v3 = vpop.permute.xlu1 %843  ;;  %5719 = vmatprep.subr.bf16.mxu1 %v6091_v0  ;;  %v846_v63 = vpop.permute.xlu0 %845  ;;  %v5732_v50 = vpack.c.bf16 %v2213_v53, %v2212_v24  ;;  %v450_v24 = vrot.slane %v6375_v8, 7  ;;  %v643_v53 = vrot.slane %v6375_v8, 1 }
  0xe6   : > { %4974 = vmatprep.mubr.msk.f32.mxu0 %vm1001_vm1, %v759_v25  ;;  %v1019_v44 = vsel %vm1001_vm1, %v569_v19, %v844_v3  ;;  %v5723_v25 = vpack.c.bf16 %v2207_v61, %v2206_v5  ;;  %v1020_v6 = vsel %vm1001_vm1, %v570_v35, %v846_v63  ;;  %v573_v3 = vsel %vm551_vm2, 0.0, %v444_v48  ;;  %v2215_v19 = vld [vmem:[%s8549_s3 + $0xe8] sm:$0xff]  ;;  %v2216_v63 = vld [vmem:[%s8549_s3 + $0xf0] sm:$0xff] }
  0xe7   : > { %v446_v61 = vrot.slane %v6352_v55, 7  ;;  %v642_v48 = vrot.slane %v6371_v7, 1 }
  0xe8   : > { %5721 = vmatpush1.bf16.msra.mxu1 %v5720_v56  ;;  %v638_v56 = vrot.slane %v6349_v54, 1 }
  0xe9   : > { %1424 = vmatmul.mubr.f32.gmra.mrb[28].mxu0 %v1016_v9  ;;  %5722 = vmatprep.subr.bf16.mxu1 %v6091_v0  ;;  %v763_v9 = vsel %vm744_vm0, %v634_v58, 0.0  ;;  %v848_v20 = vpop.permute.xlu1 %847  ;;  %v850_v51 = vpop.permute.xlu0 %849  ;;  %v766_v58 = vsel %vm744_vm0, %v637_v10, 0.0 }
  0xea   : > { %4975 = vmatprep.mubr.msk.f32.mxu0 %vm1001_vm1, %v760_v1  ;;  %v443_v1 = vrot.slane %v6338_v49, 7  ;;  %v1021_v47 = vsel %vm1001_vm1, %v571_v36, %v848_v20  ;;  %v767_v62 = vsel %vm744_vm0, %v638_v56, 0.0  ;;  %v448_v20 = vrot.slane %v6363_v60, 7 }
  0xeb   : > { %v769_v36 = vsel %vm744_vm0, %v640_v31, 0.0  ;;  %v451_v56 = vrot.slane %v6383_v12, 7 }
  0xec   : > { %5724 = vmatpush1.bf16.msra.mxu1 %v5723_v25  ;;  %v572_v52 = vsel %vm551_vm2, 0.0, %v443_v1  ;;  %v575_v1 = vsel %vm551_vm2, 0.0, %v446_v61 }
  0xed   : > { %1429 = vmatmul.mubr.f32.gmra.mrb[30].mxu0 %v1017_v4  ;;  %5725 = vmatprep.subr.bf16.mxu1 %v6091_v0  ;;  %v2211_v4 = vld [vmem:[%s8549_s3 + $0xc8] sm:$0xff]  ;;  %v1022_v57 = vsel %vm1001_vm1, %v572_v52, %v850_v51  ;;  %v852_v11 = vpop.permute.xlu1 %851  ;;  %v854_v25 = vpop.permute.xlu0 %853 }
  0xee   : > { %4976 = vmatprep.mubr.msk.f32.mxu0 %vm1001_vm1, %v761_v30  ;;  %v5729_v49 = vpack.c.bf16 %v2211_v4, %v2210_v39  ;;  %v765_v30 = vsel %vm744_vm0, %v636_v29, 0.0  ;;  %v1023_v5 = vsel %vm1001_vm1, %v573_v3, %v852_v11  ;;  %v2226_v39 = vld [vmem:[%s8549_s3 + $0x140] sm:$0xff]  ;;  %v2227_v4 = vld [vmem:[%s8549_s3 + $0x148] sm:$0xff]  ;;  %v644_v11 = vrot.slane %v6383_v12, 1 }
  0xef   : > { %v772_v3 = vsel %vm744_vm0, %v643_v53, 0.0  ;;  %v457_v53 = vrot.slane %v6413_v18, 7 }
  0xf0   : > { %5727 = vmatpush1.bf16.msra.mxu1 %v5726_v45  ;;  %v773_v61 = vsel %vm744_vm0, %v644_v11, 0.0  ;;  %v651_v11 = vrot.slane %v6416_v21, 1 }
  0xf1   : > { %1434 = vmatmul.mubr.f32.gmra.mrb[32].mxu0 %v1018_v40  ;;  %5728 = vmatprep.subr.bf16.mxu1 %v6091_v0  ;;  %v445_v40 = vrot.slane %v6349_v54, 7 }
  0xf2   : > { %4977 = vmatprep.mubr.msk.f32.mxu0 %vm1001_vm1, %v762_v34  ;;  %v2214_v34 = vld [vmem:[%s8549_s3 + $0xe0] sm:$0xff] }
  0xf3   : > { %v5735_v54 = vpack.c.bf16 %v2215_v19, %v2214_v34  ;;  %v574_v2 = vsel %vm551_vm2, 0.0, %v445_v40  ;;  %v579_v34 = vsel %vm551_vm2, 0.0, %v450_v24  ;;  %v452_v19 = vrot.slane %v6386_v13, 7 }
  0xf4   : > { %5730 = vmatpush1.bf16.msra.mxu1 %v5729_v49  ;;  %v1024_v35 = vsel %vm1001_vm1, %v574_v2, %v854_v25  ;;  %v5756_v49 = vpack.c.bf16 %v2227_v4, %v2226_v39  ;;  %v453_v25 = vrot.slane %v6393_v14, 7 }
  0xf5   : > { %1439 = vmatmul.mubr.f32.gmra.mrb[34].mxu0 %v1019_v44  ;;  %5731 = vmatprep.subr.bf16.mxu1 %v6091_v0  ;;  %v639_v44 = vrot.slane %v6352_v55, 1 }
  0xf6   : > { %4978 = vmatprep.mubr.msk.f32.mxu0 %vm1001_vm1, %v763_v9  ;;  %v2217_v9 = vld [vmem:[%s8549_s3 + $0xf8] sm:$0xff]  ;;  %5757 = vmatprep.subr.bf16.mxu0 %v5756_v49 }
  0xf7   : > { %v5738_v55 = vpack.c.bf16 %v2217_v9, %v2216_v63  ;;  %v768_v45 = vsel %vm744_vm0, %v639_v44, 0.0  ;;  %5759 = vmatpush3.bf16.msra.mxu0 %v5756_v49  ;;  %v580_v44 = vsel %vm551_vm2, 0.0, %v451_v56  ;;  %v581_v9 = vsel %vm551_vm2, 0.0, %v452_v19 }
  0xf8   : > { %5733 = vmatpush1.bf16.msra.mxu1 %v5732_v50  ;;  %v771_v50 = vsel %vm744_vm0, %v642_v48, 0.0  ;;  %v649_v48 = vrot.slane %v6406_v17, 1  ;;  %v458_v56 = vrot.slane %v6416_v21, 7  ;;  %v652_v19 = vrot.slane %v6423_v22, 1 }
  0xf9   : > { %1444 = vmatmul.mubr.f32.gmra.mrb[36].mxu0 %v1020_v6  ;;  %5734 = vmatprep.subr.bf16.mxu1 %v6091_v0  ;;  %v856_v6 = vpop.permute.xlu1 %855 }
  0xfa   : > { %4979 = vmatprep.mubr.msk.f32.mxu0 %vm1001_vm1, %v764_v46  ;;  %v1025_v29 = vsel %vm1001_vm1, %v575_v1, %v856_v6  ;;  %v858_v46 = vpop.permute.xlu0 %857 }
  0xfc   : > { %5736 = vmatpush1.bf16.msra.mxu1 %v5735_v54 }
  0xfd   : > { %1449 = vmatmul.mubr.f32.gmra.mrb[38].mxu0 %v1021_v47  ;;  %5737 = vmatprep.subr.bf16.mxu1 %v6091_v0  ;;  %v641_v0 = vrot.slane %v6363_v60, 1  ;;  %v1026_v47 = vsel %vm1001_vm1, %v576_v59, %v858_v46  ;;  %v449_v60 = vrot.slane %v6371_v7, 7  ;;  %v860_v10 = vpop.permute.xlu1 %859  ;;  %v648_v46 = vrot.slane %v6403_v16, 1 }
  0xfe   : > { %4980 = vmatprep.mubr.msk.f32.mxu0 %vm1001_vm1, %v765_v30  ;;  %v577_v30 = vsel %vm551_vm2, 0.0, %v448_v20  ;;  %v776_v59 = vsel %vm744_vm0, %v647_v28, 0.0  ;;  %v655_v28 = vrot.slane %v6436_v27, 1 }
  0xff   : > { %v770_v51 = vsel %vm744_vm0, %v641_v0, 0.0  ;;  %v1027_v52 = vsel %vm1001_vm1, %v577_v30, %v860_v10  ;;  %v578_v7 = vsel %vm551_vm2, 0.0, %v449_v60  ;;  %v2230_v0 = vld [vmem:[%s8549_s3 + $0x160] sm:$0xff]  ;;  %v2232_v60 = vld [vmem:[%s8549_s3 + $0x170] sm:$0xff] }
 0x100   : > { %5739 = vmatpush1.bf16.msra.mxu1 %v5738_v55  ;;  %v2228_v55 = vld [vmem:[%s8549_s3 + $0x150] sm:$0xff] }
 0x101   : > { %1454 = vmatmul.mubr.f32.gmra.mrb[40].mxu0 %v1022_v57  ;;  %v862_v57 = vpop.permute.xlu0 %861 }
 0x102   : > { %4981 = vmatprep.mubr.msk.f32.mxu0 %vm1001_vm1, %v766_v58  ;;  %v1028_v40 = vsel %vm1001_vm1, %v578_v7, %v862_v57  ;;  %v864_v58 = vpop.permute.xlu1 %863  ;;  %v650_v57 = vrot.slane %v6413_v18, 1 }
 0x103   : > { %v1029_v8 = vsel %vm1001_vm1, %v579_v34, %v864_v58  ;;  %v586_v34 = vsel %vm551_vm2, 0.0, %v457_v53  ;;  %v467_v53 = vrot.slane %v6469_v41, 7 }
 0x105   : > { %1459 = vmatmul.mubr.f32.gmra.mrb[42].mxu0 %v1023_v5  ;;  %v645_v5 = vrot.slane %v6386_v13, 1  ;;  %v866_v54 = vpop.permute.xlu0 %865  ;;  %v454_v13 = vrot.slane %v6396_v15, 7  ;;  %v2231_v15 = vld [vmem:[%s8549_s3 + $0x168] sm:$0xff] }
 0x106   : > { %4982 = vmatprep.mubr.msk.f32.mxu0 %vm1001_vm1, %v767_v62  ;;  %v1030_v12 = vsel %vm1001_vm1, %v580_v44, %v866_v54  ;;  %v646_v62 = vrot.slane %v6393_v14, 1  ;;  %v868_v2 = vpop.permute.xlu1 %867  ;;  %v2229_v14 = vld [vmem:[%s8549_s3 + $0x158] sm:$0xff]  ;;  %v5764_v4 = vpack.c.bf16 %v2231_v15, %v2230_v0  ;;  %v780_v54 = vsel %vm744_vm0, %v651_v11, 0.0 }
 0x107   : > { %v774_v63 = vsel %vm744_vm0, %v645_v5, 0.0  ;;  %v5760_v1 = vpack.c.bf16 %v2229_v14, %v2228_v55  ;;  %v583_v39 = vsel %vm551_vm2, 0.0, %v454_v13  ;;  %v460_v44 = vrot.slane %v6426_v23, 7 }
 0x108   : > { %v775_v6 = vsel %vm744_vm0, %v646_v62, 0.0  ;;  %v781_v62 = vsel %vm744_vm0, %v652_v19, 0.0  ;;  %v462_v14 = vrot.slane %v6436_v27, 7  ;;  %v784_v0 = vsel %vm744_vm0, %v655_v28, 0.0 }
 0x109   : > { %1464 = vmatmul.mubr.f32.gmra.mrb[44].mxu0 %v1024_v35  ;;  %v1031_v35 = vsel %vm1001_vm1, %v581_v9, %v868_v2  ;;  %v870_v31 = vpop.permute.xlu0 %869  ;;  %5761 = vmatprep.subr.bf16.mxu0 %v5760_v1  ;;  %v654_v9 = vrot.slane %v6433_v26, 1  ;;  %v589_v55 = vsel %vm551_vm2, 0.0, %v460_v44 }
 0x10a   : > { %4983 = vmatprep.mubr.msk.f32.mxu0 %vm1001_vm1, %v768_v45  ;;  %v582_v45 = vsel %vm551_vm2, 0.0, %v453_v25  ;;  %5763 = vmatpush3.bf16.msra.mxu0 %v5760_v1  ;;  %v463_v1 = vrot.slane %v6449_v32, 7  ;;  %v591_v15 = vsel %vm551_vm2, 0.0, %v462_v14 }
 0x10b   : > { %v1032_v20 = vsel %vm1001_vm1, %v582_v45, %v870_v31  ;;  %5765 = vmatprep.subr.bf16.mxu0 %v5764_v4 }
 0x10d   : > { %1469 = vmatmul.mubr.f32.gmra.mrb[46].mxu0 %v1025_v29  ;;  %v455_v29 = vrot.slane %v6403_v16, 7  ;;  %v2233_v16 = vld [vmem:[%s8549_s3 + $0x178] sm:$0xff]  ;;  %v874_v10 = vpop.permute.xlu0 %873 }
 0x10e   : > { %4984 = vmatprep.mubr.msk.f32.mxu0 %vm1001_vm1, %v769_v36  ;;  %v872_v36 = vpop.permute.xlu1 %871  ;;  %5767 = vmatpush3.bf16.msra.mxu0 %v5764_v4  ;;  %v592_v4 = vsel %vm551_vm2, 0.0, %v463_v1 }
 0x10f   : > { %v1033_v49 = vsel %vm1001_vm1, %v583_v39, %v872_v36  ;;  %v584_v30 = vsel %vm551_vm2, 0.0, %v455_v29  ;;  %v656_v29 = vrot.slane %v6449_v32, 1  ;;  %v657_v36 = vrot.slane %v6452_v33, 1 }
 0x110   : > { %v1034_v24 = vsel %vm1001_vm1, %v584_v30, %v874_v10  ;;  %v466_v10 = vrot.slane %v6462_v38, 7 }
 0x111   : > { %1474 = vmatmul.mubr.f32.gmra.mrb[48].mxu0 %v1026_v47  ;;  %v456_v47 = vrot.slane %v6406_v17, 7  ;;  %v778_v17 = vsel %vm744_vm0, %v649_v48, 0.0  ;;  %v878_v58 = vpop.permute.xlu0 %877  ;;  %v785_v39 = vsel %vm744_vm0, %v656_v29, 0.0 }
 0x112   : > { %4985 = vmatprep.mubr.msk.f32.mxu0 %vm1001_vm1, %v770_v51  ;;  %v777_v51 = vsel %vm744_vm0, %v648_v46, 0.0  ;;  %v1036_v18 = vsel %vm1001_vm1, %v586_v34, %v878_v58  ;;  %v464_v46 = vrot.slane %v6452_v33, 7  ;;  %v469_v34 = vrot.slane %v6479_v43, 7 }
 0x113   : > { %v585_v7 = vsel %vm551_vm2, 0.0, %v456_v47  ;;  %v465_v47 = vrot.slane %v6459_v37, 7 }
 0x114   : > { %v593_v48 = vsel %vm551_vm2, 0.0, %v464_v46  ;;  %v5977_v46 = vld [vmem:[%s6226_s13 + $0x198] sm:$0xff] }
 0x115   : > { %1479 = vmatmul.mubr.f32.gmra.mrb[50].mxu0 %v1027_v52  ;;  %v5768_v52 = vpack.c.bf16 %v2233_v16, %v2232_v60  ;;  %v882_v25 = vpop.permute.xlu0 %881  ;;  %v786_v16 = vsel %vm744_vm0, %v657_v36, 0.0  ;;  %v474_v36 = vrot.slane %v5977_v46, 7 }
 0x116   : > { %4986 = vmatprep.mubr.msk.f32.mxu0 %vm1001_vm1, %v771_v50  ;;  %v876_v50 = vpop.permute.xlu1 %875 }
 0x117   : > { %5769 = vmatprep.subr.bf16.mxu0 %v5768_v52 }
 0x118   : > { %5771 = vmatpush3.bf16.msra.mxu0 %v5768_v52 }
 0x119   : > { %1484 = vmatmul.mubr.f32.gmra.mrb[52].mxu0 %v1028_v40  ;;  %v1035_v40 = vsel %vm1001_vm1, %v585_v7, %v876_v50  ;;  %v886_v31 = vpop.permute.xlu0 %885  ;;  %v595_v7 = vsel %vm551_vm2, 0.0, %v466_v10  ;;  %v603_v10 = vsel %vm551_vm2, 0.0, %v474_v36 }
 0x11a   : > { %4987 = vmatprep.mubr.msk.f32.mxu0 %vm1001_vm1, %v772_v3  ;;  %v779_v3 = vsel %vm744_vm0, %v650_v57, 0.0  ;;  %v880_v5 = vpop.permute.xlu1 %879  ;;  %v660_v57 = vrot.slane %v6469_v41, 1  ;;  %v596_v41 = vsel %vm551_vm2, 0.0, %v467_v53 }
 0x11c   : > { %v789_v58 = vsel %vm744_vm0, %v660_v57, 0.0 }
 0x11d   : > { %1489 = vmatmul.mubr.f32.gmra.mrb[54].mxu0 %v1029_v8  ;;  %v459_v8 = vrot.slane %v6423_v22, 7 }
 0x11e   : > { %4988 = vmatprep.mubr.msk.f32.mxu0 %vm1001_vm1, %v773_v61  ;;  %v587_v61 = vsel %vm551_vm2, 0.0, %v458_v56  ;;  %v884_v13 = vpop.permute.xlu1 %883  ;;  %v661_v56 = vrot.slane %v6472_v42, 1 }
 0x11f   : > { %v1037_v21 = vsel %vm1001_vm1, %v587_v61, %v880_v5  ;;  %v588_v2 = vsel %vm551_vm2, 0.0, %v459_v8 }
 0x120   : > { %v1038_v22 = vsel %vm1001_vm1, %v588_v2, %v882_v25  ;;  %v790_v19 = vsel %vm744_vm0, %v661_v56, 0.0 }
 0x121   : > { %1494 = vmatmul.mubr.f32.gmra.mrb[56].mxu0 %v1030_v12  ;;  %v653_v12 = vrot.slane %v6426_v23, 1  ;;  %v1039_v23 = vsel %vm1001_vm1, %v589_v55, %v884_v13  ;;  %v5975_v55 = vld [vmem:[%s6226_s13 + $0x188] sm:$0xff] }
 0x122   : > { %4989 = vmatprep.mubr.msk.f32.mxu0 %vm1001_vm1, %v774_v63  ;;  %v461_v63 = vrot.slane %v6433_v26, 7  ;;  %v665_v14 = vrot.slane %v5975_v55, 1 }
 0x124   : > { %v590_v45 = vsel %vm551_vm2, 0.0, %v461_v63 }
 0x125   : > { %1499 = vmatmul.mubr.f32.gmra.mrb[58].mxu0 %v1031_v35  ;;  %v782_v35 = vsel %vm744_vm0, %v653_v12, 0.0  ;;  %v1040_v26 = vsel %vm1001_vm1, %v590_v45, %v886_v31 }
 0x126   : > { %4990 = vmatprep.mubr.msk.f32.mxu0 %vm1001_vm1, %v775_v6  ;;  %v783_v6 = vsel %vm744_vm0, %v654_v9, 0.0 }
 0x129   : > { %1504 = vmatmul.mubr.f32.gmra.mrb[60].mxu0 %v1032_v20  ;;  %v888_v20 = vpop.permute.xlu1 %887 }
 0x12a   : > { %4991 = vmatprep.mubr.msk.f32.mxu0 %vm1001_vm1, %v776_v59  ;;  %v1041_v27 = vsel %vm1001_vm1, %v591_v15, %v888_v20  ;;  %v890_v59 = vpop.permute.xlu0 %889 }
 0x12b   : > { %v1042_v32 = vsel %vm1001_vm1, %v592_v4, %v890_v59  ;;  %v667_v59 = vrot.slane %v5977_v46, 1 }
 0x12d   : > { %1509 = vmatmul.mubr.f32.gmra.mrb[62].mxu0 %v1033_v49  ;;  %v658_v49 = vrot.slane %v6459_v37, 1  ;;  %v892_v60 = vpop.permute.xlu1 %891 }
 0x12e   : > { %4992 = vmatprep.mubr.msk.f32.mxu0 %vm1001_vm1, %v777_v51  ;;  %v1043_v33 = vsel %vm1001_vm1, %v593_v48, %v892_v60  ;;  %v659_v51 = vrot.slane %v6462_v38, 1  ;;  %v894_v30 = vpop.permute.xlu0 %893 }
 0x12f   : > { %v787_v52 = vsel %vm744_vm0, %v658_v49, 0.0  ;;  %v5978_v49 = vld [vmem:[%s6226_s13 + $0x1a0] sm:$0xff] }
 0x130   : > { %v475_v60 = vrot.slane %v5978_v49, 7 }
 0x131   : > { %1514 = vmatmul.mubr.f32.gmra.mrb[64].mxu0 %v1034_v24  ;;  %v594_v24 = vsel %vm551_vm2, 0.0, %v465_v47  ;;  %v896_v50 = vpop.permute.xlu1 %895 }
 0x132   : > { %4993 = vmatprep.mubr.msk.f32.mxu0 %vm1001_vm1, %v778_v17  ;;  %v1044_v37 = vsel %vm1001_vm1, %v594_v24, %v894_v30  ;;  %v788_v17 = vsel %vm744_vm0, %v659_v51, 0.0  ;;  %v1045_v38 = vsel %vm1001_vm1, %v595_v7, %v896_v50  ;;  %v898_v11 = vpop.permute.xlu0 %897  ;;  %v5979_v30 = vld [vmem:[%s6226_s13 + $0x1a8] sm:$0xff]  ;;  %v604_v57 = vsel %vm551_vm2, 0.0, %v475_v60 }
 0x133   : > { %v669_v24 = vrot.slane %v5979_v30, 1 }
 0x135   : > { %1519 = vmatmul.mubr.f32.gmra.mrb[66].mxu0 %v1035_v40  ;;  %v468_v40 = vrot.slane %v6472_v42, 7  ;;  %v900_v8 = vpop.permute.xlu1 %899  ;;  %v798_v56 = vsel %vm744_vm0, %v669_v24, 0.0 }
 0x136   : > { %4994 = vmatprep.mubr.msk.f32.mxu0 %vm1001_vm1, %v779_v3  ;;  %v1046_v3 = vsel %vm1001_vm1, %v596_v41, %v898_v11  ;;  %v902_v44 = vpop.permute.xlu0 %901 }
 0x137   : > { %v597_v42 = vsel %vm551_vm2, 0.0, %v468_v40 }
 0x138   : > { %v1047_v5 = vsel %vm1001_vm1, %v597_v42, %v900_v8 }
 0x139   : > { %1524 = vmatmul.mubr.f32.gmra.mrb[68].mxu0 %v1036_v18  ;;  %v662_v18 = vrot.slane %v6479_v43, 1  ;;  %v598_v43 = vsel %vm551_vm2, 0.0, %v469_v34  ;;  %v904_v63 = vpop.permute.xlu1 %903 }
 0x13a   : > { %4995 = vmatprep.mubr.msk.f32.mxu0 %vm1001_vm1, %v780_v54  ;;  %v5973_v54 = vld [vmem:[%s6226_s13 + $0x178] sm:$0xff]  ;;  %v1048_v25 = vsel %vm1001_vm1, %v598_v43, %v902_v44  ;;  %v906_v28 = vpop.permute.xlu0 %905 }
 0x13b   : > { %v470_v61 = vrot.slane %v5973_v54, 7  ;;  %v791_v12 = vsel %vm744_vm0, %v662_v18, 0.0 }
 0x13d   : > { %1529 = vmatmul.mubr.f32.gmra.mrb[70].mxu0 %v1037_v21  ;;  %v663_v21 = vrot.slane %v5973_v54, 1  ;;  %v599_v13 = vsel %vm551_vm2, 0.0, %v470_v61  ;;  %v908_v20 = vpop.permute.xlu1 %907 }
 0x13e   : > { %4996 = vmatprep.mubr.msk.f32.mxu0 %vm1001_vm1, %v781_v62  ;;  %v5974_v62 = vld [vmem:[%s6226_s13 + $0x180] sm:$0xff] }
 0x13f   : > { %v471_v2 = vrot.slane %v5974_v62, 7  ;;  %v792_v9 = vsel %vm744_vm0, %v663_v21, 0.0  ;;  %v5982_v21 = vld [vmem:[%s6226_s13 + $0x1c0] sm:$0xff] }
 0x140   : > { %v479_v44 = vrot.slane %v5982_v21, 7  ;;  %v672_v43 = vrot.slane %v5982_v21, 1 }
 0x141   : > { %1534 = vmatmul.mubr.f32.gmra.mrb[72].mxu0 %v1038_v22  ;;  %v664_v22 = vrot.slane %v5974_v62, 1  ;;  %v912_v48 = vpop.permute.xlu1 %911 }
 0x142   : > { %4997 = vmatprep.mubr.msk.f32.mxu0 %vm1001_vm1, %v782_v35  ;;  %v1049_v35 = vsel %vm1001_vm1, %v599_v13, %v904_v63  ;;  %v1053_v51 = vsel %vm1001_vm1, %v603_v10, %v912_v48 }
 0x143   : > { %v793_v31 = vsel %vm744_vm0, %v664_v22, 0.0 }
 0x145   : > { %1539 = vmatmul.mubr.f32.gmra.mrb[74].mxu0 %v1039_v23  ;;  %v472_v23 = vrot.slane %v5975_v55, 7  ;;  %v916_v40 = vpop.permute.xlu1 %915 }
 0x146   : > { %4998 = vmatprep.mubr.msk.f32.mxu0 %vm1001_vm1, %v783_v6  ;;  %v600_v6 = vsel %vm551_vm2, 0.0, %v471_v2 }
 0x147   : > { %v1050_v45 = vsel %vm1001_vm1, %v600_v6, %v906_v28  ;;  %v601_v15 = vsel %vm551_vm2, 0.0, %v472_v23  ;;  %v5983_v23 = vld [vmem:[%s6226_s13 + $0x1c8] sm:$0xff] }
 0x149   : > { %1544 = vmatmul.mubr.f32.gmra.mrb[76].mxu0 %v1040_v26  ;;  %v5976_v26 = vld [vmem:[%s6226_s13 + $0x190] sm:$0xff]  ;;  %v920_v62 = vpop.permute.xlu1 %919 }
 0x14a   : > { %4999 = vmatprep.mubr.msk.f32.mxu0 %vm1001_vm1, %v784_v0  ;;  %v473_v1 = vrot.slane %v5976_v26, 7  ;;  %v666_v29 = vrot.slane %v5976_v26, 1  ;;  %v794_v0 = vsel %vm744_vm0, %v665_v14, 0.0  ;;  %v480_v14 = vrot.slane %v5983_v23, 7 }
 0x14b   : > { %v801_v26 = vsel %vm744_vm0, %v672_v43, 0.0 }
 0x14c   : > { %v795_v4 = vsel %vm744_vm0, %v666_v29, 0.0 }
 0x14d   : > { %1549 = vmatmul.mubr.f32.gmra.mrb[78].mxu0 %v1041_v27  ;;  %v1051_v27 = vsel %vm1001_vm1, %v601_v15, %v908_v20 }
 0x14e   : > { %5000 = vmatprep.mubr.msk.f32.mxu0 %vm1001_vm1, %v785_v39  ;;  %v910_v39 = vpop.permute.xlu0 %909 }
 0x151   : > { %1554 = vmatmul.mubr.f32.gmra.mrb[80].mxu0 %v1042_v32  ;;  %v602_v32 = vsel %vm551_vm2, 0.0, %v473_v1  ;;  %v608_v1 = vsel %vm551_vm2, 0.0, %v479_v44 }
 0x152   : > { %5001 = vmatprep.mubr.msk.f32.mxu0 %vm1001_vm1, %v786_v16  ;;  %v1052_v47 = vsel %vm1001_vm1, %v602_v32, %v910_v39  ;;  %v668_v16 = vrot.slane %v5978_v49, 1 }
 0x154   : > { %v797_v53 = vsel %vm744_vm0, %v668_v16, 0.0 }
 0x155   : > { %1559 = vmatmul.mubr.f32.gmra.mrb[82].mxu0 %v1043_v33  ;;  %v796_v33 = vsel %vm744_vm0, %v667_v59, 0.0 }
 0x156   : > { %5002 = vmatprep.mubr.msk.f32.mxu0 %vm1001_vm1, %v787_v52  ;;  %v476_v52 = vrot.slane %v5979_v30, 7 }
 0x158   : > { %v605_v11 = vsel %vm551_vm2, 0.0, %v476_v52 }
 0x159   : > { %1564 = vmatmul.mubr.f32.gmra.mrb[84].mxu0 %v1044_v37  ;;  %v914_v37 = vpop.permute.xlu0 %913  ;;  %v1055_v41 = vsel %vm1001_vm1, %v605_v11, %v916_v40 }
 0x15a   : > { %5003 = vmatprep.mubr.msk.f32.mxu0 %vm1001_vm1, %v788_v17  ;;  %v1054_v50 = vsel %vm1001_vm1, %v604_v57, %v914_v37  ;;  %v5980_v17 = vld [vmem:[%s6226_s13 + $0x1b0] sm:$0xff] }
 0x15b   : > { %v477_v7 = vrot.slane %v5980_v17, 7 }
 0x15d   : > { %1569 = vmatmul.mubr.f32.gmra.mrb[86].mxu0 %v1045_v38  ;;  %v670_v38 = vrot.slane %v5980_v17, 1  ;;  %v918_v8 = vpop.permute.xlu0 %917  ;;  %v606_v42 = vsel %vm551_vm2, 0.0, %v477_v7 }
 0x15e   : > { %5004 = vmatprep.mubr.msk.f32.mxu0 %vm1001_vm1, %v789_v58  ;;  %v6986_v58 = vld [vmem:[%s8548_s2] ss:$0 sm:$0xff] }
 0x161   : > { %1574 = vmatmul.mubr.f32.gmra.mrb[88].mxu0 %v1046_v3  ;;  %v5981_v3 = vld [vmem:[%s6226_s13 + $0x1b8] sm:$0xff] }
 0x162   : > { %5005 = vmatprep.mubr.msk.f32.mxu0 %vm1001_vm1, %v790_v19  ;;  %v478_v34 = vrot.slane %v5981_v3, 7  ;;  %v671_v18 = vrot.slane %v5981_v3, 1  ;;  %v799_v19 = vsel %vm744_vm0, %v670_v38, 0.0  ;;  %v5986_v38 = vld [vmem:[%s6226_s13 + $0x1e0] sm:$0xff] }
 0x163   : > { %v483_v40 = vrot.slane %v5986_v38, 7  ;;  %v676_v11 = vrot.slane %v5986_v38, 1 }
 0x164   : > { %v800_v2 = vsel %vm744_vm0, %v671_v18, 0.0  ;;  %v607_v22 = vsel %vm551_vm2, 0.0, %v478_v34 }
 0x165   : > { %1579 = vmatmul.mubr.f32.gmra.mrb[90].mxu0 %v1047_v5  ;;  %v1057_v28 = vsel %vm1001_vm1, %v607_v22, %v920_v62  ;;  %v805_v62 = vsel %vm744_vm0, %v676_v11, 0.0 }
 0x166   : > { %5006 = vmatprep.mubr.msk.f32.mxu0 %vm1001_vm1, %v791_v12  ;;  %v1056_v12 = vsel %vm1001_vm1, %v606_v42, %v918_v8 }
 0x169   : > { %1584 = vmatmul.mubr.f32.gmra.mrb[92].mxu0 %v1048_v25 }
 0x16a   : > { %5007 = vmatprep.mubr.msk.f32.mxu0 %vm1001_vm1, %v792_v9 }
 0x16d   : > { %1589 = vmatmul.mubr.f32.gmra.mrb[94].mxu0 %v1049_v35 }
 0x16e   : > { %5008 = vmatprep.mubr.msk.f32.mxu0 %vm1001_vm1, %v793_v31  ;;  %v673_v31 = vrot.slane %v5983_v23, 1 }
 0x170   : > { %v802_v32 = vsel %vm744_vm0, %v673_v31, 0.0 }
 0x171   : > { %1594 = vmatmul.mubr.f32.gmra.mrb[96].mxu0 %v1050_v45  ;;  %v922_v45 = vpop.permute.xlu0 %921 }
 0x172   : > { %5009 = vmatprep.mubr.msk.f32.mxu0 %vm1001_vm1, %v794_v0  ;;  %v1058_v36 = vsel %vm1001_vm1, %v608_v1, %v922_v45 }
 0x175   : > { %1599 = vmatmul.mubr.f32.gmra.mrb[98].mxu0 %v1051_v27  ;;  %v5984_v27 = vld [vmem:[%s6226_s13 + $0x1d0] sm:$0xff]  ;;  %v926_v24 = vpop.permute.xlu0 %925 }
 0x176   : > { %5010 = vmatprep.mubr.msk.f32.mxu0 %vm1001_vm1, %v795_v4  ;;  %v481_v46 = vrot.slane %v5984_v27, 7  ;;  %v674_v59 = vrot.slane %v5984_v27, 1  ;;  %v924_v4 = vpop.permute.xlu1 %923  ;;  %v5989_v27 = vld [vmem:[%s6226_s13 + $0x1f8] sm:$0xff] }
 0x178   : > { %v803_v37 = vsel %vm744_vm0, %v674_v59, 0.0  ;;  %v679_v59 = vrot.slane %v5989_v27, 1 }
 0x179   : > { %1604 = vmatmul.mubr.f32.gmra.mrb[100].mxu0 %v1052_v47  ;;  %v609_v47 = vsel %vm551_vm2, 0.0, %v480_v14  ;;  %v930_v43 = vpop.permute.xlu0 %929 }
 0x17a   : > { %5011 = vmatprep.mubr.msk.f32.mxu0 %vm1001_vm1, %v796_v33  ;;  %v5985_v33 = vld [vmem:[%s6226_s13 + $0x1d8] sm:$0xff]  ;;  %v928_v3 = vpop.permute.xlu1 %927 }
 0x17b   : > { %v482_v10 = vrot.slane %v5985_v33, 7  ;;  %v675_v30 = vrot.slane %v5985_v33, 1 }
 0x17d   : > { %1609 = vmatmul.mubr.f32.gmra.mrb[102].mxu0 %v1053_v51  ;;  %v1059_v51 = vsel %vm1001_vm1, %v609_v47, %v924_v4  ;;  %v804_v34 = vsel %vm744_vm0, %v675_v30, 0.0  ;;  %v611_v18 = vsel %vm551_vm2, 0.0, %v482_v10 }
 0x17e   : > { %5012 = vmatprep.mubr.msk.f32.mxu0 %vm1001_vm1, %v797_v53  ;;  %v610_v53 = vsel %vm551_vm2, 0.0, %v481_v46  ;;  %v1061_v21 = vsel %vm1001_vm1, %v611_v18, %v928_v3  ;;  %v932_v45 = vpop.permute.xlu1 %931  ;;  %v486_v46 = vrot.slane %v5989_v27, 7 }
 0x181   : > { %1614 = vmatmul.mubr.f32.gmra.mrb[104].mxu0 %v1054_v50 }
 0x182   : > { %5013 = vmatprep.mubr.msk.f32.mxu0 %vm1001_vm1, %v798_v56  ;;  %v1060_v56 = vsel %vm1001_vm1, %v610_v53, %v926_v24  ;;  %v936_v30 = vpop.permute.xlu1 %935  ;;  %v808_v24 = vsel %vm744_vm0, %v679_v59, 0.0 }
 0x184   : > { %v1355_v5 = vpop.f32.mrb[0].mxu0 }
 0x185   : > { %v1356_v54 = vadd.f32 %v6986_v58, %v1355_v5  ;;  %v1357_v61 = vpop.f32.mrb[1].mxu0  ;;  %1619 = vmatmul.mubr.f32.gmra.mrb[106].mxu0 %v1055_v41 }
 0x186   : > { %5014 = vmatprep.mubr.msk.f32.mxu0 %vm1001_vm1, %v799_v19 }
 0x187   : > { %v6997_v25 = vmax.f32 %v1356_v54, 0.0  ;;  %v5987_v54 = vld [vmem:[%s6226_s13 + $0x1e8] sm:$0xff] }
 0x188   : > { %v1360_v63 = vpop.f32.mrb[2].mxu0  ;;  %v484_v61 = vrot.slane %v5987_v54, 7  ;;  %v677_v44 = vrot.slane %v5987_v54, 1 }
 0x189   : > { %v1802_v13 = vrot.slane %v6997_v25, 7  ;;  %v1361_v35 = vadd.f32 %v6986_v58, %v1360_v63  ;;  %v1362_v55 = vpop.f32.mrb[3].mxu0  ;;  %1624 = vmatmul.mubr.f32.gmra.mrb[108].mxu0 %v1056_v12  ;;  %2305 = vmatprep.mubr.f32.mxu1 %v6997_v25 }
 0x18a   : > { %5015 = vmatprep.mubr.msk.f32.mxu0 %vm1001_vm1, %v800_v2  ;;  %v612_v2 = vsel %vm551_vm2, 0.0, %v483_v40  ;;  %v5988_v55 = vld [vmem:[%s6226_s13 + $0x1f0] sm:$0xff]  ;;  %v613_v1 = vsel %vm551_vm2, 0.0, %v484_v61  ;;  %v1994_v40 = vrot.slane %v6997_v25, 1  ;;  %s8483_s13 = scalar_lea.vmem [#allocation5], %s4956_s14 }
 0x18b   : > { %v7012_v6 = vmax.f32 %v1361_v35, 0.0  ;;  %5026 = vmatmul.mubr.msk.f32.vlgmr.msra.gmra.mrb[0].mxu1 %vm7002_vm3, %v1802_v13  ;;  %v485_v23 = vrot.slane %v5988_v55, 7  ;;  %v1062_v14 = vsel %vm1001_vm1, %v612_v2, %v930_v43  ;;  %s4876_s18 = sshll.u32 %s8483_s13, 4  ;;  %s8500_s18 = int_to_ptr.vmem [resolvable:$true] %s4876_s18 }
 0x18c   : > { %v1365_v29 = vpop.f32.mrb[4].mxu0  ;;  %s6020_s21 = scalar_lea.vmem %s8500_s18, 1024  ;;  %p6027_p2 = scmp.lt.s32.totalorder %s8500_s18, %s6025_s22 }
 0x18d   : > { %v1803_v20 = vrot.slane %v7012_v6, 7  ;;  %v1366_v0 = vadd.f32 %v6986_v58, %v1365_v29  ;;  %v1367_v15 = vpop.f32.mrb[5].mxu0  ;;  %1629 = vmatmul.mubr.f32.gmra.mrb[110].mxu0 %v1057_v28  ;;  %2310 = vmatprep.mubr.f32.mxu1 %v7012_v6  ;;  %v678_v28 = vrot.slane %v5988_v55, 1  ;;  %v1995_v18 = vrot.slane %v7012_v6, 1  ;;  %p6021_p6 = scmp.ne.s32.totalorder %s8500_s18, %s6020_s21  ;;  %p6028_p3 = scmp.lt.s32.totalorder %s6026_s23, %s6020_s21 }
 0x18e   : > { %5016 = vmatprep.mubr.msk.f32.mxu0 %vm1001_vm1, %v801_v26  ;;  %v806_v26 = vsel %vm744_vm0, %v677_v44, 0.0 }
 0x18f   : > { %v7024_v39 = vmax.f32 %v1366_v0, 0.0  ;;  %5028 = vmatmul.mubr.msk.f32.gmra.mrb[2].mxu1 %vm7002_vm3, %v1803_v20  ;;  %v807_v47 = vsel %vm744_vm0, %v678_v28, 0.0  ;;  %p6022_p10 = pnand %p6021_p6, %p8736_p9  ;;  %p6029_p4 = por %p6028_p3, %p6027_p2 }
 0x190   : > { %v1370_v49 = vpop.f32.mrb[6].mxu0 }
 0x191   : > { %v1804_v60 = vrot.slane %v7024_v39, 7  ;;  %v1371_v16 = vadd.f32 %v6986_v58, %v1370_v49  ;;  %v1372_v48 = vpop.f32.mrb[7].mxu0  ;;  %1634 = vmatmul.mubr.f32.gmra.mrb[112].mxu0 %v1058_v36  ;;  %2315 = vmatprep.mubr.f32.mxu1 %v7024_v39  ;;  %v1063_v36 = vsel %vm1001_vm1, %v613_v1, %v932_v45  ;;  %v614_v49 = vsel %vm551_vm2, 0.0, %v485_v23  ;;  %p6023_p12 = pneg %p6022_p10 }
 0x192   : > { %5017 = vmatprep.mubr.msk.f32.mxu0 %vm1001_vm1, %v802_v32  ;;  %v934_v32 = vpop.permute.xlu0 %933 }
 0x193   : > { %v7036_v52 = vmax.f32 %v1371_v16, 0.0  ;;  %5030 = vmatmul.mubr.msk.f32.gmra.mrb[4].mxu1 %vm7002_vm3, %v1804_v60  ;;  %v1064_v10 = vsel %vm1001_vm1, %v614_v49, %v934_v32  ;;  %p6030_p7 = pnand %p6029_p4, %p6023_p12 }
 0x194   : > { %v1375_v57 = vpop.f32.mrb[8].mxu0 }
 0x195   : > { %v1805_v50 = vrot.slane %v7036_v52, 7  ;;  %v1376_v17 = vadd.f32 %v6986_v58, %v1375_v57  ;;  %v1377_v7 = vpop.f32.mrb[9].mxu0  ;;  %1639 = vmatmul.mubr.f32.gmra.mrb[114].mxu0 %v1059_v51  ;;  %2320 = vmatprep.mubr.f32.mxu1 %v7036_v52  ;;  %v1997_v61 = vrot.slane %v7036_v52, 1 }
 0x196   : > { %5018 = vmatprep.mubr.msk.f32.mxu0 %vm1001_vm1, %v803_v37  ;;  %v615_v37 = vsel %vm551_vm2, 0.0, %v486_v46 }
 0x197   : > { %v7048_v41 = vmax.f32 %v1376_v17, 0.0  ;;  %5032 = vmatmul.mubr.msk.f32.gmra.mrb[6].mxu1 %vm7002_vm3, %v1805_v50  ;;  %v1065_v7 = vsel %vm1001_vm1, %v615_v37, %v936_v30 }
 0x198   : > { %v1380_v8 = vpop.f32.mrb[10].mxu0 }
 0x199   : > { %v1806_v19 = vrot.slane %v7048_v41, 7  ;;  %v1381_v42 = vadd.f32 %v6986_v58, %v1380_v8  ;;  %v1382_v5 = vpop.f32.mrb[11].mxu0  ;;  %1644 = vmatmul.mubr.f32.gmra.mrb[116].mxu0 %v1060_v56  ;;  %2325 = vmatprep.mubr.f32.mxu1 %v7048_v41  ;;  %v1998_v6 = vrot.slane %v7048_v41, 1 }
 0x19a   : > { %5019 = vmatprep.mubr.msk.f32.mxu0 %vm1001_vm1, %v804_v34 }
 0x19b   : > { %v7060_v12 = vmax.f32 %v1381_v42, 0.0  ;;  %5034 = vmatmul.mubr.msk.f32.gmra.mrb[8].mxu1 %vm7002_vm3, %v1806_v19  ;;  %v1996_v19 = vrot.slane %v7024_v39, 1 }
 0x19c   : > { %v1385_v22 = vpop.f32.mrb[12].mxu0 }
 0x19d   : > { %v1807_v63 = vrot.slane %v7060_v12, 7  ;;  %v1386_v13 = vadd.f32 %v6986_v58, %v1385_v22  ;;  %v1387_v35 = vpop.f32.mrb[13].mxu0  ;;  %1649 = vmatmul.mubr.f32.gmra.mrb[118].mxu0 %v1061_v21  ;;  %2330 = vmatprep.mubr.f32.mxu1 %v7060_v12  ;;  %v1999_v2 = vrot.slane %v7060_v12, 1 }
 0x19e   : > { %5020 = vmatprep.mubr.msk.f32.mxu0 %vm1001_vm1, %v805_v62 }
 0x19f   : > { %v7072_v31 = vmax.f32 %v1386_v13, 0.0  ;;  %5036 = vmatmul.mubr.msk.f32.gmra.mrb[10].mxu1 %vm7002_vm3, %v1807_v63 }
 0x1a0   : > { %v1390_v29 = vpop.f32.mrb[14].mxu0 }
 0x1a1   : > { %v1808_v20 = vrot.slane %v7072_v31, 7  ;;  %v1391_v0 = vadd.f32 %v6986_v58, %v1390_v29  ;;  %v1392_v15 = vpop.f32.mrb[15].mxu0  ;;  %1654 = vmatmul.mubr.f32.gmra.mrb[120].mxu0 %v1062_v14  ;;  %2335 = vmatprep.mubr.f32.mxu1 %v7072_v31  ;;  %v2000_v52 = vrot.slane %v7072_v31, 1 }
 0x1a2   : > { %5021 = vmatprep.mubr.msk.f32.mxu0 %vm1001_vm1, %v806_v26 }
 0x1a3   : > { %v7084_v4 = vmax.f32 %v1391_v0, 0.0  ;;  %5038 = vmatmul.mubr.msk.f32.gmra.mrb[12].mxu1 %vm7002_vm3, %v1808_v20 }
 0x1a4   : > { %v1395_v60 = vpop.f32.mrb[16].mxu0 }
 0x1a5   : > { %v1809_v16 = vrot.slane %v7084_v4, 7  ;;  %v1396_v48 = vadd.f32 %v6986_v58, %v1395_v60  ;;  %v1397_v33 = vpop.f32.mrb[17].mxu0  ;;  %1659 = vmatmul.mubr.f32.gmra.mrb[122].mxu0 %v1063_v36  ;;  %2340 = vmatprep.mubr.f32.mxu1 %v7084_v4  ;;  %v2001_v55 = vrot.slane %v7084_v4, 1 }
 0x1a6   : > { %5022 = vmatprep.mubr.msk.f32.mxu0 %vm1001_vm1, %v807_v47 }
 0x1a7   : > { %v7095_v51 = vmax.f32 %v1396_v48, 0.0  ;;  %5040 = vmatmul.mubr.msk.f32.gmra.mrb[14].mxu1 %vm7002_vm3, %v1809_v16 }
 0x1a8   : > { %v1400_v53 = vpop.f32.mrb[18].mxu0 }
 0x1a9   : > { %v1810_v57 = vrot.slane %v7095_v51, 7  ;;  %v1401_v50 = vadd.f32 %v6986_v58, %v1400_v53  ;;  %v1402_v17 = vpop.f32.mrb[19].mxu0  ;;  %1664 = vmatmul.mubr.f32.gmra.mrb[124].mxu0 %v1064_v10  ;;  %2345 = vmatprep.mubr.f32.mxu1 %v7095_v51  ;;  %v2002_v12 = vrot.slane %v7095_v51, 1 }
 0x1aa   : > { %5023 = vmatprep.mubr.msk.f32.mxu0 %vm1001_vm1, %v808_v24 }
 0x1ab   : > { %v7106_v38 = vmax.f32 %v1401_v50, 0.0  ;;  %5042 = vmatmul.mubr.msk.f32.gmra.mrb[16].mxu1 %vm7002_vm3, %v1810_v57 }
 0x1ac   : > { %v1405_v56 = vpop.f32.mrb[20].mxu0 }
 0x1ad   : > { %v1811_v11 = vrot.slane %v7106_v38, 7  ;;  %v1406_v3 = vadd.f32 %v6986_v58, %v1405_v56  ;;  %v1407_v34 = vpop.f32.mrb[21].mxu0  ;;  %1669 = vmatmul.mubr.f32.gmra.mrb[126].mxu0 %v1065_v7  ;;  %2350 = vmatprep.mubr.f32.mxu1 %v7106_v38  ;;  %v2003_v26 = vrot.slane %v7106_v38, 1 }
 0x1ae   : > { %5560 = vmatprep.mubr.msk.f32.mxu0 %vm744_vm0, %v1994_v40 }
 0x1af   : > { %v1684_v8 = vmax.f32 %v1406_v3, 0.0  ;;  %5044 = vmatmul.mubr.msk.f32.gmra.mrb[18].mxu1 %vm7002_vm3, %v1811_v11 }
 0x1b0   : > { %v1410_v25 = vpop.f32.mrb[22].mxu0 }
 0x1b1   : > { %v1812_v42 = vrot.slane %v1684_v8, 7  ;;  %v1411_v5 = vadd.f32 %v6986_v58, %v1410_v25  ;;  %v1412_v54 = vpop.f32.mrb[23].mxu0  ;;  %2355 = vmatprep.mubr.f32.mxu1 %v1684_v8  ;;  %5561 = vmatmul.mubr.msk.f32.vlgmr.msra.gmra.mrb[128].mxu0 %vm744_vm0, %v1995_v18  ;;  %v2004_v29 = vrot.slane %v1684_v8, 1  ;;  %v3091_v8 = vld [vmem:[%s8551_s5 + $0x80] sm:$0xff] }
 0x1b2   : > { %5563 = vmatprep.mubr.msk.f32.mxu0 %vm744_vm0, %v1996_v19  ;;  %v3092_v19 = vld [vmem:[%s8551_s5 + $0x88] sm:$0xff] }
 0x1b3   : > { %v1685_v21 = vmax.f32 %v1411_v5, 0.0  ;;  %5046 = vmatmul.mubr.msk.f32.gmra.mrb[20].mxu1 %vm7002_vm3, %v1812_v42  ;;  %v5772_v25 = vpack.c.bf16 %v3092_v19, %v3091_v8  ;;  %v3077_v19 = vld [vmem:[%s8551_s5 + $0x10] sm:$0xff] }
 0x1b4   : > { %v1415_v44 = vpop.f32.mrb[24].mxu0 }
 0x1b5   : > { %v1813_v39 = vrot.slane %v1685_v21, 7  ;;  %v1416_v43 = vadd.f32 %v6986_v58, %v1415_v44  ;;  %v1417_v62 = vpop.f32.mrb[25].mxu0  ;;  %2360 = vmatprep.mubr.f32.mxu1 %v1685_v21  ;;  %5564 = vmatmul.mubr.msk.f32.gmra.mrb[130].mxu0 %vm744_vm0, %v1997_v61  ;;  %v2005_v46 = vrot.slane %v1685_v21, 1  ;;  %v3075_v44 = vld [vmem:[%s8551_s5] sm:$0xff] }
 0x1b6   : > { %5566 = vmatprep.mubr.msk.f32.mxu0 %vm744_vm0, %v1998_v6  ;;  %5773 = vmatprep.subr.bf16.mxu1 %v5772_v25  ;;  %v3078_v25 = vld [vmem:[%s8551_s5 + $0x18] sm:$0xff] }
 0x1b7   : > { %v1686_v22 = vmax.f32 %v1416_v43, 0.0  ;;  %5048 = vmatmul.mubr.msk.f32.gmra.mrb[22].mxu1 %vm7002_vm3, %v1813_v39  ;;  %v3076_v39 = vld [vmem:[%s8551_s5 + $0x8] sm:$0xff] }
 0x1b8   : > { %v1420_v63 = vpop.f32.mrb[26].mxu0  ;;  %v5774_v43 = vpack.c.bf16 %v3076_v39, %v3075_v44 }
 0x1b9   : > { %v1814_v41 = vrot.slane %v1686_v22, 7  ;;  %v1421_v13 = vadd.f32 %v6986_v58, %v1420_v63  ;;  %v1422_v35 = vpop.f32.mrb[27].mxu0  ;;  %2365 = vmatprep.mubr.f32.mxu1 %v1686_v22  ;;  %5567 = vmatmul.mubr.msk.f32.gmra.mrb[132].mxu0 %vm744_vm0, %v1999_v2  ;;  %v2006_v59 = vrot.slane %v1686_v22, 1 }
 0x1ba   : > { %5569 = vmatprep.mubr.msk.f32.mxu0 %vm744_vm0, %v2000_v52  ;;  %5775 = vmatpush3.bf16.msra.mxu1 %v5774_v43 }
 0x1bb   : > { %v1687_v23 = vmax.f32 %v1421_v13, 0.0  ;;  %5050 = vmatmul.mubr.msk.f32.gmra.mrb[24].mxu1 %vm7002_vm3, %v1814_v41 }
 0x1bc   : > { %v1425_v14 = vpop.f32.mrb[28].mxu0 }
 0x1bd   : > { %v1815_v28 = vrot.slane %v1687_v23, 7  ;;  %v1426_v31 = vadd.f32 %v6986_v58, %v1425_v14  ;;  %v1427_v45 = vpop.f32.mrb[29].mxu0  ;;  %2370 = vmatprep.mubr.f32.mxu1 %v1687_v23  ;;  %5570 = vmatmul.mubr.msk.f32.gmra.mrb[134].mxu0 %vm744_vm0, %v2001_v55  ;;  %v2007_v60 = vrot.slane %v1687_v23, 1 }
 0x1be   : > { %5572 = vmatprep.mubr.msk.f32.mxu0 %vm744_vm0, %v2002_v12 }
 0x1bf   : > { %v1688_v1 = vmax.f32 %v1426_v31, 0.0  ;;  %5052 = vmatmul.mubr.msk.f32.gmra.mrb[26].mxu1 %vm7002_vm3, %v1815_v28 }
 0x1c0   : > { %v1430_v20 = vpop.f32.mrb[30].mxu0 }
 0x1c1   : > { %v1816_v0 = vrot.slane %v1688_v1, 7  ;;  %v1431_v15 = vadd.f32 %v6986_v58, %v1430_v20  ;;  %v1432_v27 = vpop.f32.mrb[31].mxu0  ;;  %2375 = vmatprep.mubr.f32.mxu1 %v1688_v1  ;;  %5573 = vmatmul.mubr.msk.f32.gmra.mrb[136].mxu0 %vm744_vm0, %v2003_v26  ;;  %v2008_v48 = vrot.slane %v1688_v1, 1 }
 0x1c2   : > { %5575 = vmatprep.mubr.msk.f32.mxu0 %vm744_vm0, %v2004_v29 }
 0x1c3   : > { %v1689_v36 = vmax.f32 %v1431_v15, 0.0  ;;  %5054 = vmatmul.mubr.msk.f32.gmra.mrb[28].mxu1 %vm7002_vm3, %v1816_v0 }
 0x1c4   : > { %v1435_v4 = vpop.f32.mrb[32].mxu0 }
 0x1c5   : > { %v1817_v32 = vrot.slane %v1689_v36, 7  ;;  %v1436_v47 = vadd.f32 %v6986_v58, %v1435_v4  ;;  %v1437_v49 = vpop.f32.mrb[33].mxu0  ;;  %2380 = vmatprep.mubr.f32.mxu1 %v1689_v36  ;;  %5576 = vmatmul.mubr.msk.f32.gmra.mrb[138].mxu0 %vm744_vm0, %v2005_v46  ;;  %v2009_v24 = vrot.slane %v1689_v36, 1 }
 0x1c6   : > { %5578 = vmatprep.mubr.msk.f32.mxu0 %vm744_vm0, %v2006_v59 }
 0x1c7   : > { %v1690_v16 = vmax.f32 %v1436_v47, 0.0  ;;  %5056 = vmatmul.mubr.msk.f32.gmra.mrb[30].mxu1 %vm7002_vm3, %v1817_v32 }
 0x1c8   : > { %v1440_v33 = vpop.f32.mrb[34].mxu0 }
 0x1c9   : > { %v1818_v10 = vrot.slane %v1690_v16, 7  ;;  %v1441_v51 = vadd.f32 %v6986_v58, %v1440_v33  ;;  %v1442_v30 = vpop.f32.mrb[35].mxu0  ;;  %2385 = vmatprep.mubr.f32.mxu1 %v1690_v16  ;;  %5579 = vmatmul.mubr.msk.f32.gmra.mrb[140].mxu0 %vm744_vm0, %v2007_v60  ;;  %v2010_v53 = vrot.slane %v1690_v16, 1 }
 0x1ca   : > { %5581 = vmatprep.mubr.msk.f32.mxu0 %vm744_vm0, %v2008_v48 }
 0x1cb   : > { %v1691_v37 = vmax.f32 %v1441_v51, 0.0  ;;  %5058 = vmatmul.mubr.msk.f32.gmra.mrb[32].mxu1 %vm7002_vm3, %v1818_v10 }
 0x1cc   : > { %v1445_v57 = vpop.f32.mrb[36].mxu0 }
 0x1cd   : > { %v1819_v50 = vrot.slane %v1691_v37, 7  ;;  %v1446_v17 = vadd.f32 %v6986_v58, %v1445_v57  ;;  %v1447_v7 = vpop.f32.mrb[37].mxu0  ;;  %2390 = vmatprep.mubr.f32.mxu1 %v1691_v37  ;;  %5582 = vmatmul.mubr.msk.f32.gmra.mrb[142].mxu0 %vm744_vm0, %v2009_v24  ;;  %v2011_v38 = vrot.slane %v1691_v37, 1 }
 0x1ce   : > { %5584 = vmatprep.mubr.msk.f32.mxu0 %vm744_vm0, %v2010_v53  ;;  %v3093_v7 = vld [vmem:[%s8551_s5 + $0x90] sm:$0xff] }
 0x1cf   : > { %v1692_v40 = vmax.f32 %v1446_v17, 0.0  ;;  %5060 = vmatmul.mubr.msk.f32.gmra.mrb[34].mxu1 %vm7002_vm3, %v1819_v50 }
 0x1d0   : > { %v1450_v56 = vpop.f32.mrb[38].mxu0 }
 0x1d1   : > { %v1820_v11 = vrot.slane %v1692_v40, 7  ;;  %v2012_v3 = vrot.slane %v1692_v40, 1  ;;  %v1451_v34 = vadd.f32 %v6986_v58, %v1450_v56  ;;  %v1452_v18 = vpop.f32.mrb[39].mxu0  ;;  %2395 = vmatprep.mubr.f32.mxu1 %v1692_v40  ;;  %5585 = vmatmul.mubr.msk.f32.gmra.mrb[144].mxu0 %vm744_vm0, %v2011_v38  ;;  %v3094_v38 = vld [vmem:[%s8551_s5 + $0x98] sm:$0xff] }
 0x1d2   : > { %v5776_v40 = vpack.c.bf16 %v3094_v38, %v3093_v7 }
 0x1d3   : > { %v1693_v42 = vmax.f32 %v1451_v34, 0.0  ;;  %5062 = vmatmul.mubr.msk.f32.gmra.mrb[36].mxu1 %vm7002_vm3, %v1820_v11  ;;  %5587 = vmatprep.mubr.msk.f32.mxu0 %vm744_vm0, %v2012_v3 }
 0x1d4   : > { %v1455_v5 = vpop.f32.mrb[40].mxu0  ;;  %5777 = vmatprep.subr.bf16.mxu1 %v5776_v40 }
 0x1d5   : > { %v1821_v54 = vrot.slane %v1693_v42, 7  ;;  %v2013_v61 = vrot.slane %v1693_v42, 1  ;;  %v1456_v21 = vadd.f32 %v6986_v58, %v1455_v5  ;;  %v1457_v6 = vpop.f32.mrb[41].mxu0  ;;  %2400 = vmatprep.mubr.f32.mxu1 %v1693_v42  ;;  %v5778_v42 = vpack.c.bf16 %v3078_v25, %v3077_v19  ;;  %v3194_v25 = vld [vmem:[%s8551_s5 + $0x3b8] sm:$0xff] }
 0x1d7   : > { %v1694_v62 = vmax.f32 %v1456_v21, 0.0  ;;  %5064 = vmatmul.mubr.msk.f32.gmra.mrb[38].mxu1 %vm7002_vm3, %v1821_v54  ;;  %5588 = vmatmul.mubr.msk.f32.gmra.mrb[146].mxu0 %vm744_vm0, %v2013_v61 }
 0x1d8   : > { %v1460_v2 = vpop.f32.mrb[42].mxu0  ;;  %5779 = vmatpush3.bf16.msra.mxu1 %v5778_v42  ;;  %v3081_v42 = vld [vmem:[%s8551_s5 + $0x30] sm:$0xff] }
 0x1d9   : > { %v1822_v22 = vrot.slane %v1694_v62, 7  ;;  %v2014_v52 = vrot.slane %v1694_v62, 1  ;;  %v1461_v63 = vadd.f32 %v6986_v58, %v1460_v2  ;;  %v1462_v41 = vpop.f32.mrb[43].mxu0  ;;  %2405 = vmatprep.mubr.f32.mxu1 %v1694_v62 }
 0x1da   : > { %v3188_v41 = vld [vmem:[%s8551_s5 + $0x388] sm:$0xff] }
 0x1db   : > { %v1695_v13 = vmax.f32 %v1461_v63, 0.0  ;;  %5066 = vmatmul.mubr.msk.f32.gmra.mrb[40].mxu1 %vm7002_vm3, %v1822_v22  ;;  %5590 = vmatprep.mubr.msk.f32.mxu0 %vm744_vm0, %v2014_v52  ;;  %v3187_v63 = vld [vmem:[%s8551_s5 + $0x380] sm:$0xff] }
 0x1dc   : > { %v1465_v35 = vpop.f32.mrb[44].mxu0 }
 0x1dd   : > { %v1823_v55 = vrot.slane %v1695_v13, 7  ;;  %v2015_v23 = vrot.slane %v1695_v13, 1  ;;  %v1466_v12 = vadd.f32 %v6986_v58, %v1465_v35  ;;  %v1467_v14 = vpop.f32.mrb[45].mxu0  ;;  %2410 = vmatprep.mubr.f32.mxu1 %v1695_v13  ;;  %v7245_v35 = vpack.c.bf16 %v3188_v41, %v3187_v63  ;;  %v3100_v63 = vld [vmem:[%s8551_s5 + $0xc8] sm:$0xff]  ;;  %v3195_v41 = vld [vmem:[%s8551_s5 + $0x3c0] sm:$0xff] }
 0x1df   : > { %v1696_v28 = vmax.f32 %v1466_v12, 0.0  ;;  %5068 = vmatmul.mubr.msk.f32.gmra.mrb[42].mxu1 %vm7002_vm3, %v1823_v55  ;;  %5591 = vmatmul.mubr.msk.f32.gmra.mrb[148].mxu0 %vm744_vm0, %v2015_v23  ;;  %v3171_v55 = vld [vmem:[%s8551_s5 + $0x300] sm:$0xff]  ;;  %v3172_v23 = vld [vmem:[%s8551_s5 + $0x308] sm:$0xff] }
 0x1e0   : > { %v1470_v31 = vpop.f32.mrb[46].mxu0  ;;  %v7253_v14 = vpack.c.bf16 %v3172_v23, %v3171_v55  ;;  %5869 = vmatprep.subr.bf16.mxu0 %v7245_v35  ;;  %v3196_v23 = vld [vmem:[%s8551_s5 + $0x3c8] sm:$0xff] }
 0x1e1   : > { %v1824_v45 = vrot.slane %v1696_v28, 7  ;;  %v2016_v26 = vrot.slane %v1696_v28, 1  ;;  %v1471_v1 = vadd.f32 %v6986_v58, %v1470_v31  ;;  %v1472_v29 = vpop.f32.mrb[47].mxu0  ;;  %2415 = vmatprep.mubr.f32.mxu1 %v1696_v28 }
 0x1e2   : > { %5871 = vmatpush3.bf16.msra.mxu0 %v7253_v14  ;;  %v3190_v29 = vld [vmem:[%s8551_s5 + $0x398] sm:$0xff] }
 0x1e3   : > { %v1697_v20 = vmax.f32 %v1471_v1, 0.0  ;;  %5070 = vmatmul.mubr.msk.f32.gmra.mrb[44].mxu1 %vm7002_vm3, %v1824_v45  ;;  %5593 = vmatprep.mubr.msk.f32.mxu0 %vm744_vm0, %v2016_v26  ;;  %v3189_v1 = vld [vmem:[%s8551_s5 + $0x390] sm:$0xff] }
 0x1e4   : > { %v1475_v0 = vpop.f32.mrb[48].mxu0 }
 0x1e5   : > { %v1825_v15 = vrot.slane %v1697_v20, 7  ;;  %v2017_v27 = vrot.slane %v1697_v20, 1  ;;  %v1476_v46 = vadd.f32 %v6986_v58, %v1475_v0  ;;  %v1477_v36 = vpop.f32.mrb[49].mxu0  ;;  %2420 = vmatprep.mubr.f32.mxu1 %v1697_v20  ;;  %v7267_v0 = vpack.c.bf16 %v3190_v29, %v3189_v1 }
 0x1e6   : > { %v7370_v29 = vpack.c.bf16 %v3196_v23, %v3195_v41  ;;  %v3106_v41 = vld [vmem:[%s8551_s5 + $0xf8] sm:$0xff] }
 0x1e7   : > { %v1698_v59 = vmax.f32 %v1476_v46, 0.0  ;;  %5072 = vmatmul.mubr.msk.f32.gmra.mrb[46].mxu1 %vm7002_vm3, %v1825_v15  ;;  %5594 = vmatmul.mubr.msk.f32.gmra.mrb[150].mxu0 %vm744_vm0, %v2017_v27  ;;  %8622 = vst [vmem:[#allocation8_spill] sm:$0xff] %v7267_v0  ;;  %v3173_v15 = vld [vmem:[%s8551_s5 + $0x310] sm:$0xff]  ;;  %v3174_v27 = vld [vmem:[%s8551_s5 + $0x318] sm:$0xff] }
 0x1e8   : > { %v1480_v4 = vpop.f32.mrb[50].mxu0  ;;  %v7275_v36 = vpack.c.bf16 %v3174_v27, %v3173_v15  ;;  %5873 = vmatprep.subr.bf16.mxu0 %v7267_v0  ;;  %8628 = vst [vmem:[#allocation14_spill] sm:$0xff] %v7370_v29  ;;  %v3180_v15 = vld [vmem:[%s8551_s5 + $0x348] sm:$0xff] }
 0x1e9   : > { %v1826_v32 = vrot.slane %v1698_v59, 7  ;;  %v2018_v47 = vrot.slane %v1698_v59, 1  ;;  %v1481_v49 = vadd.f32 %v6986_v58, %v1480_v4  ;;  %v1482_v60 = vpop.f32.mrb[51].mxu0  ;;  %2425 = vmatprep.mubr.f32.mxu1 %v1698_v59 }
 0x1ea   : > { %8623 = vst [vmem:[#allocation9_spill] sm:$0xff] %v7275_v36  ;;  %5875 = vmatpush3.bf16.msra.mxu0 %v7275_v36  ;;  %v3096_v60 = vld [vmem:[%s8551_s5 + $0xa8] sm:$0xff] }
 0x1eb   : > { %v1699_v16 = vmax.f32 %v1481_v49, 0.0  ;;  %5074 = vmatmul.mubr.msk.f32.gmra.mrb[48].mxu1 %vm7002_vm3, %v1826_v32  ;;  %5596 = vmatprep.mubr.msk.f32.mxu0 %vm744_vm0, %v2018_v47  ;;  %v3095_v49 = vld [vmem:[%s8551_s5 + $0xa0] sm:$0xff] }
 0x1ec   : > { %v1485_v48 = vpop.f32.mrb[52].mxu0 }
 0x1ed   : > { %v1827_v33 = vrot.slane %v1699_v16, 7  ;;  %v2019_v10 = vrot.slane %v1699_v16, 1  ;;  %v1486_v51 = vadd.f32 %v6986_v58, %v1485_v48  ;;  %v1487_v30 = vpop.f32.mrb[53].mxu0  ;;  %2430 = vmatprep.mubr.f32.mxu1 %v1699_v16  ;;  %v3191_v16 = vld [vmem:[%s8551_s5 + $0x3a0] sm:$0xff] }
 0x1ee   : > { %v3080_v30 = vld [vmem:[%s8551_s5 + $0x28] sm:$0xff] }
 0x1ef   : > { %v1700_v24 = vmax.f32 %v1486_v51, 0.0  ;;  %5076 = vmatmul.mubr.msk.f32.gmra.mrb[50].mxu1 %vm7002_vm3, %v1827_v33  ;;  %5597 = vmatmul.mubr.msk.f32.gmra.mrb[152].mxu0 %vm744_vm0, %v2019_v10  ;;  %v5780_v33 = vpack.c.bf16 %v3096_v60, %v3095_v49  ;;  %v3192_v10 = vld [vmem:[%s8551_s5 + $0x3a8] sm:$0xff]  ;;  %v3079_v51 = vld [vmem:[%s8551_s5 + $0x20] sm:$0xff] }
 0x1f0   : > { %v1490_v37 = vpop.f32.mrb[54].mxu0 }
 0x1f1   : > { %v1828_v53 = vrot.slane %v1700_v24, 7  ;;  %v2020_v57 = vrot.slane %v1700_v24, 1  ;;  %v1491_v50 = vadd.f32 %v6986_v58, %v1490_v37  ;;  %v1492_v17 = vpop.f32.mrb[55].mxu0  ;;  %2435 = vmatprep.mubr.f32.mxu1 %v1700_v24  ;;  %v7301_v37 = vpack.c.bf16 %v3192_v10, %v3191_v16  ;;  %5781 = vmatprep.subr.bf16.mxu1 %v5780_v33  ;;  %v3198_v16 = vld [vmem:[%s8551_s5 + $0x3d8] sm:$0xff] }
 0x1f2   : > { %v3086_v33 = vld [vmem:[%s8551_s5 + $0x58] sm:$0xff] }
 0x1f3   : > { %v1701_v56 = vmax.f32 %v1491_v50, 0.0  ;;  %5078 = vmatmul.mubr.msk.f32.gmra.mrb[52].mxu1 %vm7002_vm3, %v1828_v53  ;;  %5599 = vmatprep.mubr.msk.f32.mxu0 %vm744_vm0, %v2020_v57  ;;  %8624 = vst [vmem:[#allocation10_spill] sm:$0xff] %v7301_v37  ;;  %v5782_v53 = vpack.c.bf16 %v3080_v30, %v3079_v51  ;;  %v3175_v57 = vld [vmem:[%s8551_s5 + $0x320] sm:$0xff]  ;;  %v3176_v50 = vld [vmem:[%s8551_s5 + $0x328] sm:$0xff] }
 0x1f4   : > { %v1495_v11 = vpop.f32.mrb[56].mxu0  ;;  %5877 = vmatprep.subr.bf16.mxu0 %v7301_v37 }
 0x1f5   : > { %v1829_v3 = vrot.slane %v1701_v56, 7  ;;  %v2021_v34 = vrot.slane %v1701_v56, 1  ;;  %v1496_v18 = vadd.f32 %v6986_v58, %v1495_v11  ;;  %v1497_v8 = vpop.f32.mrb[57].mxu0  ;;  %2440 = vmatprep.mubr.f32.mxu1 %v1701_v56  ;;  %v7310_v56 = vpack.c.bf16 %v3176_v50, %v3175_v57  ;;  %5783 = vmatpush3.bf16.msra.mxu1 %v5782_v53  ;;  %v3181_v57 = vld [vmem:[%s8551_s5 + $0x350] sm:$0xff]  ;;  %v3182_v50 = vld [vmem:[%s8551_s5 + $0x358] sm:$0xff] }
 0x1f7   : > { %v1702_v5 = vmax.f32 %v1496_v18, 0.0  ;;  %5080 = vmatmul.mubr.msk.f32.gmra.mrb[54].mxu1 %vm7002_vm3, %v1829_v3  ;;  %5600 = vmatmul.mubr.msk.f32.gmra.mrb[154].mxu0 %vm744_vm0, %v2021_v34  ;;  %8625 = vst [vmem:[#allocation11_spill] sm:$0xff] %v7310_v56  ;;  %v3097_v3 = vld [vmem:[%s8551_s5 + $0xb0] sm:$0xff]  ;;  %v3098_v34 = vld [vmem:[%s8551_s5 + $0xb8] sm:$0xff] }
 0x1f8   : > { %v1500_v54 = vpop.f32.mrb[58].mxu0  ;;  %v3193_v18 = vld [vmem:[%s8551_s5 + $0x3b0] sm:$0xff]  ;;  %5879 = vmatpush3.bf16.msra.mxu0 %v7310_v56  ;;  %v5784_v19 = vpack.c.bf16 %v3098_v34, %v3097_v3 }
 0x1f9   : > { %v1830_v61 = vrot.slane %v1702_v5, 7  ;;  %v2022_v21 = vrot.slane %v1702_v5, 1  ;;  %v1501_v6 = vadd.f32 %v6986_v58, %v1500_v54  ;;  %v1502_v44 = vpop.f32.mrb[59].mxu0  ;;  %2445 = vmatprep.mubr.f32.mxu1 %v1702_v5  ;;  %v3082_v5 = vld [vmem:[%s8551_s5 + $0x38] sm:$0xff] }
 0x1fa   : > { %v7336_v44 = vpack.c.bf16 %v3194_v25, %v3193_v18  ;;  %5785 = vmatprep.subr.bf16.mxu1 %v5784_v19  ;;  %v3200_v18 = vld [vmem:[%s8551_s5 + $0x3e8] sm:$0xff]  ;;  %v7433_v25 = vld [vmem:[%s8548_s2] ss:$0 sm:$0xff] }
 0x1fb   : > { %v1703_v39 = vmax.f32 %v1501_v6, 0.0  ;;  %5082 = vmatmul.mubr.msk.f32.gmra.mrb[56].mxu1 %vm7002_vm3, %v1830_v61  ;;  %5602 = vmatprep.mubr.msk.f32.mxu0 %vm744_vm0, %v2022_v21 }
 0x1fc   : > { %v1505_v43 = vpop.f32.mrb[60].mxu0  ;;  %8626 = vst [vmem:[#allocation12_spill] sm:$0xff] %v7336_v44  ;;  %5881 = vmatprep.subr.bf16.mxu0 %v7336_v44 }
 0x1fd   : > { %v1831_v62 = vrot.slane %v1703_v39, 7  ;;  %v2023_v2 = vrot.slane %v1703_v39, 1  ;;  %v1506_v22 = vadd.f32 %v6986_v58, %v1505_v43  ;;  %v1507_v52 = vpop.f32.mrb[61].mxu0  ;;  %2450 = vmatprep.mubr.f32.mxu1 %v1703_v39  ;;  %v3177_v39 = vld [vmem:[%s8551_s5 + $0x330] sm:$0xff]  ;;  %v3178_v43 = vld [vmem:[%s8551_s5 + $0x338] sm:$0xff] }
 0x1fe   : > { %v3099_v52 = vld [vmem:[%s8551_s5 + $0xc0] sm:$0xff] }
 0x1ff   : > { %v1704_v13 = vmax.f32 %v1506_v22, 0.0  ;;  %5084 = vmatmul.mubr.msk.f32.gmra.mrb[58].mxu1 %vm7002_vm3, %v1831_v62  ;;  %5603 = vmatmul.mubr.msk.f32.gmra.mrb[156].mxu0 %vm744_vm0, %v2023_v2  ;;  %v5786_v62 = vpack.c.bf16 %v3082_v5, %v3081_v42  ;;  %v7344_v2 = vpack.c.bf16 %v3178_v43, %v3177_v39  ;;  %v5788_v55 = vpack.c.bf16 %v3100_v63, %v3099_v52  ;;  %v3184_v43 = vld [vmem:[%s8551_s5 + $0x368] sm:$0xff]  ;;  %v3105_v63 = vld [vmem:[%s8551_s5 + $0xf0] sm:$0xff] }
 0x200   : > { %v1510_v12 = vpop.f32.mrb[62].mxu0 }
 0x201   : > { %v1832_v28 = vrot.slane %v1704_v13, 7  ;;  %v2024_v31 = vrot.slane %v1704_v13, 1  ;;  %v1511_v45 = vadd.f32 %v6986_v58, %v1510_v12  ;;  %v1512_v26 = vpop.f32.mrb[63].mxu0  ;;  %2455 = vmatprep.mubr.f32.mxu1 %v1704_v13  ;;  %8627 = vst [vmem:[#allocation13_spill] sm:$0xff] %v7344_v2  ;;  %5787 = vmatpush3.bf16.msra.mxu1 %v5786_v62  ;;  %v3083_v12 = vld [vmem:[%s8551_s5 + $0x40] sm:$0xff] }
 0x202   : > { %5883 = vmatpush3.bf16.msra.mxu0 %v7344_v2  ;;  %5789 = vmatprep.subr.bf16.mxu1 %v5788_v55 }
 0x203   : > { %v1705_v20 = vmax.f32 %v1511_v45, 0.0  ;;  %5086 = vmatmul.mubr.msk.f32.gmra.mrb[60].mxu1 %vm7002_vm3, %v1832_v28  ;;  %5605 = vmatprep.mubr.msk.f32.mxu0 %vm744_vm0, %v2024_v31  ;;  %v3084_v28 = vld [vmem:[%s8551_s5 + $0x48] sm:$0xff] }
 0x204   : > { %v1515_v46 = vpop.f32.mrb[64].mxu0  ;;  %v5790_v27 = vpack.c.bf16 %v3084_v28, %v3083_v12  ;;  %5885 = vmatprep.subr.bf16.mxu0 %v7370_v29 }
 0x205   : > { %v1833_v59 = vrot.slane %v1705_v20, 7  ;;  %v2025_v4 = vrot.slane %v1705_v20, 1  ;;  %v1516_v32 = vadd.f32 %v6986_v58, %v1515_v46  ;;  %v1517_v47 = vpop.f32.mrb[65].mxu0  ;;  %2460 = vmatprep.mubr.f32.mxu1 %v1705_v20  ;;  %v3179_v20 = vld [vmem:[%s8551_s5 + $0x340] sm:$0xff] }
 0x206   : > { %v7378_v46 = vpack.c.bf16 %v3180_v15, %v3179_v20  ;;  %v3197_v47 = vld [vmem:[%s8551_s5 + $0x3d0] sm:$0xff]  ;;  %5791 = vmatpush3.bf16.msra.mxu1 %v5790_v27 }
 0x207   : > { %v1706_v48 = vmax.f32 %v1516_v32, 0.0  ;;  %5088 = vmatmul.mubr.msk.f32.gmra.mrb[62].mxu1 %vm7002_vm3, %v1833_v59  ;;  %5606 = vmatmul.mubr.msk.f32.gmra.mrb[158].mxu0 %vm744_vm0, %v2025_v4  ;;  %v3101_v4 = vld [vmem:[%s8551_s5 + $0xd0] sm:$0xff]  ;;  %v3102_v32 = vld [vmem:[%s8551_s5 + $0xd8] sm:$0xff]  ;;  %v7404_v53 = vpack.c.bf16 %v3198_v16, %v3197_v47 }
 0x208   : > { %v1520_v24 = vpop.f32.mrb[66].mxu0  ;;  %8629 = vst [vmem:[#allocation15_spill] sm:$0xff] %v7378_v46  ;;  %v5792_v60 = vpack.c.bf16 %v3102_v32, %v3101_v4  ;;  %5887 = vmatpush3.bf16.msra.mxu0 %v7378_v46  ;;  %v3185_v27 = vld [vmem:[%s8551_s5 + $0x370] sm:$0xff] }
 0x209   : > { %v1834_v17 = vrot.slane %v1706_v48, 7  ;;  %v2026_v7 = vrot.slane %v1706_v48, 1  ;;  %v1521_v38 = vadd.f32 %v6986_v58, %v1520_v24  ;;  %v1522_v40 = vpop.f32.mrb[67].mxu0  ;;  %2465 = vmatprep.mubr.f32.mxu1 %v1706_v48  ;;  %v3085_v48 = vld [vmem:[%s8551_s5 + $0x50] sm:$0xff]  ;;  %8630 = vst [vmem:[#allocation16_spill] sm:$0xff] %v7404_v53  ;;  %5889 = vmatprep.subr.bf16.mxu0 %v7404_v53 }
 0x20a   : > { %5793 = vmatprep.subr.bf16.mxu1 %v5792_v60  ;;  %v3104_v40 = vld [vmem:[%s8551_s5 + $0xe8] sm:$0xff] }
 0x20b   : > { %v1707_v11 = vmax.f32 %v1521_v38, 0.0  ;;  %5090 = vmatmul.mubr.msk.f32.gmra.mrb[64].mxu1 %vm7002_vm3, %v1834_v17  ;;  %5608 = vmatprep.mubr.msk.f32.mxu0 %vm744_vm0, %v2026_v7  ;;  %v5794_v17 = vpack.c.bf16 %v3086_v33, %v3085_v48  ;;  %v7412_v7 = vpack.c.bf16 %v3182_v50, %v3181_v57 }
 0x20c   : > { %v1525_v8 = vpop.f32.mrb[68].mxu0 }
 0x20d   : > { %v1835_v54 = vrot.slane %v1707_v11, 7  ;;  %v2027_v61 = vrot.slane %v1707_v11, 1  ;;  %v1526_v21 = vadd.f32 %v6986_v58, %v1525_v8  ;;  %v1527_v6 = vpop.f32.mrb[69].mxu0  ;;  %2470 = vmatprep.mubr.f32.mxu1 %v1707_v11  ;;  %8631 = vst [vmem:[#allocation17_spill] sm:$0xff] %v7412_v7  ;;  %v3199_v11 = vld [vmem:[%s8551_s5 + $0x3e0] sm:$0xff]  ;;  %5795 = vmatpush3.bf16.msra.mxu1 %v5794_v17 }
 0x20e   : > { %5891 = vmatpush3.bf16.msra.mxu0 %v7412_v7  ;;  %v3183_v6 = vld [vmem:[%s8551_s5 + $0x360] sm:$0xff] }
 0x20f   : > { %v1708_v22 = vmax.f32 %v1526_v21, 0.0  ;;  %5092 = vmatmul.mubr.msk.f32.gmra.mrb[66].mxu1 %vm7002_vm3, %v1835_v54  ;;  %5609 = vmatmul.mubr.msk.f32.gmra.mrb[160].mxu0 %vm744_vm0, %v2027_v61  ;;  %v7437_v54 = vpack.c.bf16 %v3200_v18, %v3199_v11  ;;  %v3087_v61 = vld [vmem:[%s8551_s5 + $0x60] sm:$0xff]  ;;  %v3088_v21 = vld [vmem:[%s8551_s5 + $0x68] sm:$0xff] }
 0x210   : > { %v1530_v13 = vpop.f32.mrb[70].mxu0  ;;  %v5798_v39 = vpack.c.bf16 %v3088_v21, %v3087_v61 }
 0x211   : > { %v1836_v31 = vrot.slane %v1708_v22, 7  ;;  %v2028_v45 = vrot.slane %v1708_v22, 1  ;;  %v1531_v26 = vadd.f32 %v6986_v58, %v1530_v13  ;;  %v1532_v1 = vpop.f32.mrb[71].mxu0  ;;  %2475 = vmatprep.mubr.f32.mxu1 %v1708_v22  ;;  %8632 = vst [vmem:[#allocation18_spill] sm:$0xff] %v7437_v54  ;;  %v7454_v22 = vpack.c.bf16 %v3184_v43, %v3183_v6  ;;  %5893 = vmatprep.subr.bf16.mxu0 %v7437_v54  ;;  %v3201_v13 = vld [vmem:[%s8551_s5 + $0x3f0] sm:$0xff] }
 0x212   : > { %v3090_v1 = vld [vmem:[%s8551_s5 + $0x78] sm:$0xff] }
 0x213   : > { %v1709_v59 = vmax.f32 %v1531_v26, 0.0  ;;  %5094 = vmatmul.mubr.msk.f32.gmra.mrb[68].mxu1 %vm7002_vm3, %v1836_v31  ;;  %5611 = vmatprep.mubr.msk.f32.mxu0 %vm744_vm0, %v2028_v45  ;;  %8633 = vst [vmem:[#allocation19_spill] sm:$0xff] %v7454_v22  ;;  %v5800_v31 = vpack.c.bf16 %v3106_v41, %v3105_v63  ;;  %v3202_v45 = vld [vmem:[%s8551_s5 + $0x3f8] sm:$0xff]  ;;  %v3089_v26 = vld [vmem:[%s8551_s5 + $0x70] sm:$0xff] }
 0x214   : > { %v1535_v49 = vpop.f32.mrb[72].mxu0  ;;  %5895 = vmatpush3.bf16.msra.mxu0 %v7454_v22  ;;  %v7477_v20 = vpack.c.bf16 %v3202_v45, %v3201_v13  ;;  %v5802_v15 = vpack.c.bf16 %v3090_v1, %v3089_v26 }
 0x215   : > { %v1837_v10 = vrot.slane %v1709_v59, 7  ;;  %v2029_v51 = vrot.slane %v1709_v59, 1  ;;  %v1536_v30 = vadd.f32 %v6986_v58, %v1535_v49  ;;  %v1537_v24 = vpop.f32.mrb[73].mxu0  ;;  %2480 = vmatprep.mubr.f32.mxu1 %v1709_v59  ;;  %v3103_v58 = vld [vmem:[%s8551_s5 + $0xe0] sm:$0xff]  ;;  %v3186_v59 = vld [vmem:[%s8551_s5 + $0x378] sm:$0xff] }
 0x216   : > { %v5796_v34 = vpack.c.bf16 %v3104_v40, %v3103_v58  ;;  %8634 = vst [vmem:[#allocation20_spill] sm:$0xff] %v7477_v20  ;;  %v7488_v32 = vpack.c.bf16 %v3186_v59, %v3185_v27  ;;  %5897 = vmatprep.subr.bf16.mxu0 %v7477_v20 }
 0x217   : > { %v1710_v38 = vmax.f32 %v1536_v30, 0.0  ;;  %5096 = vmatmul.mubr.msk.f32.gmra.mrb[70].mxu1 %vm7002_vm3, %v1837_v10  ;;  %5612 = vmatmul.mubr.msk.f32.gmra.mrb[162].mxu0 %vm744_vm0, %v2029_v51 }
 0x218   : > { %v1540_v3 = vpop.f32.mrb[74].mxu0  ;;  %5797 = vmatprep.subr.bf16.mxu1 %v5796_v34  ;;  %8635 = vst [vmem:[#allocation21_spill] sm:$0xff] %v7488_v32  ;;  %5899 = vmatpush3.bf16.msra.mxu0 %v7488_v32 }
 0x219   : > { %v1838_v8 = vrot.slane %v1710_v38, 7  ;;  %v2030_v19 = vrot.slane %v1710_v38, 1  ;;  %v1541_v42 = vadd.f32 %v7433_v25, %v1540_v3  ;;  %v1542_v5 = vpop.f32.mrb[75].mxu0  ;;  %2485 = vmatprep.mubr.f32.mxu1 %v1710_v38  ;;  %5799 = vmatpush3.bf16.msra.mxu1 %v5798_v39 }
 0x21a   : > { %5801 = vmatprep.subr.bf16.mxu1 %v5800_v31 }
 0x21b   : > { %v1711_v62 = vmax.f32 %v1541_v42, 0.0  ;;  %5098 = vmatmul.mubr.msk.f32.gmra.mrb[72].mxu1 %vm7002_vm3, %v1838_v8  ;;  %5614 = vmatprep.mubr.msk.f32.mxu0 %vm744_vm0, %v2030_v19 }
 0x21c   : > { %v1545_v52 = vpop.f32.mrb[76].mxu0 }
 0x21d   : > { %v1839_v55 = vrot.slane %v1711_v62, 7  ;;  %v2031_v23 = vrot.slane %v1711_v62, 1  ;;  %v1546_v12 = vadd.f32 %v7433_v25, %v1545_v52  ;;  %v1547_v28 = vpop.f32.mrb[77].mxu0  ;;  %2490 = vmatprep.mubr.f32.mxu1 %v1711_v62  ;;  %5803 = vmatpush3.bf16.msra.mxu1 %v5802_v15 }
 0x21f   : > { %v1712_v4 = vmax.f32 %v1546_v12, 0.0  ;;  %5100 = vmatmul.mubr.msk.f32.gmra.mrb[74].mxu1 %vm7002_vm3, %v1839_v55  ;;  %5615 = vmatmul.mubr.msk.f32.gmra.mrb[164].mxu0 %vm744_vm0, %v2031_v23 }
 0x220   : > { %v1550_v47 = vpop.f32.mrb[78].mxu0 }
 0x221   : > { %v1840_v49 = vrot.slane %v1712_v4, 7  ;;  %v2032_v60 = vrot.slane %v1712_v4, 1  ;;  %v1551_v16 = vadd.f32 %v7433_v25, %v1550_v47  ;;  %v1552_v48 = vpop.f32.mrb[79].mxu0  ;;  %2495 = vmatprep.mubr.f32.mxu1 %v1712_v4 }
 0x223   : > { %v1713_v33 = vmax.f32 %v1551_v16, 0.0  ;;  %5102 = vmatmul.mubr.msk.f32.gmra.mrb[76].mxu1 %vm7002_vm3, %v1840_v49  ;;  %5617 = vmatprep.mubr.msk.f32.mxu0 %vm744_vm0, %v2032_v60 }
 0x224   : > { %v1555_v10 = vpop.f32.mrb[80].mxu0 }
 0x225   : > { %v1841_v51 = vrot.slane %v1713_v33, 7  ;;  %v2033_v30 = vrot.slane %v1713_v33, 1  ;;  %v1556_v24 = vadd.f32 %v7433_v25, %v1555_v10  ;;  %v1557_v57 = vpop.f32.mrb[81].mxu0  ;;  %2500 = vmatprep.mubr.f32.mxu1 %v1713_v33 }
 0x227   : > { %v1714_v50 = vmax.f32 %v1556_v24, 0.0  ;;  %5104 = vmatmul.mubr.msk.f32.gmra.mrb[78].mxu1 %vm7002_vm3, %v1841_v51  ;;  %5618 = vmatmul.mubr.msk.f32.gmra.mrb[166].mxu0 %vm744_vm0, %v2033_v30 }
 0x228   : > { %v1560_v17 = vpop.f32.mrb[82].mxu0 }
 0x229   : > { %v1842_v38 = vrot.slane %v1714_v50, 7  ;;  %v2034_v58 = vrot.slane %v1714_v50, 1  ;;  %v1561_v40 = vadd.f32 %v7433_v25, %v1560_v17  ;;  %v1562_v11 = vpop.f32.mrb[83].mxu0  ;;  %2505 = vmatprep.mubr.f32.mxu1 %v1714_v50 }
 0x22b   : > { %v1715_v3 = vmax.f32 %v1561_v40, 0.0  ;;  %5106 = vmatmul.mubr.msk.f32.gmra.mrb[80].mxu1 %vm7002_vm3, %v1842_v38  ;;  %5620 = vmatprep.mubr.msk.f32.mxu0 %vm744_vm0, %v2034_v58 }
 0x22c   : > { %v1565_v34 = vpop.f32.mrb[84].mxu0 }
 0x22d   : > { %v1843_v18 = vrot.slane %v1715_v3, 7  ;;  %v2035_v8 = vrot.slane %v1715_v3, 1  ;;  %v1566_v19 = vadd.f32 %v7433_v25, %v1565_v34  ;;  %v1567_v42 = vpop.f32.mrb[85].mxu0  ;;  %2510 = vmatprep.mubr.f32.mxu1 %v1715_v3 }
 0x22f   : > { %v1716_v5 = vmax.f32 %v1566_v19, 0.0  ;;  %5108 = vmatmul.mubr.msk.f32.gmra.mrb[82].mxu1 %vm7002_vm3, %v1843_v18  ;;  %5621 = vmatmul.mubr.msk.f32.gmra.mrb[168].mxu0 %vm744_vm0, %v2035_v8 }
 0x230   : > { %v1570_v61 = vpop.f32.mrb[86].mxu0 }
 0x231   : > { %v1844_v21 = vrot.slane %v1716_v5, 7  ;;  %v2036_v6 = vrot.slane %v1716_v5, 1  ;;  %v1571_v39 = vadd.f32 %v7433_v25, %v1570_v61  ;;  %v1572_v43 = vpop.f32.mrb[87].mxu0  ;;  %2515 = vmatprep.mubr.f32.mxu1 %v1716_v5 }
 0x233   : > { %v1717_v62 = vmax.f32 %v1571_v39, 0.0  ;;  %5110 = vmatmul.mubr.msk.f32.gmra.mrb[84].mxu1 %vm7002_vm3, %v1844_v21  ;;  %5623 = vmatprep.mubr.msk.f32.mxu0 %vm744_vm0, %v2036_v6 }
 0x234   : > { %v1575_v52 = vpop.f32.mrb[88].mxu0 }
 0x235   : > { %v1845_v63 = vrot.slane %v1717_v62, 7  ;;  %v2037_v41 = vrot.slane %v1717_v62, 1  ;;  %v1576_v13 = vadd.f32 %v7433_v25, %v1575_v52  ;;  %v1577_v55 = vpop.f32.mrb[89].mxu0  ;;  %2520 = vmatprep.mubr.f32.mxu1 %v1717_v62 }
 0x237   : > { %v1718_v23 = vmax.f32 %v1576_v13, 0.0  ;;  %5112 = vmatmul.mubr.msk.f32.gmra.mrb[86].mxu1 %vm7002_vm3, %v1845_v63  ;;  %5624 = vmatmul.mubr.msk.f32.gmra.mrb[170].mxu0 %vm744_vm0, %v2037_v41 }
 0x238   : > { %v1580_v12 = vpop.f32.mrb[90].mxu0 }
 0x239   : > { %v1846_v28 = vrot.slane %v1718_v23, 7  ;;  %v2038_v31 = vrot.slane %v1718_v23, 1  ;;  %v1581_v45 = vadd.f32 %v7433_v25, %v1580_v12  ;;  %v1582_v26 = vpop.f32.mrb[91].mxu0  ;;  %2525 = vmatprep.mubr.f32.mxu1 %v1718_v23 }
 0x23b   : > { %v1719_v1 = vmax.f32 %v1581_v45, 0.0  ;;  %5114 = vmatmul.mubr.msk.f32.gmra.mrb[88].mxu1 %vm7002_vm3, %v1846_v28  ;;  %5626 = vmatprep.mubr.msk.f32.mxu0 %vm744_vm0, %v2038_v31 }
 0x23c   : > { %v1585_v15 = vpop.f32.mrb[92].mxu0 }
 0x23d   : > { %v1847_v27 = vrot.slane %v1719_v1, 7  ;;  %v2039_v59 = vrot.slane %v1719_v1, 1  ;;  %v1586_v4 = vadd.f32 %v7433_v25, %v1585_v15  ;;  %v1587_v47 = vpop.f32.mrb[93].mxu0  ;;  %2530 = vmatprep.mubr.f32.mxu1 %v1719_v1 }
 0x23f   : > { %v1720_v49 = vmax.f32 %v1586_v4, 0.0  ;;  %5116 = vmatmul.mubr.msk.f32.gmra.mrb[90].mxu1 %vm7002_vm3, %v1847_v27  ;;  %5627 = vmatmul.mubr.msk.f32.gmra.mrb[172].mxu0 %vm744_vm0, %v2039_v59 }
 0x240   : > { %v1590_v60 = vpop.f32.mrb[94].mxu0 }
 0x241   : > { %v1848_v16 = vrot.slane %v1720_v49, 7  ;;  %v2040_v48 = vrot.slane %v1720_v49, 1  ;;  %v1591_v33 = vadd.f32 %v7433_v25, %v1590_v60  ;;  %v1592_v10 = vpop.f32.mrb[95].mxu0  ;;  %2535 = vmatprep.mubr.f32.mxu1 %v1720_v49 }
 0x243   : > { %v1721_v51 = vmax.f32 %v1591_v33, 0.0  ;;  %5118 = vmatmul.mubr.msk.f32.gmra.mrb[92].mxu1 %vm7002_vm3, %v1848_v16  ;;  %5629 = vmatprep.mubr.msk.f32.mxu0 %vm744_vm0, %v2040_v48 }
 0x244   : > { %v1595_v30 = vpop.f32.mrb[96].mxu0 }
 0x245   : > { %v1849_v24 = vrot.slane %v1721_v51, 7  ;;  %v2041_v57 = vrot.slane %v1721_v51, 1  ;;  %v1596_v50 = vadd.f32 %v7433_v25, %v1595_v30  ;;  %v1597_v17 = vpop.f32.mrb[97].mxu0  ;;  %2540 = vmatprep.mubr.f32.mxu1 %v1721_v51 }
 0x247   : > { %v1722_v38 = vmax.f32 %v1596_v50, 0.0  ;;  %5120 = vmatmul.mubr.msk.f32.gmra.mrb[94].mxu1 %vm7002_vm3, %v1849_v24  ;;  %5630 = vmatmul.mubr.msk.f32.gmra.mrb[174].mxu0 %vm744_vm0, %v2041_v57 }
 0x248   : > { %v1600_v58 = vpop.f32.mrb[98].mxu0 }
 0x249   : > { %v1850_v40 = vrot.slane %v1722_v38, 7  ;;  %v2042_v11 = vrot.slane %v1722_v38, 1  ;;  %v1601_v3 = vadd.f32 %v7433_v25, %v1600_v58  ;;  %v1602_v34 = vpop.f32.mrb[99].mxu0  ;;  %2545 = vmatprep.mubr.f32.mxu1 %v1722_v38 }
 0x24b   : > { %v1723_v18 = vmax.f32 %v1601_v3, 0.0  ;;  %5122 = vmatmul.mubr.msk.f32.gmra.mrb[96].mxu1 %vm7002_vm3, %v1850_v40  ;;  %5632 = vmatprep.mubr.msk.f32.mxu0 %vm744_vm0, %v2042_v11 }
 0x24c   : > { %v1605_v8 = vpop.f32.mrb[100].mxu0 }
 0x24d   : > { %v1851_v19 = vrot.slane %v1723_v18, 7  ;;  %v2043_v42 = vrot.slane %v1723_v18, 1  ;;  %v1606_v5 = vadd.f32 %v7433_v25, %v1605_v8  ;;  %v1607_v61 = vpop.f32.mrb[101].mxu0  ;;  %2550 = vmatprep.mubr.f32.mxu1 %v1723_v18 }
 0x24f   : > { %v1724_v21 = vmax.f32 %v1606_v5, 0.0  ;;  %5124 = vmatmul.mubr.msk.f32.gmra.mrb[98].mxu1 %vm7002_vm3, %v1851_v19  ;;  %5633 = vmatmul.mubr.msk.f32.gmra.mrb[176].mxu0 %vm744_vm0, %v2043_v42 }
 0x250   : > { %v1610_v6 = vpop.f32.mrb[102].mxu0 }
 0x251   : > { %v1852_v39 = vrot.slane %v1724_v21, 7  ;;  %v2044_v43 = vrot.slane %v1724_v21, 1  ;;  %v1611_v62 = vadd.f32 %v7433_v25, %v1610_v6  ;;  %v1612_v52 = vpop.f32.mrb[103].mxu0  ;;  %2555 = vmatprep.mubr.f32.mxu1 %v1724_v21 }
 0x253   : > { %v1725_v63 = vmax.f32 %v1611_v62, 0.0  ;;  %5126 = vmatmul.mubr.msk.f32.gmra.mrb[100].mxu1 %vm7002_vm3, %v1852_v39  ;;  %5635 = vmatprep.mubr.msk.f32.mxu0 %vm744_vm0, %v2044_v43 }
 0x254   : > { %v1615_v41 = vpop.f32.mrb[104].mxu0 }
 0x255   : > { %v1853_v13 = vrot.slane %v1725_v63, 7  ;;  %v2045_v55 = vrot.slane %v1725_v63, 1  ;;  %v1616_v23 = vadd.f32 %v7433_v25, %v1615_v41  ;;  %v1617_v12 = vpop.f32.mrb[105].mxu0  ;;  %2560 = vmatprep.mubr.f32.mxu1 %v1725_v63 }
 0x257   : > { %v1726_v28 = vmax.f32 %v1616_v23, 0.0  ;;  %5128 = vmatmul.mubr.msk.f32.gmra.mrb[102].mxu1 %vm7002_vm3, %v1853_v13  ;;  %5636 = vmatmul.mubr.msk.f32.gmra.mrb[178].mxu0 %vm744_vm0, %v2045_v55 }
 0x258   : > { %v1620_v31 = vpop.f32.mrb[106].mxu0 }
 0x259   : > { %v1854_v45 = vrot.slane %v1726_v28, 7  ;;  %v2046_v26 = vrot.slane %v1726_v28, 1  ;;  %v1621_v1 = vadd.f32 %v7433_v25, %v1620_v31  ;;  %v1622_v15 = vpop.f32.mrb[107].mxu0  ;;  %2565 = vmatprep.mubr.f32.mxu1 %v1726_v28 }
 0x25b   : > { %v1727_v27 = vmax.f32 %v1621_v1, 0.0  ;;  %5130 = vmatmul.mubr.msk.f32.gmra.mrb[104].mxu1 %vm7002_vm3, %v1854_v45  ;;  %5638 = vmatprep.mubr.msk.f32.mxu0 %vm744_vm0, %v2046_v26 }
 0x25c   : > { %v1625_v59 = vpop.f32.mrb[108].mxu0 }
 0x25d   : > { %v1855_v4 = vrot.slane %v1727_v27, 7  ;;  %v2047_v47 = vrot.slane %v1727_v27, 1  ;;  %v1626_v49 = vadd.f32 %v7433_v25, %v1625_v59  ;;  %v1627_v60 = vpop.f32.mrb[109].mxu0  ;;  %2570 = vmatprep.mubr.f32.mxu1 %v1727_v27 }
 0x25e   : > { %v7553_v16 = vpop.f32.mrb[0].mxu1 }
 0x25f   : > { %v1728_v48 = vmax.f32 %v1626_v49, 0.0  ;;  %v2309_v33 = vpop.f32.mrb[1].mxu1  ;;  %5132 = vmatmul.mubr.msk.f32.gmra.mrb[106].mxu1 %vm7002_vm3, %v1855_v4  ;;  %5639 = vmatmul.mubr.msk.f32.gmra.mrb[180].mxu0 %vm744_vm0, %v2047_v47 }
 0x260   : > { %v1630_v10 = vpop.f32.mrb[110].mxu0 }
 0x261   : > { %v1856_v51 = vrot.slane %v1728_v48, 7  ;;  %v2048_v30 = vrot.slane %v1728_v48, 1  ;;  %v1631_v24 = vadd.f32 %v7433_v25, %v1630_v10  ;;  %v1632_v57 = vpop.f32.mrb[111].mxu0  ;;  %2575 = vmatprep.mubr.f32.mxu1 %v1728_v48 }
 0x262   : > { %v7559_v50 = vpop.f32.mrb[2].mxu1 }
 0x263   : > { %v1729_v17 = vmax.f32 %v1631_v24, 0.0  ;;  %v2314_v38 = vpop.f32.mrb[3].mxu1  ;;  %5134 = vmatmul.mubr.msk.f32.gmra.mrb[108].mxu1 %vm7002_vm3, %v1856_v51  ;;  %5641 = vmatprep.mubr.msk.f32.mxu0 %vm744_vm0, %v2048_v30 }
 0x264   : > { %v1635_v58 = vpop.f32.mrb[112].mxu0 }
 0x265   : > { %v1857_v40 = vrot.slane %v1729_v17, 7  ;;  %v2049_v11 = vrot.slane %v1729_v17, 1  ;;  %v1636_v3 = vadd.f32 %v7433_v25, %v1635_v58  ;;  %v1637_v34 = vpop.f32.mrb[113].mxu0  ;;  %2580 = vmatprep.mubr.f32.mxu1 %v1729_v17 }
 0x266   : > { %v7565_v18 = vpop.f32.mrb[4].mxu1 }
 0x267   : > { %v1730_v8 = vmax.f32 %v1636_v3, 0.0  ;;  %v2319_v19 = vpop.f32.mrb[5].mxu1  ;;  %5136 = vmatmul.mubr.msk.f32.gmra.mrb[110].mxu1 %vm7002_vm3, %v1857_v40  ;;  %5642 = vmatmul.mubr.msk.f32.gmra.mrb[182].mxu0 %vm744_vm0, %v2049_v11 }
 0x268   : > { %v1640_v42 = vpop.f32.mrb[114].mxu0 }
 0x269   : > { %v1858_v5 = vrot.slane %v1730_v8, 7  ;;  %v2050_v61 = vrot.slane %v1730_v8, 1  ;;  %v1641_v21 = vadd.f32 %v7433_v25, %v1640_v42  ;;  %v1642_v6 = vpop.f32.mrb[115].mxu0  ;;  %2585 = vmatprep.mubr.f32.mxu1 %v1730_v8 }
 0x26a   : > { %v7571_v39 = vpop.f32.mrb[6].mxu1 }
 0x26b   : > { %v1731_v43 = vmax.f32 %v1641_v21, 0.0  ;;  %v2324_v62 = vpop.f32.mrb[7].mxu1  ;;  %5138 = vmatmul.mubr.msk.f32.gmra.mrb[112].mxu1 %vm7002_vm3, %v1858_v5  ;;  %5644 = vmatprep.mubr.msk.f32.mxu0 %vm744_vm0, %v2050_v61 }
 0x26c   : > { %v1645_v52 = vpop.f32.mrb[116].mxu0  ;;  %v7609_v62 = vld [vmem:[%s8550_s4] ss:$0 sm:$0xff] }
 0x26d   : > { %v1859_v63 = vrot.slane %v1731_v43, 7  ;;  %v2051_v41 = vrot.slane %v1731_v43, 1  ;;  %v1646_v13 = vadd.f32 %v7433_v25, %v1645_v52  ;;  %v1647_v55 = vpop.f32.mrb[117].mxu0  ;;  %2590 = vmatprep.mubr.f32.mxu1 %v1731_v43 }
 0x26e   : > { %v7577_v23 = vpop.f32.mrb[8].mxu1 }
 0x26f   : > { %v1732_v12 = vmax.f32 %v1646_v13, 0.0  ;;  %v2329_v28 = vpop.f32.mrb[9].mxu1  ;;  %5140 = vmatmul.mubr.msk.f32.gmra.mrb[114].mxu1 %vm7002_vm3, %v1859_v63  ;;  %5645 = vmatmul.mubr.msk.f32.gmra.mrb[184].mxu0 %vm744_vm0, %v2051_v41 }
 0x270   : > { %v1650_v31 = vpop.f32.mrb[118].mxu0 }
 0x271   : > { %v1860_v45 = vrot.slane %v1732_v12, 7  ;;  %v2052_v26 = vrot.slane %v1732_v12, 1  ;;  %v1651_v1 = vadd.f32 %v7433_v25, %v1650_v31  ;;  %v1652_v15 = vpop.f32.mrb[119].mxu0  ;;  %2595 = vmatprep.mubr.f32.mxu1 %v1732_v12  ;;  %v2313_v12 = vadd.f32 %v7609_v62, %v7559_v50 }
 0x272   : > { %v7583_v27 = vpop.f32.mrb[10].mxu1  ;;  %v2308_v15 = vadd.f32 %v7609_v62, %v7553_v16  ;;  %v2318_v16 = vadd.f32 %v7609_v62, %v7565_v18 }
 0x273   : > { %v1733_v59 = vmax.f32 %v1651_v1, 0.0  ;;  %v2334_v4 = vpop.f32.mrb[11].mxu1  ;;  %5142 = vmatmul.mubr.msk.f32.gmra.mrb[116].mxu1 %vm7002_vm3, %v1860_v45  ;;  %5647 = vmatprep.mubr.msk.f32.mxu0 %vm744_vm0, %v2052_v26  ;;  %v6093_v45 = vmov 1966171168   ;;  %v3285_v1 = vlaneseq }
 0x274   : > { %v1655_v47 = vpop.f32.mrb[120].mxu0  ;;  %v3283_v26 = vunpack.c.l.s4 %v6093_v45 }
 0x275   : > { %v1861_v49 = vrot.slane %v1733_v59, 7  ;;  %v2053_v60 = vrot.slane %v1733_v59, 1  ;;  %v1656_v48 = vadd.f32 %v7433_v25, %v1655_v47  ;;  %v1657_v33 = vpop.f32.mrb[121].mxu0  ;;  %2600 = vmatprep.mubr.f32.mxu1 %v1733_v59 }
 0x276   : > { %v7589_v10 = vpop.f32.mrb[12].mxu1 }
 0x277   : > { %v1734_v51 = vmax.f32 %v1656_v48, 0.0  ;;  %v2339_v30 = vpop.f32.mrb[13].mxu1  ;;  %5144 = vmatmul.mubr.msk.f32.gmra.mrb[118].mxu1 %vm7002_vm3, %v1861_v49  ;;  %5648 = vmatmul.mubr.msk.f32.gmra.mrb[186].mxu0 %vm744_vm0, %v2053_v60  ;;  %v2323_v48 = vadd.f32 %v7609_v62, %v7571_v39 }
 0x278   : > { %v1660_v24 = vpop.f32.mrb[122].mxu0  ;;  %v3286_v30 = vshrl.u32 %v3285_v1, 7 }
 0x279   : > { %v1862_v57 = vrot.slane %v1734_v51, 7  ;;  %v2054_v17 = vrot.slane %v1734_v51, 1  ;;  %v1661_v38 = vadd.f32 %v7433_v25, %v1660_v24  ;;  %v1662_v58 = vpop.f32.mrb[123].mxu0  ;;  %2605 = vmatprep.mubr.f32.mxu1 %v1734_v51  ;;  %v3284_v51 = vunpack.c.0.s8 %v3283_v26 }
 0x27a   : > { %v7595_v40 = vpop.f32.mrb[14].mxu1 }
 0x27b   : > { %v1735_v11 = vmax.f32 %v1661_v38, 0.0  ;;  %v2344_v3 = vpop.f32.mrb[15].mxu1  ;;  %5146 = vmatmul.mubr.msk.f32.gmra.mrb[120].mxu1 %vm7002_vm3, %v1862_v57  ;;  %5650 = vmatprep.mubr.msk.f32.mxu0 %vm744_vm0, %v2054_v17 }
 0x27c   : > { %v1665_v34 = vpop.f32.mrb[124].mxu0 }
 0x27d   : > { %v1863_v8 = vrot.slane %v1735_v11, 7  ;;  %v2055_v19 = vrot.slane %v1735_v11, 1  ;;  %v1666_v42 = vadd.f32 %v7433_v25, %v1665_v34  ;;  %v1667_v5 = vpop.f32.mrb[125].mxu0  ;;  %2610 = vmatprep.mubr.f32.mxu1 %v1735_v11 }
 0x27e   : > { %v7601_v61 = vpop.f32.mrb[16].mxu1  ;;  %v2328_v5 = vadd.f32 %v7609_v62, %v7577_v23 }
 0x27f   : > { %v1736_v21 = vmax.f32 %v1666_v42, 0.0  ;;  %v2349_v6 = vpop.f32.mrb[17].mxu1  ;;  %5148 = vmatmul.mubr.msk.f32.gmra.mrb[122].mxu1 %vm7002_vm3, %v1863_v8  ;;  %5651 = vmatmul.mubr.msk.f32.gmra.mrb[188].mxu0 %vm744_vm0, %v2055_v19  ;;  %v2333_v8 = vadd.f32 %v7609_v62, %v7583_v27  ;;  %v7628_v19 = vsub.s32 %v3284_v51, %v3286_v30 }
 0x280   : > { %v1670_v43 = vpop.f32.mrb[126].mxu0 }
 0x281   : > { %v1864_v52 = vrot.slane %v1736_v21, 7  ;;  %v2056_v63 = vrot.slane %v1736_v21, 1  ;;  %v1671_v41 = vadd.f32 %v7433_v25, %v1670_v43  ;;  %v1672_v13 = vpop.f32.mrb[127].mxu0  ;;  %2615 = vmatprep.mubr.f32.mxu1 %v1736_v21 }
 0x282   : > { %v2352_v55 = vpop.f32.mrb[18].mxu1 }
 0x283   : > { %v1737_v28 = vmax.f32 %v1671_v41, 0.0  ;;  %v2354_v31 = vpop.f32.mrb[19].mxu1  ;;  %5150 = vmatmul.mubr.msk.f32.gmra.mrb[124].mxu1 %vm7002_vm3, %v1864_v52  ;;  %5653 = vmatprep.mubr.msk.f32.mxu0 %vm744_vm0, %v2056_v63 }
 0x284   : > { %v5562_v25 = vpop.f32.mrb[128].mxu0 }
 0x285   : > { %v1865_v59 = vrot.slane %v1737_v28, 7  ;;  %v2057_v4 = vrot.slane %v1737_v28, 1  ;;  %v2698_v47 = vadd.f32 %v5562_v25, %v2313_v12  ;;  %2620 = vmatprep.mubr.f32.mxu1 %v1737_v28  ;;  %v2692_v49 = vpop.f32.mrb[129].mxu0  ;;  %v2343_v12 = vadd.f32 %v7609_v62, %v7595_v40 }
 0x286   : > { %v2693_v50 = vadd.f32 %v2692_v49, %v2308_v15  ;;  %v2357_v60 = vpop.f32.mrb[20].mxu1  ;;  %v2338_v25 = vadd.f32 %v7609_v62, %v7589_v10 }
 0x287   : > { %v3012_v33 = vmax.f32 %v2698_v47, 0.0  ;;  %v2359_v24 = vpop.f32.mrb[21].mxu1  ;;  %5152 = vmatmul.mubr.msk.f32.gmra.mrb[126].mxu1 %vm7002_vm3, %v1865_v59  ;;  %5654 = vmatmul.mubr.msk.f32.gmra.mrb[190].mxu0 %vm744_vm0, %v2057_v4  ;;  %v2353_v59 = vadd.f32 %v7609_v62, %v2352_v55  ;;  %v2358_v10 = vadd.f32 %v7609_v62, %v2357_v60 }
 0x288   : > { %v3011_v57 = vmax.f32 %v2693_v50, 0.0  ;;  %v5565_v17 = vpop.f32.mrb[130].mxu0 }
 0x289   : > { %v2708_v38 = vadd.f32 %v5565_v17, %v2323_v48  ;;  %v2702_v58 = vpop.f32.mrb[131].mxu0  ;;  %v2348_v17 = vadd.f32 %v7609_v62, %v7601_v61 }
 0x28a   : > { %v3274_v11 = vcombine.low %v3011_v57, %v3012_v33  ;;  %v3275_v3 = vcombine.high %v3011_v57, %v3012_v33  ;;  %v2703_v34 = vadd.f32 %v2702_v58, %v2318_v16  ;;  %v2362_v39 = vpop.f32.mrb[22].mxu1 }
 0x28b   : > { %v3014_v9 = vmax.f32 %v2708_v38, 0.0  ;;  %v2364_v42 = vpop.f32.mrb[23].mxu1 }
 0x28c   : > { %v3013_v21 = vmax.f32 %v2703_v34, 0.0  ;;  %v5568_v18 = vpop.f32.mrb[132].mxu0  ;;  %v3288_v27 = vrot.slane %v3274_v11, %v7628_v19  ;;  %v3295_v45 = vrot.slane %v3275_v3, %v7628_v19  ;;  %v2363_v34 = vadd.f32 %v7609_v62, %v2362_v39 }
 0x28d   : > { %v2718_v6 = vadd.f32 %v5568_v18, %v2333_v8  ;;  %v2712_v43 = vpop.f32.mrb[133].mxu0 }
 0x28e   : > { %v3276_v52 = vcombine.low %v3013_v21, %v3014_v9  ;;  %v3277_v63 = vcombine.high %v3013_v21, %v3014_v9  ;;  %v2713_v41 = vadd.f32 %v2712_v43, %v2328_v5  ;;  %v2367_v13 = vpop.f32.mrb[24].mxu1 }
 0x28f   : > { %v3016_v28 = vmax.f32 %v2718_v6, 0.0  ;;  %v2369_v31 = vpop.f32.mrb[25].mxu1  ;;  %v2368_v8 = vadd.f32 %v7609_v62, %v2367_v13 }
 0x290   : > { %v3302_v26 = vrot.slane %v3276_v52, %v7628_v19  ;;  %v3309_v23 = vrot.slane %v3277_v63, %v7628_v19  ;;  %v3015_v1 = vmax.f32 %v2713_v41, 0.0  ;;  %v5571_v15 = vpop.f32.mrb[134].mxu0 }
 0x291   : > { %v2728_v4 = vadd.f32 %v5571_v15, %v2343_v12  ;;  %v2722_v47 = vpop.f32.mrb[135].mxu0 }
 0x292   : > { %v3338_v40 = vcombine.low %v3288_v27, %v3302_v26  ;;  %v3339_v49 = vcombine.high %v3288_v27, %v3302_v26  ;;  %v3340_v50 = vcombine.low %v3295_v45, %v3309_v23  ;;  %v3341_v48 = vcombine.high %v3295_v45, %v3309_v23  ;;  %v2372_v33 = vpop.f32.mrb[26].mxu1 }
 0x293   : > { %v3278_v51 = vcombine.low %v3015_v1, %v3016_v28  ;;  %v3279_v30 = vcombine.high %v3015_v1, %v3016_v28  ;;  %v3018_v24 = vmax.f32 %v2728_v4, 0.0  ;;  %v2723_v16 = vadd.f32 %v2722_v47, %v2338_v25  ;;  %v2374_v57 = vpop.f32.mrb[27].mxu1 }
 0x294   : > { %v5574_v38 = vpop.f32.mrb[136].mxu0  ;;  %v7645_v3 = vrot.slane %v3338_v40, %v7628_v19  ;;  %v7650_v5 = vrot.slane %v3340_v50, %v7628_v19  ;;  %v2373_v43 = vadd.f32 %v7609_v62, %v2372_v33  ;;  %v7655_v41 = vrot.slane %v3339_v49, %v7628_v19 }
 0x295   : > { %v3017_v58 = vmax.f32 %v2723_v16, 0.0  ;;  %v2738_v55 = vadd.f32 %v5574_v38, %v2353_v59  ;;  %v2732_v11 = vpop.f32.mrb[137].mxu0  ;;  %v3316_v60 = vrot.slane %v3278_v51, %v7628_v19  ;;  %v3323_v39 = vrot.slane %v3279_v30, %v7628_v19 }
 0x296   : > { %v2733_v9 = vadd.f32 %v2732_v11, %v2348_v17  ;;  %v2377_v42 = vpop.f32.mrb[28].mxu1  ;;  %v7661_v1 = vrot.slane %v3341_v48, %v7628_v19 }
 0x297   : > { %v3280_v21 = vcombine.low %v3017_v58, %v3018_v24  ;;  %v3281_v61 = vcombine.high %v3017_v58, %v3018_v24  ;;  %v3020_v18 = vmax.f32 %v2738_v55, 0.0  ;;  %v2379_v6 = vpop.f32.mrb[29].mxu1 }
 0x298   : > { %v3019_v52 = vmax.f32 %v2733_v9, 0.0  ;;  %v5577_v63 = vpop.f32.mrb[138].mxu0 }
 0x299   : > { %v3330_v13 = vrot.slane %v3280_v21, %v7628_v19  ;;  %v3337_v12 = vrot.slane %v3281_v61, %v7628_v19  ;;  %v2748_v27 = vadd.f32 %v5577_v63, %v2363_v34  ;;  %v2742_v28 = vpop.f32.mrb[139].mxu0 }
 0x29a   : > { %v3410_v31 = vcombine.low %v3019_v52, %v3020_v18  ;;  %v3411_v45 = vcombine.high %v3019_v52, %v3020_v18  ;;  %v2743_v26 = vadd.f32 %v2742_v28, %v2358_v10  ;;  %v2382_v23 = vpop.f32.mrb[30].mxu1  ;;  %v2378_v52 = vadd.f32 %v7609_v62, %v2377_v42 }
 0x29b   : > { %v3342_v15 = vcombine.low %v3316_v60, %v3330_v13  ;;  %v3343_v25 = vcombine.high %v3316_v60, %v3330_v13  ;;  %v3344_v59 = vcombine.low %v3323_v39, %v3337_v12  ;;  %v3345_v4 = vcombine.high %v3323_v39, %v3337_v12  ;;  %v2384_v47 = vpop.f32.mrb[31].mxu1 }
 0x29c   : > { %v7664_v40 = vrot.slane %v3410_v31, %v7628_v19  ;;  %v7667_v49 = vrot.slane %v3411_v45, %v7628_v19  ;;  %v3022_v50 = vmax.f32 %v2748_v27, 0.0  ;;  %v3021_v33 = vmax.f32 %v2743_v26, 0.0  ;;  %v5580_v51 = vpop.f32.mrb[140].mxu0 }
 0x29d   : > { %v7670_v30 = vrot.slane %v3342_v15, %v7628_v19  ;;  %v7673_v48 = vrot.slane %v3344_v59, %v7628_v19  ;;  %v2383_v24 = vadd.f32 %v7609_v62, %v2382_v23  ;;  %v2758_v16 = vadd.f32 %v5580_v51, %v2373_v43  ;;  %v2752_v57 = vpop.f32.mrb[141].mxu0 }
 0x29e   : > { %v3412_v17 = vcombine.low %v3021_v33, %v3022_v50  ;;  %v3413_v38 = vcombine.high %v3021_v33, %v3022_v50  ;;  %v2753_v10 = vadd.f32 %v2752_v57, %v2368_v8  ;;  %v2387_v58 = vpop.f32.mrb[32].mxu1  ;;  %v7677_v55 = vrot.slane %v3343_v25, %v7628_v19 }
 0x29f   : > { %v3402_v11 = vcombine.low %v7645_v3, %v7670_v30  ;;  %v3405_v21 = vcombine.high %v7650_v5, %v7673_v48  ;;  %v2389_v61 = vpop.f32.mrb[33].mxu1  ;;  %v3024_v6 = vmax.f32 %v2758_v16, 0.0  ;;  %v7693_v13 = vrot.slane %v3345_v4, %v7628_v19 }
 0x2a0   : > { %v3438_v18 = vrot.slane %v3412_v17, %v7628_v19  ;;  %v3445_v8 = vrot.slane %v3413_v38, %v7628_v19  ;;  %v3023_v60 = vmax.f32 %v2753_v10, 0.0  ;;  %v5583_v43 = vpop.f32.mrb[142].mxu0  ;;  %v3406_v39 = vcombine.low %v7655_v41, %v7677_v55 }
 0x2a1   : > { %v2768_v63 = vadd.f32 %v5583_v43, %v2383_v24  ;;  %v2762_v12 = vpop.f32.mrb[143].mxu0  ;;  %v3409_v42 = vcombine.high %v7661_v1, %v7693_v13  ;;  %v2388_v59 = vadd.f32 %v7609_v62, %v2387_v58 }
 0x2a2   : > { %v3474_v27 = vcombine.low %v7664_v40, %v3438_v18  ;;  %v3475_v28 = vcombine.high %v7664_v40, %v3438_v18  ;;  %v3476_v31 = vcombine.low %v7667_v49, %v3445_v8  ;;  %v3477_v45 = vcombine.high %v7667_v49, %v3445_v8  ;;  %v2392_v26 = vpop.f32.mrb[34].mxu1  ;;  %4490 = vmatprep.mubr.f32.mxu1 %v3406_v39 }
 0x2a3   : > { %v3414_v23 = vcombine.low %v3023_v60, %v3024_v6  ;;  %v3415_v15 = vcombine.high %v3023_v60, %v3024_v6  ;;  %v2394_v25 = vpop.f32.mrb[35].mxu1  ;;  %v3026_v4 = vmax.f32 %v2768_v63, 0.0  ;;  %v2763_v47 = vadd.f32 %v2762_v12, %v2378_v52  ;;  %4491 = vmatmul.mubr.f32.vlgmr.msra.gmra.mrb[128].mxu1 %v3402_v11  ;;  %4805 = vmatprep.mubr.f32.mxu0 %v3409_v42 }
 0x2a4   : > { %v2393_v50 = vadd.f32 %v7609_v62, %v2392_v26  ;;  %v5586_v40 = vpop.f32.mrb[144].mxu0  ;;  %4806 = vmatmul.mubr.f32.vlgmr.msra.gmra.mrb[192].mxu0 %v3405_v21  ;;  %v7714_v25 = vrot.slane %v3475_v28, %v7628_v19 }
 0x2a5   : > { %v2772_v33 = vpop.f32.mrb[145].mxu0  ;;  %v3025_v51 = vmax.f32 %v2763_v47, 0.0  ;;  %v3452_v18 = vrot.slane %v3414_v23, %v7628_v19  ;;  %v3459_v8 = vrot.slane %v3415_v15, %v7628_v19  ;;  %v7717_v23 = vrot.slane %v3477_v45, %v7628_v19 }
 0x2a6   : > { %v2778_v49 = vadd.f32 %v5586_v40, %v2393_v50  ;;  %v2773_v24 = vadd.f32 %v2772_v33, %v2388_v59  ;;  %v2397_v16 = vpop.f32.mrb[36].mxu1  ;;  %v7720_v33 = vrot.slane %v3474_v27, %v7628_v19 }
 0x2a7   : > { %v2399_v17 = vpop.f32.mrb[37].mxu1  ;;  %v3416_v10 = vcombine.low %v3025_v51, %v3026_v4  ;;  %v3417_v58 = vcombine.high %v3025_v51, %v3026_v4  ;;  %v2398_v39 = vadd.f32 %v7609_v62, %v2397_v16  ;;  %v7723_v51 = vrot.slane %v3476_v31, %v7628_v19 }
 0x2a8   : > { %v3028_v11 = vmax.f32 %v2778_v49, 0.0  ;;  %v3027_v61 = vmax.f32 %v2773_v24, 0.0 }
 0x2a9   : > { %v3466_v21 = vrot.slane %v3416_v10, %v7628_v19  ;;  %v3473_v6 = vrot.slane %v3417_v58, %v7628_v19  ;;  %8636 = vst [vmem:[#allocation22_spill] sm:$0xff] %v7723_v51 }
 0x2aa   : > { %v3546_v60 = vcombine.low %v3027_v61, %v3028_v11  ;;  %v3547_v43 = vcombine.high %v3027_v61, %v3028_v11  ;;  %v2402_v52 = vpop.f32.mrb[38].mxu1  ;;  %v5589_v63 = vpop.f32.mrb[146].mxu0 }
 0x2ab   : > { %v2403_v12 = vadd.f32 %v7609_v62, %v2402_v52  ;;  %v2404_v26 = vpop.f32.mrb[39].mxu1  ;;  %v2782_v42 = vpop.f32.mrb[147].mxu0  ;;  %v3478_v15 = vcombine.low %v3452_v18, %v3466_v21  ;;  %v3479_v59 = vcombine.high %v3452_v18, %v3466_v21  ;;  %v3480_v4 = vcombine.low %v3459_v8, %v3473_v6 }
 0x2ac   : > { %v3481_v47 = vcombine.high %v3459_v8, %v3473_v6  ;;  %v2783_v40 = vadd.f32 %v2782_v42, %v2398_v39  ;;  %v7738_v17 = vrot.slane %v3546_v60, %v7628_v19  ;;  %v7741_v27 = vrot.slane %v3547_v43, %v7628_v19 }
 0x2ad   : > { %v2788_v50 = vadd.f32 %v5589_v63, %v2403_v12  ;;  %v7726_v24 = vrot.slane %v3479_v59, %v7628_v19  ;;  %v7732_v45 = vrot.slane %v3478_v15, %v7628_v19  ;;  %v7735_v16 = vrot.slane %v3480_v4, %v7628_v19 }
 0x2ae   : > { %v2407_v49 = vpop.f32.mrb[40].mxu1  ;;  %v7729_v28 = vrot.slane %v3481_v47, %v7628_v19  ;;  %v3029_v10 = vmax.f32 %v2783_v40, 0.0 }
 0x2af   : > { %8637 = vst [vmem:[#allocation23_spill] sm:$0xff] %v7735_v16  ;;  %v3030_v31 = vmax.f32 %v2788_v50, 0.0  ;;  %v2409_v58 = vpop.f32.mrb[41].mxu1  ;;  %v3542_v11 = vcombine.low %v7714_v25, %v7726_v24  ;;  %v3538_v18 = vcombine.low %v7720_v33, %v7732_v45  ;;  %v3541_v8 = vcombine.high %v7723_v51, %v7735_v16 }
 0x2b0   : > { %v3545_v61 = vcombine.high %v7717_v23, %v7729_v28  ;;  %v2408_v52 = vadd.f32 %v7609_v62, %v2407_v49 }
 0x2b1   : > { %v3548_v21 = vcombine.low %v3029_v10, %v3030_v31  ;;  %v3549_v6 = vcombine.high %v3029_v10, %v3030_v31  ;;  %4495 = vmatprep.mubr.f32.mxu1 %v3542_v11 }
 0x2b2   : > { %4810 = vmatprep.mubr.f32.mxu0 %v3545_v61  ;;  %v2412_v63 = vpop.f32.mrb[42].mxu1  ;;  %v5592_v39 = vpop.f32.mrb[148].mxu0  ;;  %4496 = vmatmul.mubr.f32.gmra.mrb[130].mxu1 %v3538_v18 }
 0x2b3   : > { %v3574_v42 = vrot.slane %v3548_v21, %v7628_v19  ;;  %v3581_v15 = vrot.slane %v3549_v6, %v7628_v19  ;;  %4811 = vmatmul.mubr.f32.gmra.mrb[194].mxu0 %v3541_v8  ;;  %v2413_v59 = vadd.f32 %v7609_v62, %v2412_v63  ;;  %v2414_v4 = vpop.f32.mrb[43].mxu1  ;;  %v2792_v47 = vpop.f32.mrb[149].mxu0 }
 0x2b4   : > { %v2793_v50 = vadd.f32 %v2792_v47, %v2408_v52 }
 0x2b5   : > { %v3610_v40 = vcombine.low %v7738_v17, %v3574_v42  ;;  %v3611_v49 = vcombine.high %v7738_v17, %v3574_v42  ;;  %v3612_v31 = vcombine.low %v7741_v27, %v3581_v15  ;;  %v3613_v10 = vcombine.high %v7741_v27, %v3581_v15 }
 0x2b6   : > { %v2798_v58 = vadd.f32 %v5592_v39, %v2413_v59  ;;  %v3031_v11 = vmax.f32 %v2793_v50, 0.0  ;;  %v2417_v61 = vpop.f32.mrb[44].mxu1 }
 0x2b7   : > { %v2419_v21 = vpop.f32.mrb[45].mxu1  ;;  %v2418_v63 = vadd.f32 %v7609_v62, %v2417_v61 }
 0x2b8   : > { %v3032_v6 = vmax.f32 %v2798_v58, 0.0 }
 0x2ba   : > { %v3550_v18 = vcombine.low %v3031_v11, %v3032_v6  ;;  %v3551_v8 = vcombine.high %v3031_v11, %v3032_v6  ;;  %v2422_v4 = vpop.f32.mrb[46].mxu1  ;;  %v5595_v26 = vpop.f32.mrb[150].mxu0 }
 0x2bb   : > { %v2423_v52 = vadd.f32 %v7609_v62, %v2422_v4  ;;  %v2424_v47 = vpop.f32.mrb[47].mxu1  ;;  %v2802_v12 = vpop.f32.mrb[151].mxu0 }
 0x2bc   : > { %v2803_v17 = vadd.f32 %v2802_v12, %v2418_v63  ;;  %v3588_v50 = vrot.slane %v3550_v18, %v7628_v19  ;;  %v3595_v21 = vrot.slane %v3551_v8, %v7628_v19  ;;  %v7779_v8 = vrot.slane %v3610_v40, %v7628_v19 }
 0x2bd   : > { %v2808_v42 = vadd.f32 %v5595_v26, %v2423_v52 }
 0x2be   : > { %v3033_v9 = vmax.f32 %v2803_v17, 0.0  ;;  %v2427_v38 = vpop.f32.mrb[48].mxu1 }
 0x2bf   : > { %v3034_v27 = vmax.f32 %v2808_v42, 0.0  ;;  %v2429_v39 = vpop.f32.mrb[49].mxu1  ;;  %v2428_v58 = vadd.f32 %v7609_v62, %v2427_v38 }
 0x2c0   : > { %v7776_v39 = vrot.slane %v3611_v49, %v7628_v19 }
 0x2c1   : > { %v3552_v15 = vcombine.low %v3033_v9, %v3034_v27  ;;  %v3553_v59 = vcombine.high %v3033_v9, %v3034_v27 }
 0x2c2   : > { %v2432_v11 = vpop.f32.mrb[50].mxu1  ;;  %v5598_v61 = vpop.f32.mrb[152].mxu0 }
 0x2c3   : > { %v3602_v6 = vrot.slane %v3552_v15, %v7628_v19  ;;  %v3609_v4 = vrot.slane %v3553_v59, %v7628_v19  ;;  %v2433_v12 = vadd.f32 %v7609_v62, %v2432_v11  ;;  %v2434_v26 = vpop.f32.mrb[51].mxu1  ;;  %v2812_v63 = vpop.f32.mrb[153].mxu0 }
 0x2c4   : > { %v2813_v52 = vadd.f32 %v2812_v63, %v2428_v58 }
 0x2c5   : > { %v3614_v47 = vcombine.low %v3588_v50, %v3602_v6  ;;  %v3615_v17 = vcombine.high %v3588_v50, %v3602_v6  ;;  %v3616_v9 = vcombine.low %v3595_v21, %v3609_v4  ;;  %v3617_v42 = vcombine.high %v3595_v21, %v3609_v4 }
 0x2c6   : > { %v2818_v18 = vadd.f32 %v5598_v61, %v2433_v12  ;;  %v3035_v27 = vmax.f32 %v2813_v52, 0.0  ;;  %v2437_v38 = vpop.f32.mrb[52].mxu1  ;;  %v7788_v50 = vrot.slane %v3613_v10, %v7628_v19  ;;  %v7795_v21 = vrot.slane %v3612_v31, %v7628_v19 }
 0x2c7   : > { %v2439_v15 = vpop.f32.mrb[53].mxu1  ;;  %v7782_v59 = vrot.slane %v3615_v17, %v7628_v19  ;;  %v7785_v11 = vrot.slane %v3614_v47, %v7628_v19  ;;  %v7791_v58 = vrot.slane %v3617_v42, %v7628_v19  ;;  %v2438_v49 = vadd.f32 %v7609_v62, %v2437_v38 }
 0x2c8   : > { %8638 = vst [vmem:[#allocation24_spill] sm:$0xff] %v7788_v50  ;;  %v3036_v61 = vmax.f32 %v2818_v18, 0.0  ;;  %8640 = vst [vmem:[#allocation26_spill] sm:$0xff] %v7795_v21  ;;  %v7798_v40 = vrot.slane %v3616_v9, %v7628_v19  ;;  %v3109_v15 = vld [vmem:[%s8551_s5 + $0x110] sm:$0xff] }
 0x2c9   : > { %8639 = vst [vmem:[#allocation25_spill] sm:$0xff] %v7791_v58  ;;  %v3678_v6 = vcombine.low %v7776_v39, %v7782_v59  ;;  %v3674_v4 = vcombine.low %v7779_v8, %v7785_v11 }
 0x2ca   : > { %8641 = vst [vmem:[#allocation27_spill] sm:$0xff] %v7798_v40  ;;  %v3682_v26 = vcombine.low %v3035_v27, %v3036_v61  ;;  %v3683_v63 = vcombine.high %v3035_v27, %v3036_v61  ;;  %v2442_v52 = vpop.f32.mrb[54].mxu1  ;;  %v5601_v31 = vpop.f32.mrb[154].mxu0 }
 0x2cb   : > { %v2443_v9 = vadd.f32 %v7609_v62, %v2442_v52  ;;  %v2444_v42 = vpop.f32.mrb[55].mxu1  ;;  %v2822_v18 = vpop.f32.mrb[155].mxu0  ;;  %4500 = vmatprep.mubr.f32.mxu1 %v3678_v6 }
 0x2cc   : > { %v2823_v27 = vadd.f32 %v2822_v18, %v2438_v49  ;;  %4501 = vmatmul.mubr.f32.gmra.mrb[132].mxu1 %v3674_v4  ;;  %v7818_v52 = vrot.slane %v3682_v26, %v7628_v19  ;;  %v7821_v6 = vrot.slane %v3683_v63, %v7628_v19  ;;  %v3123_v49 = vld [vmem:[%s8551_s5 + $0x180] sm:$0xff] }
 0x2cd   : > { %v2828_v61 = vadd.f32 %v5601_v31, %v2443_v9  ;;  %v3108_v9 = vld [vmem:[%s8551_s5 + $0x108] sm:$0xff] }
 0x2ce   : > { %v3037_v12 = vmax.f32 %v2823_v27, 0.0  ;;  %v2447_v10 = vpop.f32.mrb[56].mxu1 }
 0x2cf   : > { %v3038_v47 = vmax.f32 %v2828_v61, 0.0  ;;  %v2449_v43 = vpop.f32.mrb[57].mxu1  ;;  %v2448_v42 = vadd.f32 %v7609_v62, %v2447_v10 }
 0x2d0   : > { %v3124_v43 = vld [vmem:[%s8551_s5 + $0x188] sm:$0xff] }
 0x2d1   : > { %v3684_v60 = vcombine.low %v3037_v12, %v3038_v47  ;;  %v3685_v17 = vcombine.high %v3037_v12, %v3038_v47  ;;  %v5804_v31 = vpack.c.bf16 %v3124_v43, %v3123_v49  ;;  %v3107_v47 = vld [vmem:[%s8551_s5 + $0x100] sm:$0xff] }
 0x2d2   : > { %v2452_v38 = vpop.f32.mrb[58].mxu1  ;;  %v5604_v34 = vpop.f32.mrb[156].mxu0  ;;  %v5806_v27 = vpack.c.bf16 %v3108_v9, %v3107_v47 }
 0x2d3   : > { %v7831_v4 = vrot.slane %v3684_v60, %v7628_v19  ;;  %v7834_v12 = vrot.slane %v3685_v17, %v7628_v19  ;;  %v2453_v26 = vadd.f32 %v7609_v62, %v2452_v38  ;;  %v2454_v63 = vpop.f32.mrb[59].mxu1  ;;  %v2832_v10 = vpop.f32.mrb[157].mxu0  ;;  %5805 = vmatprep.subr.bf16.mxu1 %v5804_v31 }
 0x2d4   : > { %v2833_v18 = vadd.f32 %v2832_v10, %v2448_v42  ;;  %5807 = vmatpush3.bf16.msra.mxu1 %v5806_v27  ;;  %v3125_v42 = vld [vmem:[%s8551_s5 + $0x190] sm:$0xff]  ;;  %v3126_v10 = vld [vmem:[%s8551_s5 + $0x198] sm:$0xff] }
 0x2d5   : > { %v2838_v49 = vadd.f32 %v5604_v34, %v2453_v26  ;;  %v5808_v9 = vpack.c.bf16 %v3126_v10, %v3125_v42  ;;  %v3110_v34 = vld [vmem:[%s8551_s5 + $0x118] sm:$0xff]  ;;  %v3127_v42 = vld [vmem:[%s8551_s5 + $0x1a0] sm:$0xff]  ;;  %v3128_v10 = vld [vmem:[%s8551_s5 + $0x1a8] sm:$0xff] }
 0x2d6   : > { %v3039_v43 = vmax.f32 %v2833_v18, 0.0  ;;  %v2457_v63 = vpop.f32.mrb[60].mxu1  ;;  %v5810_v31 = vpack.c.bf16 %v3110_v34, %v3109_v15 }
 0x2d7   : > { %v2459_v47 = vpop.f32.mrb[61].mxu1  ;;  %v3040_v26 = vmax.f32 %v2838_v49, 0.0  ;;  %5809 = vmatprep.subr.bf16.mxu1 %v5808_v9  ;;  %v2458_v57 = vadd.f32 %v7609_v62, %v2457_v63  ;;  %v5812_v9 = vpack.c.bf16 %v3128_v10, %v3127_v42  ;;  %v3112_v63 = vld [vmem:[%s8551_s5 + $0x128] sm:$0xff]  ;;  %v3130_v42 = vld [vmem:[%s8551_s5 + $0x1b8] sm:$0xff] }
 0x2d8   : > { %5811 = vmatpush3.bf16.msra.mxu1 %v5810_v31 }
 0x2d9   : > { %v3686_v18 = vcombine.low %v3039_v43, %v3040_v26  ;;  %v3687_v27 = vcombine.high %v3039_v43, %v3040_v26  ;;  %v3111_v43 = vld [vmem:[%s8551_s5 + $0x120] sm:$0xff]  ;;  %5813 = vmatprep.subr.bf16.mxu1 %v5812_v9 }
 0x2da   : > { %v2462_v38 = vpop.f32.mrb[62].mxu1  ;;  %v5607_v61 = vpop.f32.mrb[158].mxu0  ;;  %v5814_v26 = vpack.c.bf16 %v3112_v63, %v3111_v43 }
 0x2db   : > { %v2463_v47 = vadd.f32 %v7609_v62, %v2462_v38  ;;  %v2464_v49 = vpop.f32.mrb[63].mxu1  ;;  %v2842_v15 = vpop.f32.mrb[159].mxu0  ;;  %v3129_v38 = vld [vmem:[%s8551_s5 + $0x1b0] sm:$0xff]  ;;  %v3724_v43 = vrot.slane %v3686_v18, %v7628_v19  ;;  %v3731_v63 = vrot.slane %v3687_v27, %v7628_v19 }
 0x2dc   : > { %v2843_v34 = vadd.f32 %v2842_v15, %v2458_v57  ;;  %5815 = vmatpush3.bf16.msra.mxu1 %v5814_v26  ;;  %v5816_v32 = vpack.c.bf16 %v3130_v42, %v3129_v38  ;;  %v3113_v57 = vld [vmem:[%s8551_s5 + $0x130] sm:$0xff]  ;;  %v3131_v38 = vld [vmem:[%s8551_s5 + $0x1c0] sm:$0xff]  ;;  %v3132_v42 = vld [vmem:[%s8551_s5 + $0x1c8] sm:$0xff] }
 0x2dd   : > { %v2848_v31 = vadd.f32 %v5607_v61, %v2463_v47  ;;  %v3114_v61 = vld [vmem:[%s8551_s5 + $0x138] sm:$0xff] }
 0x2de   : > { %v3041_v60 = vmax.f32 %v2843_v34, 0.0  ;;  %v2467_v17 = vpop.f32.mrb[64].mxu1  ;;  %v5818_v47 = vpack.c.bf16 %v3114_v61, %v3113_v57  ;;  %5817 = vmatprep.subr.bf16.mxu1 %v5816_v32  ;;  %v3116_v57 = vld [vmem:[%s8551_s5 + $0x148] sm:$0xff] }
 0x2df   : > { %v3042_v10 = vmax.f32 %v2848_v31, 0.0  ;;  %v2469_v49 = vpop.f32.mrb[65].mxu1  ;;  %v2468_v34 = vadd.f32 %v7609_v62, %v2467_v17  ;;  %v5820_v17 = vpack.c.bf16 %v3132_v42, %v3131_v38 }
 0x2e0   : > { %5819 = vmatpush3.bf16.msra.mxu1 %v5818_v47  ;;  %v3115_v49 = vld [vmem:[%s8551_s5 + $0x140] sm:$0xff]  ;;  %v8642_v47 = vcombine.high %v7818_v52, %v7831_v4 }
 0x2e1   : > { %v3688_v15 = vcombine.low %v3041_v60, %v3042_v10  ;;  %v3689_v9 = vcombine.high %v3041_v60, %v3042_v10  ;;  %v5822_v38 = vpack.c.bf16 %v3116_v57, %v3115_v49  ;;  %5821 = vmatprep.subr.bf16.mxu1 %v5820_v17 }
 0x2e2   : > { %v2472_v26 = vpop.f32.mrb[66].mxu1  ;;  %v5610_v31 = vpop.f32.mrb[160].mxu0 }
 0x2e3   : > { %v3738_v60 = vrot.slane %v3688_v15, %v7628_v19  ;;  %v3745_v32 = vrot.slane %v3689_v9, %v7628_v19  ;;  %v2473_v18 = vadd.f32 %v7609_v62, %v2472_v26  ;;  %v2474_v27 = vpop.f32.mrb[67].mxu1  ;;  %v2852_v10 = vpop.f32.mrb[161].mxu0  ;;  %v7911_v15 = vrot.slane %v8642_v47, %v7628_v19 }
 0x2e4   : > { %v2853_v61 = vadd.f32 %v2852_v10, %v2468_v34  ;;  %v8643_v9 = vcombine.low %v7818_v52, %v7831_v4  ;;  %v3133_v34 = vld [vmem:[%s8551_s5 + $0x1d0] sm:$0xff]  ;;  %v3134_v10 = vld [vmem:[%s8551_s5 + $0x1d8] sm:$0xff]  ;;  %5823 = vmatpush3.bf16.msra.mxu1 %v5822_v38 }
 0x2e5   : > { %v3750_v42 = vcombine.low %v3724_v43, %v3738_v60  ;;  %v3751_v27 = vcombine.high %v3724_v43, %v3738_v60  ;;  %v3752_v20 = vcombine.low %v3731_v63, %v3745_v32  ;;  %v3753_v22 = vcombine.high %v3731_v63, %v3745_v32  ;;  %v3117_v52 = vld [vmem:[%s8551_s5 + $0x150] sm:$0xff]  ;;  %v3118_v63 = vld [vmem:[%s8551_s5 + $0x158] sm:$0xff]  ;;  %v3135_v60 = vld [vmem:[%s8551_s5 + $0x1e0] sm:$0xff] }
 0x2e6   : > { %v7917_v26 = vrot.slane %v8643_v9, %v7628_v19  ;;  %v2858_v4 = vadd.f32 %v5610_v31, %v2473_v18  ;;  %v3043_v47 = vmax.f32 %v2853_v61, 0.0  ;;  %v2477_v49 = vpop.f32.mrb[68].mxu1  ;;  %v5824_v43 = vpack.c.bf16 %v3134_v10, %v3133_v34  ;;  %v3136_v32 = vld [vmem:[%s8551_s5 + $0x1e8] sm:$0xff]  ;;  %v3119_v34 = vld [vmem:[%s8551_s5 + $0x160] sm:$0xff] }
 0x2e7   : > { %v8644_v31 = vcombine.high %v7821_v6, %v7834_v12  ;;  %v2478_v17 = vadd.f32 %v7609_v62, %v2477_v49  ;;  %v2479_v57 = vpop.f32.mrb[69].mxu1  ;;  %v7945_v61 = vrot.slane %v3751_v27, %v7628_v19  ;;  %v7948_v9 = vrot.slane %v3750_v42, %v7628_v19  ;;  %v3120_v10 = vld [vmem:[%s8551_s5 + $0x168] sm:$0xff] }
 0x2e8   : > { %v5826_v38 = vpack.c.bf16 %v3118_v63, %v3117_v52  ;;  %5825 = vmatprep.subr.bf16.mxu1 %v5824_v43  ;;  %v5828_v54 = vpack.c.bf16 %v3136_v32, %v3135_v60  ;;  %v5830_v49 = vpack.c.bf16 %v3120_v10, %v3119_v34  ;;  %v7957_v57 = vrot.slane %v3753_v22, %v7628_v19  ;;  %v3137_v63 = vld [vmem:[%s8551_s5 + $0x1f0] sm:$0xff] }
 0x2e9   : > { %v7941_v18 = vrot.slane %v8644_v31, %v7628_v19  ;;  %v3044_v31 = vmax.f32 %v2858_v4, 0.0  ;;  %v3814_v42 = vcombine.low %v7911_v15, %v7945_v61  ;;  %v3810_v27 = vcombine.low %v7917_v26, %v7948_v9 }
 0x2ea   : > { %8646 = vst [vmem:[#allocation29_spill] sm:$0xff] %v7957_v57  ;;  %v2482_v43 = vpop.f32.mrb[70].mxu1  ;;  %v5613_v60 = vpop.f32.mrb[162].mxu0  ;;  %5827 = vmatpush3.bf16.msra.mxu1 %v5826_v38  ;;  %v7970_v32 = vrot.slane %v3752_v20, %v7628_v19  ;;  %v8648_v38 = vcombine.low %v7821_v6, %v7834_v12  ;;  %v3155_v6 = vld [vmem:[%s8551_s5 + $0x280] sm:$0xff]  ;;  %v3156_v12 = vld [vmem:[%s8551_s5 + $0x288] sm:$0xff] }
 0x2eb   : > { %8645 = vst [vmem:[#allocation28_spill] sm:$0xff] %v7941_v18  ;;  %v3818_v7 = vcombine.low %v3043_v47, %v3044_v31  ;;  %v3819_v4 = vcombine.high %v3043_v47, %v3044_v31  ;;  %v2483_v34 = vadd.f32 %v7609_v62, %v2482_v43  ;;  %v2484_v10 = vpop.f32.mrb[71].mxu1  ;;  %v2862_v53 = vpop.f32.mrb[163].mxu0  ;;  %4505 = vmatprep.mubr.f32.mxu1 %v3814_v42  ;;  %v3138_v47 = vld [vmem:[%s8551_s5 + $0x1f8] sm:$0xff]  ;;  %v3121_v42 = vld [vmem:[%s8551_s5 + $0x170] sm:$0xff] }
 0x2ec   : > { %8647 = vst [vmem:[#allocation30_spill] sm:$0xff] %v7970_v32  ;;  %5829 = vmatprep.subr.bf16.mxu1 %v5828_v54  ;;  %v7983_v20 = vrot.slane %v8648_v38, %v7628_v19  ;;  %v2863_v43 = vadd.f32 %v2862_v53, %v2478_v17  ;;  %4506 = vmatmul.mubr.f32.gmra.mrb[134].mxu1 %v3810_v27  ;;  %v3122_v10 = vld [vmem:[%s8551_s5 + $0x178] sm:$0xff] }
 0x2ed   : > { %v5832_v54 = vpack.c.bf16 %v3138_v47, %v3137_v63  ;;  %v2868_v22 = vadd.f32 %v5613_v60, %v2483_v34  ;;  %v5834_v47 = vpack.c.bf16 %v3122_v10, %v3121_v42  ;;  %v5836_v34 = vpack.c.bf16 %v3156_v12, %v3155_v6 }
 0x2ee   : > { %8649 = vst [vmem:[#allocation31_spill] sm:$0xff] %v7983_v20  ;;  %v3045_v27 = vmax.f32 %v2863_v43, 0.0  ;;  %v2487_v63 = vpop.f32.mrb[72].mxu1  ;;  %5831 = vmatpush3.bf16.msra.mxu1 %v5830_v49  ;;  %v3832_v46 = vrot.slane %v3818_v7, %v7628_v19  ;;  %v3839_v53 = vrot.slane %v3819_v4, %v7628_v19 }
 0x2ef   : > { %v3046_v38 = vmax.f32 %v2868_v22, 0.0  ;;  %v2489_v60 = vpop.f32.mrb[73].mxu1  ;;  %5833 = vmatprep.subr.bf16.mxu1 %v5832_v54  ;;  %v2488_v29 = vadd.f32 %v7609_v62, %v2487_v63 }
 0x2f1   : > { %v3820_v31 = vcombine.low %v3045_v27, %v3046_v38  ;;  %v3821_v52 = vcombine.high %v3045_v27, %v3046_v38 }
 0x2f2   : > { %v2492_v2 = vpop.f32.mrb[74].mxu1  ;;  %v5616_v44 = vpop.f32.mrb[164].mxu0  ;;  %5835 = vmatpush3.bf16.msra.mxu1 %v5834_v47 }
 0x2f3   : > { %v3846_v43 = vrot.slane %v3820_v31, %v7628_v19  ;;  %v3853_v49 = vrot.slane %v3821_v52, %v7628_v19  ;;  %v2493_v22 = vadd.f32 %v7609_v62, %v2492_v2  ;;  %v2494_v42 = vpop.f32.mrb[75].mxu1  ;;  %v2872_v54 = vpop.f32.mrb[165].mxu0  ;;  %5837 = vmatprep.subr.bf16.mxu1 %v5836_v34 }
 0x2f4   : > { %v2873_v10 = vadd.f32 %v2872_v54, %v2488_v29 }
 0x2f5   : > { %v3882_v6 = vcombine.low %v3832_v46, %v3846_v43  ;;  %v3883_v12 = vcombine.high %v3832_v46, %v3846_v43  ;;  %v3884_v7 = vcombine.low %v3839_v53, %v3853_v49  ;;  %v3885_v27 = vcombine.high %v3839_v53, %v3853_v49 }
 0x2f6   : > { %v2878_v63 = vadd.f32 %v5616_v44, %v2493_v22  ;;  %v3047_v38 = vmax.f32 %v2873_v10, 0.0  ;;  %v2497_v60 = vpop.f32.mrb[76].mxu1 }
 0x2f7   : > { %v2499_v47 = vpop.f32.mrb[77].mxu1  ;;  %v2498_v31 = vadd.f32 %v7609_v62, %v2497_v60 }
 0x2f8   : > { %v3048_v17 = vmax.f32 %v2878_v63, 0.0 }
 0x2fa   : > { %v3822_v4 = vcombine.low %v3047_v38, %v3048_v17  ;;  %v3823_v32 = vcombine.high %v3047_v38, %v3048_v17  ;;  %v2502_v52 = vpop.f32.mrb[78].mxu1  ;;  %v5619_v20 = vpop.f32.mrb[166].mxu0 }
 0x2fb   : > { %v2503_v2 = vadd.f32 %v7609_v62, %v2502_v52  ;;  %v2504_v42 = vpop.f32.mrb[79].mxu1  ;;  %v2882_v34 = vpop.f32.mrb[167].mxu0 }
 0x2fc   : > { %v2883_v29 = vadd.f32 %v2882_v34, %v2498_v31  ;;  %v3860_v10 = vrot.slane %v3822_v4, %v7628_v19  ;;  %v3867_v60 = vrot.slane %v3823_v32, %v7628_v19  ;;  %v8021_v32 = vrot.slane %v3882_v6, %v7628_v19 }
 0x2fd   : > { %v2888_v54 = vadd.f32 %v5619_v20, %v2503_v2 }
 0x2fe   : > { %v3049_v46 = vmax.f32 %v2883_v29, 0.0  ;;  %v2507_v43 = vpop.f32.mrb[80].mxu1 }
 0x2ff   : > { %v3050_v53 = vmax.f32 %v2888_v54, 0.0  ;;  %v2509_v44 = vpop.f32.mrb[81].mxu1  ;;  %v2508_v17 = vadd.f32 %v7609_v62, %v2507_v43 }
 0x300   : > { %v8018_v44 = vrot.slane %v3883_v12, %v7628_v19  ;;  %v8038_v12 = vld [vmem:[%s8550_s4] ss:$0 sm:$0xff] }
 0x301   : > { %v3824_v49 = vcombine.low %v3049_v46, %v3050_v53  ;;  %v3825_v22 = vcombine.high %v3049_v46, %v3050_v53 }
 0x302   : > { %v2512_v63 = vpop.f32.mrb[82].mxu1  ;;  %v5622_v38 = vpop.f32.mrb[168].mxu0 }
 0x303   : > { %v3874_v47 = vrot.slane %v3824_v49, %v7628_v19  ;;  %v3881_v52 = vrot.slane %v3825_v22, %v7628_v19  ;;  %v2513_v20 = vadd.f32 %v7609_v62, %v2512_v63  ;;  %v2514_v31 = vpop.f32.mrb[83].mxu1  ;;  %v2892_v2 = vpop.f32.mrb[169].mxu0 }
 0x304   : > { %v2893_v42 = vadd.f32 %v2892_v2, %v2508_v17  ;;  %v8033_v17 = vrot.slane %v3884_v7, %v7628_v19 }
 0x305   : > { %v3886_v34 = vcombine.low %v3860_v10, %v3874_v47  ;;  %v3887_v29 = vcombine.high %v3860_v10, %v3874_v47  ;;  %v3888_v54 = vcombine.low %v3867_v60, %v3881_v52  ;;  %v3889_v46 = vcombine.high %v3867_v60, %v3881_v52 }
 0x306   : > { %v2898_v4 = vadd.f32 %v5622_v38, %v2513_v20  ;;  %v3051_v53 = vmax.f32 %v2893_v42, 0.0  ;;  %v2517_v43 = vpop.f32.mrb[84].mxu1  ;;  %v8030_v10 = vrot.slane %v3885_v27, %v7628_v19  ;;  %8651 = vst [vmem:[#allocation33_spill] sm:$0xff] %v8033_v17 }
 0x307   : > { %v2519_v49 = vpop.f32.mrb[85].mxu1  ;;  %v8024_v22 = vrot.slane %v3887_v29, %v7628_v19  ;;  %v8027_v62 = vrot.slane %v3886_v34, %v7628_v19  ;;  %v2518_v6 = vadd.f32 %v8038_v12, %v2517_v43  ;;  %v8042_v38 = vrot.slane %v3889_v46, %v7628_v19 }
 0x308   : > { %8650 = vst [vmem:[#allocation32_spill] sm:$0xff] %v8030_v10  ;;  %v3052_v63 = vmax.f32 %v2898_v4, 0.0  ;;  %v8045_v60 = vrot.slane %v3888_v54, %v7628_v19 }
 0x309   : > { %8652 = vst [vmem:[#allocation34_spill] sm:$0xff] %v8042_v38  ;;  %v3950_v27 = vcombine.low %v8018_v44, %v8024_v22  ;;  %v3946_v7 = vcombine.low %v8021_v32, %v8027_v62 }
 0x30a   : > { %8653 = vst [vmem:[#allocation35_spill] sm:$0xff] %v8045_v60  ;;  %v3954_v20 = vcombine.low %v3051_v53, %v3052_v63  ;;  %v3955_v31 = vcombine.high %v3051_v53, %v3052_v63  ;;  %v2522_v2 = vpop.f32.mrb[86].mxu1  ;;  %v5625_v42 = vpop.f32.mrb[170].mxu0 }
 0x30b   : > { %v2523_v54 = vadd.f32 %v8038_v12, %v2522_v2  ;;  %v2524_v46 = vpop.f32.mrb[87].mxu1  ;;  %v2902_v4 = vpop.f32.mrb[171].mxu0  ;;  %4510 = vmatprep.mubr.f32.mxu1 %v3950_v27 }
 0x30c   : > { %v2903_v53 = vadd.f32 %v2902_v4, %v2518_v6  ;;  %4511 = vmatmul.mubr.f32.gmra.mrb[136].mxu1 %v3946_v7  ;;  %v3968_v2 = vrot.slane %v3954_v20, %v7628_v19  ;;  %v3975_v43 = vrot.slane %v3955_v31, %v7628_v19 }
 0x30d   : > { %v2908_v63 = vadd.f32 %v5625_v42, %v2523_v54 }
 0x30e   : > { %v3053_v52 = vmax.f32 %v2903_v53, 0.0  ;;  %v2527_v47 = vpop.f32.mrb[88].mxu1 }
 0x30f   : > { %v3054_v34 = vmax.f32 %v2908_v63, 0.0  ;;  %v2529_v57 = vpop.f32.mrb[89].mxu1  ;;  %v2528_v46 = vadd.f32 %v8038_v12, %v2527_v47 }
 0x311   : > { %v3956_v18 = vcombine.low %v3053_v52, %v3054_v34  ;;  %v3957_v29 = vcombine.high %v3053_v52, %v3054_v34 }
 0x312   : > { %v2532_v27 = vpop.f32.mrb[90].mxu1  ;;  %v5628_v56 = vpop.f32.mrb[172].mxu0 }
 0x313   : > { %v3982_v38 = vrot.slane %v3956_v18, %v7628_v19  ;;  %v3989_v6 = vrot.slane %v3957_v29, %v7628_v19  ;;  %v2533_v7 = vadd.f32 %v8038_v12, %v2532_v27  ;;  %v2534_v42 = vpop.f32.mrb[91].mxu1  ;;  %v2912_v54 = vpop.f32.mrb[173].mxu0 }
 0x314   : > { %v2913_v4 = vadd.f32 %v2912_v54, %v2528_v46 }
 0x315   : > { %v4018_v57 = vcombine.low %v3968_v2, %v3982_v38  ;;  %v4019_v53 = vcombine.high %v3968_v2, %v3982_v38  ;;  %v4020_v52 = vcombine.low %v3975_v43, %v3989_v6  ;;  %v4021_v34 = vcombine.high %v3975_v43, %v3989_v6 }
 0x316   : > { %v2918_v20 = vadd.f32 %v5628_v56, %v2533_v7  ;;  %v3055_v63 = vmax.f32 %v2913_v4, 0.0  ;;  %v2537_v47 = vpop.f32.mrb[92].mxu1 }
 0x317   : > { %v2539_v49 = vpop.f32.mrb[93].mxu1  ;;  %v2538_v18 = vadd.f32 %v8038_v12, %v2537_v47 }
 0x318   : > { %v3056_v60 = vmax.f32 %v2918_v20, 0.0 }
 0x31a   : > { %v3958_v17 = vcombine.low %v3055_v63, %v3056_v60  ;;  %v3959_v31 = vcombine.high %v3055_v63, %v3056_v60  ;;  %v2542_v10 = vpop.f32.mrb[94].mxu1  ;;  %v5631_v29 = vpop.f32.mrb[174].mxu0 }
 0x31b   : > { %v2543_v27 = vadd.f32 %v8038_v12, %v2542_v10  ;;  %v2544_v42 = vpop.f32.mrb[95].mxu1  ;;  %v2922_v40 = vpop.f32.mrb[175].mxu0 }
 0x31c   : > { %v2923_v46 = vadd.f32 %v2922_v40, %v2538_v18  ;;  %v3996_v49 = vrot.slane %v3958_v17, %v7628_v19  ;;  %v4003_v63 = vrot.slane %v3959_v31, %v7628_v19  ;;  %v8082_v31 = vrot.slane %v4018_v57, %v7628_v19 }
 0x31d   : > { %v2928_v54 = vadd.f32 %v5631_v29, %v2543_v27 }
 0x31e   : > { %v3057_v38 = vmax.f32 %v2923_v46, 0.0  ;;  %v2547_v2 = vpop.f32.mrb[96].mxu1 }
 0x31f   : > { %v3058_v43 = vmax.f32 %v2928_v54, 0.0  ;;  %v2549_v56 = vpop.f32.mrb[97].mxu1  ;;  %v2548_v60 = vadd.f32 %v8038_v12, %v2547_v2 }
 0x320   : > { %v8079_v56 = vrot.slane %v4019_v53, %v7628_v19 }
 0x321   : > { %v3960_v6 = vcombine.low %v3057_v38, %v3058_v43  ;;  %v3961_v7 = vcombine.high %v3057_v38, %v3058_v43 }
 0x322   : > { %v2552_v4 = vpop.f32.mrb[98].mxu1  ;;  %v5634_v20 = vpop.f32.mrb[176].mxu0 }
 0x323   : > { %v4010_v10 = vrot.slane %v3960_v6, %v7628_v19  ;;  %v4017_v47 = vrot.slane %v3961_v7, %v7628_v19  ;;  %v2553_v40 = vadd.f32 %v8038_v12, %v2552_v4  ;;  %v2554_v18 = vpop.f32.mrb[99].mxu1  ;;  %v2932_v29 = vpop.f32.mrb[177].mxu0 }
 0x324   : > { %v2933_v27 = vadd.f32 %v2932_v29, %v2548_v60 }
 0x325   : > { %v4022_v42 = vcombine.low %v3996_v49, %v4010_v10  ;;  %v4023_v46 = vcombine.high %v3996_v49, %v4010_v10  ;;  %v4024_v54 = vcombine.low %v4003_v63, %v4017_v47  ;;  %v4025_v38 = vcombine.high %v4003_v63, %v4017_v47 }
 0x326   : > { %v2938_v17 = vadd.f32 %v5634_v20, %v2553_v40  ;;  %v3059_v43 = vmax.f32 %v2933_v27, 0.0  ;;  %v2557_v2 = vpop.f32.mrb[100].mxu1  ;;  %v8091_v49 = vrot.slane %v4021_v34, %v7628_v19  ;;  %v8098_v63 = vrot.slane %v4020_v52, %v7628_v19 }
 0x327   : > { %v2559_v6 = vpop.f32.mrb[101].mxu1  ;;  %v8085_v7 = vrot.slane %v4023_v46, %v7628_v19  ;;  %v8088_v4 = vrot.slane %v4022_v42, %v7628_v19  ;;  %v8094_v60 = vrot.slane %v4025_v38, %v7628_v19  ;;  %v2558_v53 = vadd.f32 %v8038_v12, %v2557_v2 }
 0x328   : > { %8654 = vst [vmem:[#allocation36_spill] sm:$0xff] %v8091_v49  ;;  %v3060_v20 = vmax.f32 %v2938_v17, 0.0  ;;  %8656 = vst [vmem:[#allocation38_spill] sm:$0xff] %v8098_v63  ;;  %v8101_v57 = vrot.slane %v4024_v54, %v7628_v19 }
 0x329   : > { %8655 = vst [vmem:[#allocation37_spill] sm:$0xff] %v8094_v60  ;;  %v4086_v10 = vcombine.low %v8079_v56, %v8085_v7  ;;  %v4082_v47 = vcombine.low %v8082_v31, %v8088_v4 }
 0x32a   : > { %8657 = vst [vmem:[#allocation39_spill] sm:$0xff] %v8101_v57  ;;  %v4090_v18 = vcombine.low %v3059_v43, %v3060_v20  ;;  %v4091_v29 = vcombine.high %v3059_v43, %v3060_v20  ;;  %v2562_v27 = vpop.f32.mrb[102].mxu1  ;;  %v5637_v52 = vpop.f32.mrb[178].mxu0 }
 0x32b   : > { %v2563_v54 = vadd.f32 %v8038_v12, %v2562_v27  ;;  %v2564_v38 = vpop.f32.mrb[103].mxu1  ;;  %v2942_v17 = vpop.f32.mrb[179].mxu0  ;;  %4515 = vmatprep.mubr.f32.mxu1 %v4086_v10 }
 0x32c   : > { %v2943_v43 = vadd.f32 %v2942_v17, %v2558_v53  ;;  %4516 = vmatmul.mubr.f32.gmra.mrb[138].mxu1 %v4082_v47  ;;  %v4104_v27 = vrot.slane %v4090_v18, %v7628_v19  ;;  %v4111_v2 = vrot.slane %v4091_v29, %v7628_v19 }
 0x32d   : > { %v2948_v20 = vadd.f32 %v5637_v52, %v2563_v54 }
 0x32e   : > { %v3061_v40 = vmax.f32 %v2943_v43, 0.0  ;;  %v2567_v34 = vpop.f32.mrb[104].mxu1 }
 0x32f   : > { %v3062_v42 = vmax.f32 %v2948_v20, 0.0  ;;  %v2569_v21 = vpop.f32.mrb[105].mxu1  ;;  %v2568_v38 = vadd.f32 %v8038_v12, %v2567_v34 }
 0x331   : > { %v4092_v37 = vcombine.low %v3061_v40, %v3062_v42  ;;  %v4093_v46 = vcombine.high %v3061_v40, %v3062_v42 }
 0x332   : > { %v2572_v10 = vpop.f32.mrb[106].mxu1  ;;  %v5640_v58 = vpop.f32.mrb[180].mxu0 }
 0x333   : > { %v4118_v60 = vrot.slane %v4092_v37, %v7628_v19  ;;  %v4125_v53 = vrot.slane %v4093_v46, %v7628_v19  ;;  %v2573_v47 = vadd.f32 %v8038_v12, %v2572_v10  ;;  %v2574_v52 = vpop.f32.mrb[107].mxu1  ;;  %v2952_v54 = vpop.f32.mrb[181].mxu0 }
 0x334   : > { %v2953_v17 = vadd.f32 %v2952_v54, %v2568_v38 }
 0x335   : > { %v4154_v21 = vcombine.low %v4104_v27, %v4118_v60  ;;  %v4155_v43 = vcombine.high %v4104_v27, %v4118_v60  ;;  %v4156_v40 = vcombine.low %v4111_v2, %v4125_v53  ;;  %v4157_v42 = vcombine.high %v4111_v2, %v4125_v53 }
 0x336   : > { %v2958_v18 = vadd.f32 %v5640_v58, %v2573_v47  ;;  %v3063_v20 = vmax.f32 %v2953_v17, 0.0  ;;  %v2577_v34 = vpop.f32.mrb[108].mxu1 }
 0x337   : > { %v2579_v6 = vpop.f32.mrb[109].mxu1  ;;  %v2578_v37 = vadd.f32 %v8038_v12, %v2577_v34 }
 0x338   : > { %v3064_v57 = vmax.f32 %v2958_v18, 0.0 }
 0x33a   : > { %v4094_v63 = vcombine.low %v3063_v20, %v3064_v57  ;;  %v4095_v29 = vcombine.high %v3063_v20, %v3064_v57  ;;  %v2582_v49 = vpop.f32.mrb[110].mxu1  ;;  %v5643_v46 = vpop.f32.mrb[182].mxu0 }
 0x33b   : > { %v2583_v10 = vadd.f32 %v8038_v12, %v2582_v49  ;;  %v2584_v52 = vpop.f32.mrb[111].mxu1  ;;  %v2962_v50 = vpop.f32.mrb[183].mxu0 }
 0x33c   : > { %v2963_v38 = vadd.f32 %v2962_v50, %v2578_v37  ;;  %v4132_v6 = vrot.slane %v4094_v63, %v7628_v19  ;;  %v4139_v20 = vrot.slane %v4095_v29, %v7628_v19  ;;  %v8138_v29 = vrot.slane %v4154_v21, %v7628_v19 }
 0x33d   : > { %v2968_v54 = vadd.f32 %v5643_v46, %v2583_v10 }
 0x33e   : > { %v3065_v60 = vmax.f32 %v2963_v38, 0.0  ;;  %v2587_v27 = vpop.f32.mrb[112].mxu1 }
 0x33f   : > { %v3066_v2 = vmax.f32 %v2968_v54, 0.0  ;;  %v2589_v58 = vpop.f32.mrb[113].mxu1  ;;  %v2588_v57 = vadd.f32 %v8038_v12, %v2587_v27 }
 0x340   : > { %v8135_v58 = vrot.slane %v4155_v43, %v7628_v19 }
 0x341   : > { %v4096_v53 = vcombine.low %v3065_v60, %v3066_v2  ;;  %v4097_v47 = vcombine.high %v3065_v60, %v3066_v2 }
 0x342   : > { %v2592_v17 = vpop.f32.mrb[114].mxu1  ;;  %v5646_v18 = vpop.f32.mrb[184].mxu0 }
 0x343   : > { %v4146_v49 = vrot.slane %v4096_v53, %v7628_v19  ;;  %v4153_v34 = vrot.slane %v4097_v47, %v7628_v19  ;;  %v2593_v50 = vadd.f32 %v8038_v12, %v2592_v17  ;;  %v2594_v37 = vpop.f32.mrb[115].mxu1  ;;  %v2972_v46 = vpop.f32.mrb[185].mxu0 }
 0x344   : > { %v2973_v10 = vadd.f32 %v2972_v46, %v2588_v57 }
 0x345   : > { %v4158_v52 = vcombine.low %v4132_v6, %v4146_v49  ;;  %v4159_v38 = vcombine.high %v4132_v6, %v4146_v49  ;;  %v4160_v54 = vcombine.low %v4139_v20, %v4153_v34  ;;  %v4161_v60 = vcombine.high %v4139_v20, %v4153_v34 }
 0x346   : > { %v2978_v63 = vadd.f32 %v5646_v18, %v2593_v50  ;;  %v3067_v2 = vmax.f32 %v2973_v10, 0.0  ;;  %v2597_v27 = vpop.f32.mrb[116].mxu1  ;;  %v8147_v6 = vrot.slane %v4157_v42, %v7628_v19  ;;  %v8154_v20 = vrot.slane %v4156_v40, %v7628_v19 }
 0x347   : > { %v2599_v53 = vpop.f32.mrb[117].mxu1  ;;  %v8141_v47 = vrot.slane %v4159_v38, %v7628_v19  ;;  %v8144_v17 = vrot.slane %v4158_v52, %v7628_v19  ;;  %v8150_v57 = vrot.slane %v4161_v60, %v7628_v19  ;;  %v2598_v43 = vadd.f32 %v8038_v12, %v2597_v27 }
 0x348   : > { %8658 = vst [vmem:[#allocation40_spill] sm:$0xff] %v8147_v6  ;;  %v3068_v18 = vmax.f32 %v2978_v63, 0.0  ;;  %8660 = vst [vmem:[#allocation42_spill] sm:$0xff] %v8154_v20  ;;  %v8157_v21 = vrot.slane %v4160_v54, %v7628_v19 }
 0x349   : > { %8659 = vst [vmem:[#allocation41_spill] sm:$0xff] %v8150_v57  ;;  %v4222_v49 = vcombine.low %v8135_v58, %v8141_v47  ;;  %v4218_v34 = vcombine.low %v8138_v29, %v8144_v17 }
 0x34a   : > { %8661 = vst [vmem:[#allocation43_spill] sm:$0xff] %v8157_v21  ;;  %v4226_v37 = vcombine.low %v3067_v2, %v3068_v18  ;;  %v4227_v46 = vcombine.high %v3067_v2, %v3068_v18  ;;  %v2602_v10 = vpop.f32.mrb[118].mxu1  ;;  %v5649_v40 = vpop.f32.mrb[186].mxu0 }
 0x34b   : > { %v2603_v54 = vadd.f32 %v8038_v12, %v2602_v10  ;;  %v2604_v60 = vpop.f32.mrb[119].mxu1  ;;  %v2982_v63 = vpop.f32.mrb[187].mxu0  ;;  %4520 = vmatprep.mubr.f32.mxu1 %v4222_v49 }
 0x34c   : > { %v2983_v2 = vadd.f32 %v2982_v63, %v2598_v43  ;;  %4521 = vmatmul.mubr.f32.gmra.mrb[140].mxu1 %v4218_v34  ;;  %v4240_v10 = vrot.slane %v4226_v37, %v7628_v19  ;;  %v4247_v27 = vrot.slane %v4227_v46, %v7628_v19 }
 0x34d   : > { %v2988_v18 = vadd.f32 %v5649_v40, %v2603_v54 }
 0x34e   : > { %v3069_v50 = vmax.f32 %v2983_v2, 0.0  ;;  %v2607_v42 = vpop.f32.mrb[120].mxu1 }
 0x34f   : > { %v3070_v52 = vmax.f32 %v2988_v18, 0.0  ;;  %v2609_v36 = vpop.f32.mrb[121].mxu1  ;;  %v2608_v60 = vadd.f32 %v8038_v12, %v2607_v42 }
 0x351   : > { %v4228_v16 = vcombine.low %v3069_v50, %v3070_v52  ;;  %v4229_v38 = vcombine.high %v3069_v50, %v3070_v52 }
 0x352   : > { %v2612_v49 = vpop.f32.mrb[122].mxu1  ;;  %v5652_v51 = vpop.f32.mrb[188].mxu0 }
 0x353   : > { %v4254_v57 = vrot.slane %v4228_v16, %v7628_v19  ;;  %v4261_v43 = vrot.slane %v4229_v38, %v7628_v19  ;;  %v2613_v34 = vadd.f32 %v8038_v12, %v2612_v49  ;;  %v2614_v40 = vpop.f32.mrb[123].mxu1  ;;  %v2992_v54 = vpop.f32.mrb[189].mxu0 }
 0x354   : > { %v2993_v63 = vadd.f32 %v2992_v54, %v2608_v60 }
 0x355   : > { %v4290_v36 = vcombine.low %v4240_v10, %v4254_v57  ;;  %v4291_v2 = vcombine.high %v4240_v10, %v4254_v57  ;;  %v4292_v50 = vcombine.low %v4247_v27, %v4261_v43  ;;  %v4293_v52 = vcombine.high %v4247_v27, %v4261_v43 }
 0x356   : > { %v2998_v37 = vadd.f32 %v5652_v51, %v2613_v34  ;;  %v3071_v18 = vmax.f32 %v2993_v63, 0.0  ;;  %v2617_v42 = vpop.f32.mrb[124].mxu1 }
 0x357   : > { %v2619_v53 = vpop.f32.mrb[125].mxu1  ;;  %v2618_v16 = vadd.f32 %v8038_v12, %v2617_v42 }
 0x358   : > { %v3072_v21 = vmax.f32 %v2998_v37, 0.0 }
 0x35a   : > { %v4230_v20 = vcombine.low %v3071_v18, %v3072_v21  ;;  %v4231_v46 = vcombine.high %v3071_v18, %v3072_v21  ;;  %v2622_v6 = vpop.f32.mrb[126].mxu1  ;;  %v5655_v38 = vpop.f32.mrb[190].mxu0 }
 0x35b   : > { %v2623_v49 = vadd.f32 %v8038_v12, %v2622_v6  ;;  %v2624_v40 = vpop.f32.mrb[127].mxu1  ;;  %v3002_v0 = vpop.f32.mrb[191].mxu0  ;;  %v8189_v6 = vrot.slane %v4291_v2, %v7628_v19  ;;  %v8210_v2 = vrot.slane %v4292_v50, %v7628_v19 }
 0x35c   : > { %v3003_v60 = vadd.f32 %v3002_v0, %v2618_v16  ;;  %v4268_v43 = vrot.slane %v4230_v20, %v7628_v19  ;;  %v4275_v53 = vrot.slane %v4231_v46, %v7628_v19  ;;  %v8192_v0 = vrot.slane %v4290_v36, %v7628_v19 }
 0x35d   : > { %v3008_v54 = vadd.f32 %v5655_v38, %v2623_v49  ;;  %v8207_v38 = vrot.slane %v4293_v52, %v7628_v19  ;;  %v3139_v52 = vld [vmem:[%s8551_s5 + $0x200] sm:$0xff] }
 0x35e   : > { %v3073_v57 = vmax.f32 %v3003_v60, 0.0 }
 0x35f   : > { %v3074_v10 = vmax.f32 %v3008_v54, 0.0 }
 0x361   : > { %v4232_v27 = vcombine.low %v3073_v57, %v3074_v10  ;;  %v4233_v51 = vcombine.high %v3073_v57, %v3074_v10 }
 0x363   : > { %v4282_v21 = vrot.slane %v4232_v27, %v7628_v19  ;;  %v4289_v34 = vrot.slane %v4233_v51, %v7628_v19  ;;  %v3157_v27 = vld [vmem:[%s8551_s5 + $0x290] sm:$0xff]  ;;  %v3158_v51 = vld [vmem:[%s8551_s5 + $0x298] sm:$0xff] }
 0x365   : > { %v4294_v63 = vcombine.low %v4268_v43, %v4282_v21  ;;  %v4295_v37 = vcombine.high %v4268_v43, %v4282_v21  ;;  %v4296_v18 = vcombine.low %v4275_v53, %v4289_v34  ;;  %v4297_v12 = vcombine.high %v4275_v53, %v4289_v34  ;;  %v3141_v34 = vld [vmem:[%s8551_s5 + $0x210] sm:$0xff] }
 0x366   : > { %v8662_v43 = vcombine.high %v7655_v41, %v7677_v55  ;;  %v5840_v21 = vpack.c.bf16 %v3158_v51, %v3157_v27  ;;  %v8663_v41 = vcombine.high %v7645_v3, %v7670_v30  ;;  %v8664_v55 = vcombine.high %v7714_v25, %v7726_v24  ;;  %v3161_v3 = vld [vmem:[%s8551_s5 + $0x2b0] sm:$0xff]  ;;  %v3162_v30 = vld [vmem:[%s8551_s5 + $0x2b8] sm:$0xff] }
 0x367   : > { %v8195_v42 = vrot.slane %v4295_v37, %v7628_v19  ;;  %v8198_v20 = vrot.slane %v4294_v63, %v7628_v19  ;;  %v8201_v46 = vrot.slane %v4297_v12, %v7628_v19  ;;  %v8204_v16 = vrot.slane %v4296_v18, %v7628_v19  ;;  %v3140_v19 = vld [vmem:[%s8551_s5 + $0x208] sm:$0xff]  ;;  %v3142_v63 = vld [vmem:[%s8551_s5 + $0x218] sm:$0xff]  ;;  %v3159_v37 = vld [vmem:[%s8551_s5 + $0x2a0] sm:$0xff] }
 0x368   : > { %v5838_v53 = vpack.c.bf16 %v3140_v19, %v3139_v52  ;;  %v3160_v18 = vld [vmem:[%s8551_s5 + $0x2a8] sm:$0xff]  ;;  %v5842_v12 = vpack.c.bf16 %v3142_v63, %v3141_v34  ;;  %v8665_v25 = vcombine.high %v7720_v33, %v7732_v45  ;;  %v8666_v24 = vcombine.high %v7776_v39, %v7782_v59  ;;  %v3145_v51 = vld [vmem:[%s8551_s5 + $0x230] sm:$0xff]  ;;  %v3163_v33 = vld [vmem:[%s8551_s5 + $0x2c0] sm:$0xff] }
 0x369   : > { %v4358_v36 = vcombine.low %v8189_v6, %v8195_v42  ;;  %v4354_v49 = vcombine.low %v8192_v0, %v8198_v20  ;;  %v4359_v40 = vcombine.high %v8189_v6, %v8195_v42  ;;  %v4355_v60 = vcombine.high %v8192_v0, %v8198_v20  ;;  %v3144_v52 = vld [vmem:[%s8551_s5 + $0x228] sm:$0xff]  ;;  %v8679_v6 = vld [vmem:[#allocation8_spill] sm:$0xff]  ;;  %v8680_v0 = vld [vmem:[#allocation22_spill] sm:$0xff] }
 0x36a   : > { %v4360_v50 = vcombine.low %v8207_v38, %v8201_v46  ;;  %v4356_v54 = vcombine.low %v8210_v2, %v8204_v16  ;;  %v4361_v57 = vcombine.high %v8207_v38, %v8201_v46  ;;  %v4357_v10 = vcombine.high %v8210_v2, %v8204_v16  ;;  %v3164_v45 = vld [vmem:[%s8551_s5 + $0x2c8] sm:$0xff]  ;;  %v8681_v42 = vld [vmem:[#allocation23_spill] sm:$0xff]  ;;  %v5217_v46 = vld [vmem:[%s8552_s6] ss:$0 sm:$0xff] }
 0x36b   : > { %4525 = vmatprep.mubr.f32.mxu1 %v4358_v36  ;;  %v5844_v36 = vpack.c.bf16 %v3160_v18, %v3159_v37  ;;  %v5848_v27 = vpack.c.bf16 %v3162_v30, %v3161_v3  ;;  %v8667_v59 = vcombine.high %v7779_v8, %v7785_v11  ;;  %v8668_v63 = vcombine.high %v7911_v15, %v7945_v61  ;;  %v3148_v8 = vld [vmem:[%s8551_s5 + $0x248] sm:$0xff]  ;;  %v3166_v15 = vld [vmem:[%s8551_s5 + $0x2d8] sm:$0xff]  ;;  %v3149_v3 = vld [vmem:[%s8551_s5 + $0x250] sm:$0xff] }
 0x36c   : > { %4526 = vmatmul.mubr.f32.gmra.mrb[142].mxu1 %v4354_v49  ;;  %v3143_v49 = vld [vmem:[%s8551_s5 + $0x220] sm:$0xff]  ;;  %v8669_v61 = vcombine.high %v7917_v26, %v7948_v9  ;;  %v3150_v30 = vld [vmem:[%s8551_s5 + $0x258] sm:$0xff]  ;;  %v3168_v9 = vld [vmem:[%s8551_s5 + $0x2e8] sm:$0xff]  ;;  %v8682_v20 = vcombine.low %v8680_v0, %v8681_v42 }
 0x36d   : > { %4595 = vmatprep.mubr.f32.mxu1 %v8662_v43  ;;  %v5846_v19 = vpack.c.bf16 %v3144_v52, %v3143_v49  ;;  %v3146_v43 = vld [vmem:[%s8551_s5 + $0x238] sm:$0xff]  ;;  %v3167_v26 = vld [vmem:[%s8551_s5 + $0x2e0] sm:$0xff] }
 0x36e   : > { %v5850_v37 = vpack.c.bf16 %v3146_v43, %v3145_v51 }
 0x370   : > { %4596 = vmatmul.mubr.f32.vlgmr.msra.gmra.mrb[144].mxu1 %v8663_v41  ;;  %v5852_v41 = vpack.c.bf16 %v3164_v45, %v3163_v33  ;;  %v3153_v45 = vld [vmem:[%s8551_s5 + $0x270] sm:$0xff] }
 0x371   : > { %5839 = vmatpush3.bf16.msra.mxu1 %v5838_v53  ;;  %4600 = vmatprep.mubr.f32.mxu1 %v8664_v55  ;;  %v3147_v55 = vld [vmem:[%s8551_s5 + $0x240] sm:$0xff] }
 0x372   : > { %5841 = vmatprep.subr.bf16.mxu1 %v5840_v21  ;;  %v5854_v49 = vpack.c.bf16 %v3148_v8, %v3147_v55  ;;  %v8696_v55 = vld [vmem:[#allocation31_spill] sm:$0xff]  ;;  %v8697_v8 = vld [vmem:[#allocation30_spill] sm:$0xff] }
 0x374   : > { %4601 = vmatmul.mubr.f32.gmra.mrb[146].mxu1 %v8665_v25  ;;  %v5858_v25 = vpack.c.bf16 %v3150_v30, %v3149_v3 }
 0x375   : > { %5843 = vmatpush3.bf16.msra.mxu1 %v5842_v12  ;;  %4605 = vmatprep.mubr.f32.mxu1 %v8666_v24  ;;  %v3165_v12 = vld [vmem:[%s8551_s5 + $0x2d0] sm:$0xff]  ;;  %v5860_v24 = vpack.c.bf16 %v3168_v9, %v3167_v26  ;;  %v8704_v26 = vld [vmem:[#allocation33_spill] sm:$0xff]  ;;  %v8705_v9 = vld [vmem:[#allocation35_spill] sm:$0xff] }
 0x376   : > { %5845 = vmatprep.subr.bf16.mxu1 %v5844_v36  ;;  %v5336_v53 = vpop.f32.mrb[128].mxu1  ;;  %v8670_v36 = vcombine.high %v8018_v44, %v8024_v22  ;;  %v5856_v52 = vpack.c.bf16 %v3166_v15, %v3165_v12  ;;  %v8671_v44 = vcombine.high %v8021_v32, %v8027_v62  ;;  %v8672_v22 = vcombine.high %v8079_v56, %v8085_v7  ;;  %v3169_v32 = vld [vmem:[%s8551_s5 + $0x2f0] sm:$0xff]  ;;  %v3170_v62 = vld [vmem:[%s8551_s5 + $0x2f8] sm:$0xff]  ;;  %v8699_v15 = vld [vmem:[#allocation13_spill] sm:$0xff] }
 0x377   : > { %v5337_v39 = vpop.f32.mrb[129].mxu1  ;;  %v5504_v21 = vpop.f32.mrb[192].mxu0  ;;  %v8673_v56 = vcombine.high %v8082_v31, %v8088_v4  ;;  %v8674_v7 = vcombine.high %v8135_v58, %v8141_v47  ;;  %v5864_v33 = vpack.c.bf16 %v3170_v62, %v3169_v32  ;;  %v8675_v58 = vcombine.high %v8138_v29, %v8144_v17  ;;  %v8711_v32 = vld [vmem:[#allocation16_spill] sm:$0xff]  ;;  %v8712_v62 = vld [vmem:[#allocation38_spill] sm:$0xff] }
 0x378   : > { %4606 = vmatmul.mubr.f32.gmra.mrb[148].mxu1 %v8667_v59  ;;  %v8294_v34 = vadd.f32 %v5337_v39, %v5336_v53  ;;  %v5505_v18 = vpop.f32.mrb[193].mxu0  ;;  %v3154_v39 = vld [vmem:[%s8551_s5 + $0x278] sm:$0xff]  ;;  %v8677_v29 = vcombine.low %v7650_v5, %v7673_v48  ;;  %v8678_v17 = vcombine.low %v7717_v23, %v7729_v28  ;;  %v8687_v5 = vld [vmem:[#allocation10_spill] sm:$0xff]  ;;  %v8692_v28 = vld [vmem:[#allocation28_spill] sm:$0xff]  ;;  %v8698_v12 = vcombine.low %v8696_v55, %v8697_v8 }
 0x379   : > { %5847 = vmatpush3.bf16.msra.mxu1 %v5846_v19  ;;  %4610 = vmatprep.mubr.f32.mxu1 %v8668_v63  ;;  %v8305_v11 = vadd.f32 %v5505_v18, %v5504_v21  ;;  %v3151_v19 = vld [vmem:[%s8551_s5 + $0x260] sm:$0xff]  ;;  %v5866_v47 = vpack.c.bf16 %v3154_v39, %v3153_v45  ;;  %v8676_v63 = vcombine.low %v7661_v1, %v7693_v13  ;;  %v8683_v1 = vld [vmem:[#allocation9_spill] sm:$0xff]  ;;  %v8688_v48 = vld [vmem:[#allocation26_spill] sm:$0xff] }
 0x37a   : > { %5849 = vmatprep.subr.bf16.mxu1 %v5848_v27  ;;  %v3152_v27 = vld [vmem:[%s8551_s5 + $0x268] sm:$0xff]  ;;  %v8684_v13 = vld [vmem:[#allocation24_spill] sm:$0xff]  ;;  %v8691_v23 = vld [vmem:[#allocation11_spill] sm:$0xff]  ;;  %v8731_v0 = vcombine.high %v8704_v26, %v8705_v9  ;;  %v4493_v16 = vadd.f32 %v8294_v34, %v5217_v46 }
 0x37b   : > { %v5862_v51 = vpack.c.bf16 %v3152_v27, %v3151_v19  ;;  %v8709_v19 = vld [vmem:[#allocation37_spill] sm:$0xff]  ;;  %v8719_v45 = vld [vmem:[#allocation18_spill] sm:$0xff] }
 0x37c   : > { %4611 = vmatmul.mubr.f32.gmra.mrb[150].mxu1 %v8669_v61  ;;  %v8700_v61 = vld [vmem:[#allocation32_spill] sm:$0xff]  ;;  %v8720_v39 = vld [vmem:[#allocation42_spill] sm:$0xff] }
 0x37d   : > { %5851 = vmatpush3.bf16.msra.mxu1 %v5850_v37  ;;  %4615 = vmatprep.mubr.f32.mxu1 %v8670_v36  ;;  %v8693_v37 = vld [vmem:[#allocation29_spill] sm:$0xff]  ;;  %v8701_v36 = vld [vmem:[#allocation34_spill] sm:$0xff] }
 0x37e   : > { %5853 = vmatprep.subr.bf16.mxu1 %v5852_v41  ;;  %v8694_v18 = vcombine.low %v8692_v28, %v8693_v37  ;;  %v8695_v41 = vld [vmem:[#allocation12_spill] sm:$0xff] }
 0x380   : > { %4616 = vmatmul.mubr.f32.gmra.mrb[152].mxu1 %v8671_v44  ;;  %v8706_v44 = vcombine.low %v8704_v26, %v8705_v9 }
 0x381   : > { %5855 = vmatpush3.bf16.msra.mxu1 %v5854_v49  ;;  %4620 = vmatprep.mubr.f32.mxu1 %v8672_v22  ;;  %v8702_v49 = vcombine.low %v8700_v61, %v8701_v36 }
 0x382   : > { %5857 = vmatprep.subr.bf16.mxu1 %v5856_v52  ;;  %v8703_v52 = vld [vmem:[#allocation14_spill] sm:$0xff] }
 0x384   : > { %4621 = vmatmul.mubr.f32.gmra.mrb[154].mxu1 %v8673_v56  ;;  %v8713_v56 = vld [vmem:[#allocation39_spill] sm:$0xff] }
 0x385   : > { %5859 = vmatpush3.bf16.msra.mxu1 %v5858_v25  ;;  %4625 = vmatprep.mubr.f32.mxu1 %v8674_v7  ;;  %v5339_v43 = vpop.f32.mrb[130].mxu1  ;;  %v8707_v25 = vld [vmem:[#allocation15_spill] sm:$0xff]  ;;  %v8714_v7 = vcombine.low %v8712_v62, %v8713_v56 }
 0x386   : > { %v5507_v53 = vpop.f32.mrb[194].mxu0  ;;  %5861 = vmatprep.subr.bf16.mxu1 %v5860_v24  ;;  %v5340_v31 = vpop.f32.mrb[131].mxu1  ;;  %v8708_v24 = vld [vmem:[#allocation36_spill] sm:$0xff] }
 0x387   : > { %v5508_v4 = vpop.f32.mrb[195].mxu0  ;;  %v8361_v59 = vadd.f32 %v5340_v31, %v5339_v43  ;;  %v8710_v27 = vcombine.low %v8708_v24, %v8709_v19  ;;  %v8716_v43 = vld [vmem:[#allocation40_spill] sm:$0xff]  ;;  %v8721_v31 = vld [vmem:[#allocation43_spill] sm:$0xff]  ;;  %v8732_v42 = vcombine.high %v8708_v24, %v8709_v19 }
 0x388   : > { %v8363_v21 = vadd.f32 %v5508_v4, %v5507_v53  ;;  %4626 = vmatmul.mubr.f32.gmra.mrb[156].mxu1 %v8675_v58  ;;  %v8717_v53 = vld [vmem:[#allocation41_spill] sm:$0xff]  ;;  %v8722_v4 = vcombine.low %v8720_v39, %v8721_v31  ;;  %v8723_v58 = vld [vmem:[#allocation19_spill] sm:$0xff] }
 0x389   : > { %5863 = vmatpush3.bf16.msra.mxu1 %v5862_v51  ;;  %4630 = vmatprep.mubr.f32.mxu1 %v4359_v40  ;;  %v8715_v51 = vld [vmem:[#allocation17_spill] sm:$0xff] }
 0x38a   : > { %5865 = vmatprep.subr.bf16.mxu1 %v5864_v33  ;;  %v8718_v33 = vcombine.low %v8716_v43, %v8717_v53 }
 0x38c   : > { %4631 = vmatmul.mubr.f32.gmra.mrb[158].mxu1 %v4355_v60 }
 0x38d   : > { %5867 = vmatpush3.bf16.msra.mxu1 %v5866_v47  ;;  %4700 = vmatprep.mubr.f32.mxu1 %v8676_v63  ;;  %v8724_v47 = vld [vmem:[#allocation20_spill] sm:$0xff]  ;;  %v8725_v63 = vld [vmem:[#allocation21_spill] sm:$0xff] }
 0x38e   : > { %5900 = vmatprep.subr.bf16.mxu1 %v7245_v35  ;;  %v8685_v35 = vld [vmem:[#allocation25_spill] sm:$0xff] }
 0x38f   : > { %v8686_v40 = vcombine.low %v8684_v13, %v8685_v35 }
 0x390   : > { %4701 = vmatmul.mubr.f32.vlgmr.msra.gmra.mrb[160].mxu1 %v8677_v29  ;;  %v8726_v29 = vcombine.high %v8684_v13, %v8685_v35 }
 0x391   : > { %5908 = vmatpush3.bf16.msra.mxu1 %v7253_v14  ;;  %4705 = vmatprep.mubr.f32.mxu1 %v8678_v17  ;;  %v8689_v14 = vld [vmem:[#allocation27_spill] sm:$0xff] }
 0x392   : > { %5901 = vmatprep.subr.bf16.mxu1 %v8679_v6  ;;  %v8690_v60 = vcombine.low %v8688_v48, %v8689_v14  ;;  %v8727_v17 = vcombine.high %v8688_v48, %v8689_v14  ;;  %v8728_v6 = vcombine.high %v8692_v28, %v8693_v37 }
 0x394   : > { %4706 = vmatmul.mubr.f32.gmra.mrb[162].mxu1 %v8682_v20  ;;  %v8733_v20 = vcombine.high %v8712_v62, %v8713_v56 }
 0x395   : > { %5909 = vmatpush3.bf16.msra.mxu1 %v8683_v1  ;;  %4710 = vmatprep.mubr.f32.mxu1 %v8686_v40  ;;  %v8734_v1 = vcombine.high %v8716_v43, %v8717_v53  ;;  %v8735_v40 = vcombine.high %v8720_v39, %v8721_v31 }
 0x396   : > { %5902 = vmatprep.subr.bf16.mxu1 %v8687_v5 }
 0x398   : > { %4711 = vmatmul.mubr.f32.gmra.mrb[164].mxu1 %v8690_v60 }
 0x399   : > { %5910 = vmatpush3.bf16.msra.mxu1 %v8691_v23  ;;  %4715 = vmatprep.mubr.f32.mxu1 %v8694_v18 }
 0x39a   : > { %5903 = vmatprep.subr.bf16.mxu1 %v8695_v41 }
 0x39c   : > { %4716 = vmatmul.mubr.f32.gmra.mrb[166].mxu1 %v8698_v12 }
 0x39d   : > { %5911 = vmatpush3.bf16.msra.mxu1 %v8699_v15  ;;  %4720 = vmatprep.mubr.f32.mxu1 %v8702_v49  ;;  %v4498_v49 = vadd.f32 %v8361_v59, %v5217_v46 }
 0x39e   : > { %5904 = vmatprep.subr.bf16.mxu1 %v8703_v52 }
 0x39f   : > { %v5342_v3 = vpop.f32.mrb[132].mxu1 }
 0x3a0   : > { %v5343_v30 = vpop.f32.mrb[133].mxu1  ;;  %4721 = vmatmul.mubr.f32.gmra.mrb[168].mxu1 %v8706_v44 }
 0x3a1   : > { %v5344_v22 = vadd.f32 %v5343_v30, %v5342_v3  ;;  %5912 = vmatpush3.bf16.msra.mxu1 %v8707_v25  ;;  %4725 = vmatprep.mubr.f32.mxu1 %v8710_v27 }
 0x3a2   : > { %5905 = vmatprep.subr.bf16.mxu1 %v8711_v32 }
 0x3a3   : > { %v4503_v9 = vadd.f32 %v5344_v22, %v5217_v46 }
 0x3a4   : > { %4726 = vmatmul.mubr.f32.gmra.mrb[170].mxu1 %v8714_v7 }
 0x3a5   : > { %5913 = vmatpush3.bf16.msra.mxu1 %v8715_v51  ;;  %4730 = vmatprep.mubr.f32.mxu1 %v8718_v33 }
 0x3a6   : > { %5906 = vmatprep.subr.bf16.mxu1 %v8719_v45 }
 0x3a8   : > { %4731 = vmatmul.mubr.f32.gmra.mrb[172].mxu1 %v8722_v4 }
 0x3a9   : > { %5914 = vmatpush3.bf16.msra.mxu1 %v8723_v58  ;;  %4735 = vmatprep.mubr.f32.mxu1 %v4360_v50  ;;  %v8729_v50 = vcombine.high %v8696_v55, %v8697_v8 }
 0x3aa   : > { %5907 = vmatprep.subr.bf16.mxu1 %v8724_v47 }
 0x3ac   : > { %4736 = vmatmul.mubr.f32.gmra.mrb[174].mxu1 %v4356_v54  ;;  %v8730_v54 = vcombine.high %v8700_v61, %v8701_v36 }
 0x3ad   : > { %5915 = vmatpush3.bf16.msra.mxu1 %v8725_v63  ;;  %4815 = vmatprep.mubr.f32.mxu1 %v8726_v29 }
 0x3b0   : > { %4816 = vmatmul.mubr.f32.vlgmr.msra.gmra.mrb[176].mxu1 %v8727_v17 }
 0x3b1   : > { %4820 = vmatprep.mubr.f32.mxu1 %v8728_v6 }
 0x3b4   : > { %4821 = vmatmul.mubr.f32.gmra.mrb[178].mxu1 %v8729_v50 }
 0x3b5   : > { %4825 = vmatprep.mubr.f32.mxu1 %v8730_v54 }
 0x3b8   : > { %4826 = vmatmul.mubr.f32.gmra.mrb[180].mxu1 %v8731_v0 }
 0x3b9   : > { %4830 = vmatprep.mubr.f32.mxu1 %v8732_v42 }
 0x3bc   : > { %4831 = vmatmul.mubr.f32.gmra.mrb[182].mxu1 %v8733_v20 }
 0x3bd   : > { %4835 = vmatprep.mubr.f32.mxu1 %v8734_v1 }
 0x3bf   : > { %v5345_v13 = vpop.f32.mrb[134].mxu1 }
 0x3c0   : > { %v5346_v35 = vpop.f32.mrb[135].mxu1  ;;  %4836 = vmatmul.mubr.f32.gmra.mrb[184].mxu1 %v8735_v40 }
 0x3c1   : > { %v5347_v5 = vadd.f32 %v5346_v35, %v5345_v13  ;;  %4840 = vmatprep.mubr.f32.mxu1 %v4361_v57 }
 0x3c3   : > { %v4508_v27 = vadd.f32 %v5347_v5, %v5217_v46 }
 0x3c4   : > { %4841 = vmatmul.mubr.f32.gmra.mrb[186].mxu1 %v4357_v10 }
 0x3df   : > { %v5348_v48 = vpop.f32.mrb[136].mxu1 }
 0x3e0   : > { %v5349_v14 = vpop.f32.mrb[137].mxu1 }
 0x3e1   : > { %v5350_v60 = vadd.f32 %v5349_v14, %v5348_v48 }
 0x3e3   : > { %v4513_v7 = vadd.f32 %v5350_v60, %v5217_v46 }
 0x3ff   : > { %v5351_v23 = vpop.f32.mrb[138].mxu1 }
 0x400   : > { %v5352_v28 = vpop.f32.mrb[139].mxu1 }
 0x401   : > { %v5353_v37 = vadd.f32 %v5352_v28, %v5351_v23 }
 0x403   : > { %v4518_v33 = vadd.f32 %v5353_v37, %v5217_v46 }
 0x41f   : > { %v5354_v18 = vpop.f32.mrb[140].mxu1 }
 0x420   : > { %v5355_v41 = vpop.f32.mrb[141].mxu1 }
 0x421   : > { %v5356_v55 = vadd.f32 %v5355_v41, %v5354_v18 }
 0x423   : > { %v4523_v4 = vadd.f32 %v5356_v55, %v5217_v46 }
 0x43f   : > { %v5357_v8 = vpop.f32.mrb[142].mxu1 }
 0x440   : > { %v5358_v12 = vpop.f32.mrb[143].mxu1 }
 0x441   : > { %v5359_v15 = vadd.f32 %v5358_v12, %v5357_v8 }
 0x443   : > { %v5392_v38 = vpop.f32.mrb[144].mxu1  ;;  %v4528_v17 = vadd.f32 %v5359_v15, %v5217_v46 }
 0x444   : > { %v5393_v57 = vpop.f32.mrb[145].mxu1 }
 0x445   : > { %v5394_v2 = vadd.f32 %v5393_v57, %v5392_v38 }
 0x447   : > { %v4598_v10 = vadd.f32 %v5394_v2, %v4493_v16  ;;  %v5395_v61 = vpop.f32.mrb[146].mxu1 }
 0x448   : > { %v5396_v36 = vpop.f32.mrb[147].mxu1 }
 0x449   : > { %v5397_v52 = vadd.f32 %v5396_v36, %v5395_v61 }
 0x44b   : > { %v4603_v3 = vadd.f32 %v5397_v52, %v4498_v49  ;;  %v5398_v30 = vpop.f32.mrb[148].mxu1 }
 0x44c   : > { %v5399_v26 = vpop.f32.mrb[149].mxu1 }
 0x44d   : > { %v5400_v44 = vadd.f32 %v5399_v26, %v5398_v30 }
 0x44f   : > { %v4608_v25 = vadd.f32 %v5400_v44, %v4503_v9  ;;  %v5401_v24 = vpop.f32.mrb[150].mxu1 }
 0x450   : > { %v5402_v19 = vpop.f32.mrb[151].mxu1 }
 0x451   : > { %v5403_v32 = vadd.f32 %v5402_v19, %v5401_v24 }
 0x453   : > { %v4613_v62 = vadd.f32 %v5403_v32, %v4508_v27  ;;  %v5404_v56 = vpop.f32.mrb[152].mxu1 }
 0x454   : > { %v5405_v34 = vpop.f32.mrb[153].mxu1 }
 0x455   : > { %v5406_v51 = vadd.f32 %v5405_v34, %v5404_v56 }
 0x457   : > { %v4618_v43 = vadd.f32 %v5406_v51, %v4513_v7  ;;  %v5407_v53 = vpop.f32.mrb[154].mxu1 }
 0x458   : > { %v5408_v59 = vpop.f32.mrb[155].mxu1 }
 0x459   : > { %v5409_v45 = vadd.f32 %v5408_v59, %v5407_v53 }
 0x45b   : > { %v4623_v39 = vadd.f32 %v5409_v45, %v4518_v33  ;;  %v5410_v22 = vpop.f32.mrb[156].mxu1 }
 0x45c   : > { %v5411_v31 = vpop.f32.mrb[157].mxu1 }
 0x45d   : > { %v5412_v58 = vadd.f32 %v5411_v31, %v5410_v22 }
 0x45f   : > { %v4628_v47 = vadd.f32 %v5412_v58, %v4523_v4  ;;  %v5413_v63 = vpop.f32.mrb[158].mxu1 }
 0x460   : > { %v5414_v29 = vpop.f32.mrb[159].mxu1 }
 0x461   : > { %v5415_v6 = vadd.f32 %v5414_v29, %v5413_v63 }
 0x463   : > { %v4633_v50 = vadd.f32 %v5415_v6, %v4528_v17  ;;  %v5448_v54 = vpop.f32.mrb[160].mxu1 }
 0x464   : > { %v5449_v0 = vpop.f32.mrb[161].mxu1 }
 0x465   : > { %v5450_v42 = vadd.f32 %v5449_v0, %v5448_v54 }
 0x467   : > { %v4703_v20 = vadd.f32 %v5450_v42, %v4598_v10  ;;  %v5451_v1 = vpop.f32.mrb[162].mxu1 }
 0x468   : > { %v5452_v13 = vpop.f32.mrb[163].mxu1 }
 0x469   : > { %v4808_v35 = vadd.f32 %v8305_v11, %v4703_v20  ;;  %v5453_v40 = vadd.f32 %v5452_v13, %v5451_v1 }
 0x46b   : > { %v4846_v5 = vmax.f32 %v4808_v35, 0.0  ;;  %v4708_v48 = vadd.f32 %v5453_v40, %v4603_v3  ;;  %v5454_v14 = vpop.f32.mrb[164].mxu1 }
 0x46c   : > { %v5455_v60 = vpop.f32.mrb[165].mxu1 }
 0x46d   : > { %4854 = vst [vmem:[%s8483_s13] sm:$0xff] %v4846_v5  ;;  %v4813_v23 = vadd.f32 %v8363_v21, %v4708_v48  ;;  %v5456_v28 = vadd.f32 %v5455_v60, %v5454_v14 }
 0x46f   : > { %v4847_v37 = vmax.f32 %v4813_v23, 0.0  ;;  %v4713_v18 = vadd.f32 %v5456_v28, %v4608_v25  ;;  %v5457_v41 = vpop.f32.mrb[166].mxu1 }
 0x470   : > { %v5458_v55 = vpop.f32.mrb[167].mxu1 }
 0x471   : > { %4855 = vst [vmem:[%s8483_s13 + $0x8] sm:$0xff] %v4847_v37  ;;  %v5459_v8 = vadd.f32 %v5458_v55, %v5457_v41 }
 0x473   : > { %v4718_v11 = vadd.f32 %v5459_v8, %v4613_v62  ;;  %v5460_v12 = vpop.f32.mrb[168].mxu1 }
 0x474   : > { %v5461_v15 = vpop.f32.mrb[169].mxu1 }
 0x475   : > { %v5462_v46 = vadd.f32 %v5461_v15, %v5460_v12 }
 0x477   : > { %v4723_v38 = vadd.f32 %v5462_v46, %v4618_v43  ;;  %v5463_v57 = vpop.f32.mrb[170].mxu1 }
 0x478   : > { %v5464_v16 = vpop.f32.mrb[171].mxu1 }
 0x479   : > { %v5465_v2 = vadd.f32 %v5464_v16, %v5463_v57 }
 0x47b   : > { %v4728_v10 = vadd.f32 %v5465_v2, %v4623_v39  ;;  %v5466_v61 = vpop.f32.mrb[172].mxu1 }
 0x47c   : > { %v5467_v36 = vpop.f32.mrb[173].mxu1 }
 0x47d   : > { %v5468_v21 = vadd.f32 %v5467_v36, %v5466_v61 }
 0x47f   : > { %v4733_v49 = vadd.f32 %v5468_v21, %v4628_v47  ;;  %v5469_v52 = vpop.f32.mrb[174].mxu1 }
 0x480   : > { %v5470_v3 = vpop.f32.mrb[175].mxu1 }
 0x481   : > { %v5471_v30 = vadd.f32 %v5470_v3, %v5469_v52 }
 0x483   : > { %v4738_v26 = vadd.f32 %v5471_v30, %v4633_v50  ;;  %v5510_v9 = vpop.f32.mrb[176].mxu1 }
 0x484   : > { %v5511_v44 = vpop.f32.mrb[177].mxu1 }
 0x485   : > { %v5512_v25 = vadd.f32 %v5511_v44, %v5510_v9 }
 0x487   : > { %v4818_v24 = vadd.f32 %v5512_v25, %v4713_v18  ;;  %v5513_v19 = vpop.f32.mrb[178].mxu1 }
 0x488   : > { %v5514_v27 = vpop.f32.mrb[179].mxu1 }
 0x489   : > { %v4848_v32 = vmax.f32 %v4818_v24, 0.0  ;;  %v5515_v62 = vadd.f32 %v5514_v27, %v5513_v19 }
 0x48b   : > { %4856 = vst [vmem:[%s8483_s13 + $0x10] sm:$0xff] %v4848_v32  ;;  %v4823_v56 = vadd.f32 %v5515_v62, %v4718_v11  ;;  %v5516_v34 = vpop.f32.mrb[180].mxu1 }
 0x48c   : > { %v5517_v7 = vpop.f32.mrb[181].mxu1 }
 0x48d   : > { %v4849_v51 = vmax.f32 %v4823_v56, 0.0  ;;  %v5518_v43 = vadd.f32 %v5517_v7, %v5516_v34 }
 0x48f   : > { %4857 = vst [vmem:[%s8483_s13 + $0x18] sm:$0xff] %v4849_v51  ;;  %v4828_v53 = vadd.f32 %v5518_v43, %v4723_v38  ;;  %v5519_v59 = vpop.f32.mrb[182].mxu1 }
 0x490   : > { %v5520_v33 = vpop.f32.mrb[183].mxu1 }
 0x491   : > { %v4850_v45 = vmax.f32 %v4828_v53, 0.0  ;;  %v5521_v39 = vadd.f32 %v5520_v33, %v5519_v59 }
 0x493   : > { %4858 = vst [vmem:[%s8483_s13 + $0x20] sm:$0xff] %v4850_v45  ;;  %v4833_v22 = vadd.f32 %v5521_v39, %v4728_v10  ;;  %v5522_v31 = vpop.f32.mrb[184].mxu1 }
 0x494   : > { %v5523_v4 = vpop.f32.mrb[185].mxu1 }
 0x495   : > { %v4851_v58 = vmax.f32 %v4833_v22, 0.0  ;;  %v5524_v47 = vadd.f32 %v5523_v4, %v5522_v31 }
 0x497   : > { %4859 = vst [vmem:[%s8483_s13 + $0x28] sm:$0xff] %v4851_v58  ;;  %v4838_v63 = vadd.f32 %v5524_v47, %v4733_v49  ;;  %v5525_v29 = vpop.f32.mrb[186].mxu1 }
 0x498   : > { %v5526_v17 = vpop.f32.mrb[187].mxu1 }
 0x499   : > { %v4852_v6 = vmax.f32 %v4838_v63, 0.0  ;;  %v5527_v50 = vadd.f32 %v5526_v17, %v5525_v29 }
 0x49b   : > { %4860 = vst [vmem:[%s8483_s13 + $0x30] sm:$0xff] %v4852_v6  ;;  %v4843_v54 = vadd.f32 %v5527_v50, %v4738_v26 }
 0x49d   : > { %v4853_v0 = vmax.f32 %v4843_v54, 0.0 }
 0x49f   : > { %4861 = vst [vmem:[%s8483_s13 + $0x38] sm:$0xff] %v4853_v0 }
 0x4a0   : > { %6033 = shalt.err (!%p6030_p7)
}
 0x4a1   : > { %s6034_s29 = scalar_lea.hbm %s8498_s19, 1024  ;;  %s6038_s14 = scalar_lea.hbm %s8553_s7, 2048 }
 0x4a2   : > { %p6035_p8 = scmp.ne.s32.totalorder %s8498_s19, %s6034_s29  ;;  %p6039_p1 = scmp.lt.u32.totalorder %s8498_s19, %s8553_s7 }
 0x4a3   : > { %p6040_p0 = scmp.lt.u32.totalorder %s6038_s14, %s6034_s29  ;;  %p6042_p6 = scmp.lt.u32.totalorder %s6034_s29, %s8498_s19 }
 0x4a4   : > { %p6036_p11 = pnand %p6035_p8, %p8736_p9 }
 0x4a5   : > { %p6041_p5 = por %p6040_p0, %p6039_p1 }
 0x4a6   : > { %p6037_p13 = pneg %p6036_p11 }
 0x4a7   : > { %p6043_p10 = por %p6042_p6, %p6041_p5 }
 0x4a9   : > { %p6044_p12 = pnand %p6043_p10, %p6037_p13 }
 0x4ab   : > { %6047 = shalt.err (!%p6044_p12)
}
 0x4ac   : > { %s6095_s16 = smov 128   ;;  %s6096_s15 = smov 8  }
 0x4ad   : > { %5920 = dma.vmem_to_hbm [thread:$0]  (%p8736_p9), %s8500_s18, 1024, %s8498_s19, %s8505_s20, %s6095_s16, %s6095_s16, %s6096_s15  }
 0x4ae PF: > { %p5932_p2 = scmp.ge.s32.totalorder %s6086_s27, 2  ;;  %s4891_s21 = sand.u32 1, %s6074_s24  }
 0x4af   : > { %p8737_p3 = scmp.ne.s32.totalorder %s8614_s12, 0  ;;  %s4892_s28 = scalar_lea.sflag [#allocation4], %s4891_s21 }
 0x4b1   : > { %p5927_p4 = pnand %p5932_p2, %p8737_p3 }
 0x4b3   : > { %6069 = dma.done.wait (!%p5927_p4), %s4892_s28, 1024  }
 0x4b4   : > { %6071 = vsyncadd (!%p5927_p4), %s4892_s28, 4294966272  ;;  %p18_p7 = scmp.ge.s32.totalorder %s6162_s30, 4   ;;  %s8738_s24 = smov %s6078_s25 }
 0x4b5   : > { %s8739_s25 = smov %s6082_s26  ;;  %s8740_s26 = smov %s6173_s10 }
 0x4b6   : > { %s8741_s27 = smov %s6162_s30  ;;  %20 = sbr.rel (!%p18_p7) target bundleno = 4 (0x4), region = 88 }
 0x4bd   :  { %4897 = vsyncpa [#allocation3], 1 }
 0x4be   :  { %4899 = vsyncpa [#allocation3 + $0x1], 1 }
 0x4bf   :  { %4900 = vsyncpa [#allocation4], 1 }
 0x4c0   :  { %4902 = vsyncpa [#allocation4 + $0x1], 1 }

</bundles_post_ra>
